<compile_context>
chip_gen: v7x
topology: tpu7x:2x2x1
jax: 0.10.0
libtpu: 0.0.40
codegen_flags: <defaults>
</compile_context>

<pallas_src>
import functools

import jax
import jax.numpy as jnp
from jax.experimental import pallas as pl
from jax.experimental.pallas import tpu as pltpu


def _residual_block_kernel(x_ref, w1_ref, b1_ref, w2_ref, b2_ref,
                           out2_ref, out1_ref,
                           pad1_ref, acc_ref, *, H, W):
    """One image per grid step.

    x_ref   : ((H+4)*W, Cin)  input, zero-padded by 2 rows top/bottom,
                              flattened (h, w) -> row h*W + w, C on lanes.
    w*_ref  : (9, Cin, Cout)  per-tap weights, tap index = kh*3 + kw.
    b*_ref  : (1, Cout)       f32 biases.
    out*_ref: (H*W, Cout)     f32 outputs (same flattened layout).
    pad1_ref: ((H+4)*W, Cout) VMEM scratch: H-padded ReLU(conv1) for conv2.
    acc_ref : (H*W, Cout)     f32 VMEM accumulator, reused by both convs.
    """
    HW = H * W
    f32 = jnp.float32
    cout = out1_ref.shape[-1]

    # Column masks for the wrap-around reads of the kw=0 / kw=2 taps
    # (W is not padded; the out-of-image column is zeroed here instead).
    col = jax.lax.broadcasted_iota(jnp.int32, (HW, 1), 0) % W
    not_first_col = col != 0           # kills tap kw=0 at w == 0
    not_last_col = col != (W - 1)      # kills tap kw=2 at w == W-1

    def conv3x3(src_ref, w_ref):
        # 3x3 conv over the flattened, H-padded layout: every tap is a plain
        # sublane-offset slice of src_ref -- no strided repack copies.
        acc_ref[...] = jnp.zeros_like(acc_ref)
        for kw in range(3):
            g = jnp.zeros((HW, cout), f32)
            for kh in range(3):
                off = (kh + 1) * W + (kw - 1)        # static offset
                patch = src_ref[off:off + HW, :]
                g = g + jnp.dot(patch, w_ref[kh * 3 + kw],
                                preferred_element_type=f32)
            if kw == 0:
                g = jnp.where(not_first_col, g, 0.0)
            elif kw == 2:
                g = jnp.where(not_last_col, g, 0.0)
            acc_ref[...] = acc_ref[...] + g
        return acc_ref[...]

    # ---- conv1 + bias + ReLU ---------------------------------------------
    out1 = jnp.maximum(conv3x3(x_ref, w1_ref) + b1_ref[...], 0.0)
    out1_ref[...] = out1

    # ---- stage ReLU(conv1) for conv2: zero only the 2-row halos ------------
    cdt = pad1_ref.dtype
    halo = jnp.zeros((2 * W, cout), cdt)
    pad1_ref[0:2 * W, :] = halo
    pad1_ref[(H + 2) * W:(H + 4) * W, :] = halo
    pad1_ref[2 * W:2 * W + HW, :] = out1.astype(cdt)

    # ---- conv2 + bias + residual add + ReLU --------------------------------
    residual = x_ref[2 * W:2 * W + HW, :].astype(f32)
    out2 = conv3x3(pad1_ref, w2_ref) + b2_ref[...] + residual
    out2_ref[...] = jnp.maximum(out2, 0.0)


def residual_block(x_nchw, w1, b1, w2, b2, *, compute_dtype=jnp.float32):
    """ResidualBlock forward.

    x_nchw: (N, C, H, W).  w*: (3, 3, Cin, Cout) HWIO.  b*: (Cout,).
    Returns (out2, out1) in NCHW (PyTorch convention).

    compute_dtype: dtype fed to the MXU matmuls.  f32 by default; pass
    jnp.bfloat16 on v6e/v7x for ~2x MXU throughput and half the HBM/VMEM
    traffic (accumulation / bias / ReLU / residual stay in f32).
    """
    N, C, H, W = x_nchw.shape
    assert w1.shape[:2] == (3, 3) and w2.shape[:2] == (3, 3)
    cin, cout = int(w1.shape[2]), int(w1.shape[3])
    assert cin == C and cin == cout, "residual add needs in_ch == out_ch"

    # NHWC, pad H only by 2 rows each side, flatten (h, w) onto the sublane
    # axis so the kernel's 9 conv taps are plain leading-axis slices.
    x = jnp.transpose(x_nchw, (0, 2, 3, 1)).astype(compute_dtype)
    xp = jnp.pad(x, ((0, 0), (2, 2), (0, 0), (0, 0)))
    Rp = (H + 4) * W
    HW = H * W
    x_flat = xp.reshape(N, Rp, cin)

    w1m = w1.reshape(9, cin, cout).astype(compute_dtype)
    w2m = w2.reshape(9, cout, cout).astype(compute_dtype)
    b1m = b1.reshape(1, cout).astype(jnp.float32)
    b2m = b2.reshape(1, cout).astype(jnp.float32)

    # Size the scoped-VMEM limit off the chip we are actually on
    # (v5e/v6e: 128 MiB physical, v7x: 64 MiB).
    try:
        vmem_cap = int(pltpu.get_tpu_info().vmem_capacity_bytes)
        cp_extra = {"vmem_limit_bytes": min(vmem_cap // 2, 96 * 1024 * 1024)}
    except Exception:
        cp_extra = {}

    kernel = functools.partial(_residual_block_kernel, H=H, W=W)

    out2, out1 = pl.pallas_call(
        kernel,
        grid=(N,),
        in_specs=[
            pl.BlockSpec((None, Rp, cin), lambda n: (n, 0, 0)),     # x
            pl.BlockSpec((9, cin, cout), lambda n: (0, 0, 0)),      # w1
            pl.BlockSpec((1, cout), lambda n: (0, 0)),              # b1
            pl.BlockSpec((9, cout, cout), lambda n: (0, 0, 0)),     # w2
            pl.BlockSpec((1, cout), lambda n: (0, 0)),              # b2
        ],
        out_specs=(
            pl.BlockSpec((None, HW, cout), lambda n: (n, 0, 0)),    # out2
            pl.BlockSpec((None, HW, cout), lambda n: (n, 0, 0)),    # out1
        ),
        out_shape=(
            jax.ShapeDtypeStruct((N, HW, cout), jnp.float32),
            jax.ShapeDtypeStruct((N, HW, cout), jnp.float32),
        ),
        scratch_shapes=[
            pltpu.VMEM((Rp, cout), compute_dtype),   # H-padded ReLU(conv1)
            pltpu.VMEM((HW, cout), jnp.float32),     # shared f32 accumulator
        ],
        compiler_params=pltpu.CompilerParams(
            dimension_semantics=("parallel",), **cp_extra),
    )(x_flat, w1m, b1m, w2m, b2m)

    out1 = jnp.transpose(out1.reshape(N, H, W, cout), (0, 3, 1, 2))
    out2 = jnp.transpose(out2.reshape(N, H, W, cout), (0, 3, 1, 2))
    return out2, out1


# ------------------------- pure-JAX reference -------------------------
def _conv3x3_ref(x_nhwc, w_hwio, b):
    y = jax.lax.conv_general_dilated(
        x_nhwc, w_hwio, window_strides=(1, 1), padding="SAME",
        dimension_numbers=("NHWC", "HWIO", "NHWC"))
    return y + b.reshape(1, 1, 1, -1)


def residual_block_ref(x_nchw, w1, b1, w2, b2):
    x = jnp.transpose(x_nchw, (0, 2, 3, 1)).astype(jnp.float32)
    out1 = jax.nn.relu(_conv3x3_ref(x, w1, b1))
    out2 = jax.nn.relu(_conv3x3_ref(out1, w2, b2) + x)
    return (jnp.transpose(out2, (0, 3, 1, 2)),
            jnp.transpose(out1, (0, 3, 1, 2)))


if __name__ == "__main__":
    # Small shapes consistent with the module defaults: residual add (no
    # downsample) requires in_channels == out_channels.
    N, C, H, W = 2, 4, 16, 16
    K = 3

    key = jax.random.PRNGKey(0)
    kx, k1, kb1, k2, kb2 = jax.random.split(key, 5)
    x = jax.random.normal(kx, (N, C, H, W), dtype=jnp.float32)
    w1 = 0.1 * jax.random.normal(k1, (K, K, C, C), dtype=jnp.float32)
    b1 = 0.1 * jax.random.normal(kb1, (C,), dtype=jnp.float32)
    w2 = 0.1 * jax.random.normal(k2, (K, K, C, C), dtype=jnp.float32)
    b2 = 0.1 * jax.random.normal(kb2, (C,), dtype=jnp.float32)

    # f32 path (exact PyTorch semantics).
    out2, out1 = residual_block(x, w1, b1, w2, b2)
    jax.block_until_ready((out2, out1))

    ref2, ref1 = residual_block_ref(x, w1, b1, w2, b2)
    assert out1.shape == (N, C, H, W) and out2.shape == (N, C, H, W)
    assert jnp.allclose(out1, ref1, atol=1e-4, rtol=1e-4)
    assert jnp.allclose(out2, ref2, atol=1e-4, rtol=1e-4)

    # bf16 MXU path (v6e/v7x perf mode): f32 accumulate / bias / ReLU /
    # residual, looser tolerance only due to bf16 input rounding.
    out2b, out1b = residual_block(x, w1, b1, w2, b2,
                                  compute_dtype=jnp.bfloat16)
    jax.block_until_ready((out2b, out1b))
    assert jnp.allclose(out1b, ref1, atol=5e-2, rtol=5e-2)
    assert jnp.allclose(out2b, ref2, atol=5e-2, rtol=5e-2)

    print("KERNEL_OK")
</pallas_src>

<mosaic_0001>
module attributes {stable_mosaic.version = 11 : i64} {
  func.func @_residual_block_kernel(%arg0: i32, %arg1: memref<1x320x4xf32, #tpu.memory_space<vmem>>, %arg2: memref<9x4x4xf32, #tpu.memory_space<vmem>>, %arg3: memref<1x4xf32, #tpu.memory_space<vmem>>, %arg4: memref<9x4x4xf32, #tpu.memory_space<vmem>>, %arg5: memref<1x4xf32, #tpu.memory_space<vmem>>, %arg6: memref<1x256x4xf32, #tpu.memory_space<vmem>>, %arg7: memref<1x256x4xf32, #tpu.memory_space<vmem>>, %arg8: memref<320x4xf32, #tpu.memory_space<vmem>>, %arg9: memref<256x4xf32, #tpu.memory_space<vmem>>) attributes {dimension_semantics = [#tpu.dimension_semantics<parallel>], iteration_bounds = array<i64: 2>, scalar_prefetch = 0 : i64, scratch_operands = 2 : i64, tpu.core_type = #tpu.core_type<tc>, window_params = [{transform_indices = @transform_0, window_bounds = array<i64: 1, 320, 4>}, {pipeline_mode = #tpu.pipeline_mode<synchronous>, transform_indices = @transform_1, window_bounds = array<i64: 9, 4, 4>}, {pipeline_mode = #tpu.pipeline_mode<synchronous>, transform_indices = @transform_2, window_bounds = array<i64: 1, 4>}, {pipeline_mode = #tpu.pipeline_mode<synchronous>, transform_indices = @transform_3, window_bounds = array<i64: 9, 4, 4>}, {pipeline_mode = #tpu.pipeline_mode<synchronous>, transform_indices = @transform_4, window_bounds = array<i64: 1, 4>}, {transform_indices = @transform_5, window_bounds = array<i64: 1, 256, 4>}, {transform_indices = @transform_6, window_bounds = array<i64: 1, 256, 4>}]} {
    %0 = tpu.iota {dimensions = array<i32: 0>} : vector<256x1xi32>
    %c16_i32 = arith.constant 16 : i32
    %c0_i32 = arith.constant 0 : i32
    %1 = arith.cmpi eq, %c16_i32, %c0_i32 : i32
    %c1_i32 = arith.constant 1 : i32
    %2 = arith.select %1, %c1_i32, %c16_i32 : i32
    %3 = vector.broadcast %2 : i32 to vector<256x1xi32>
    %4 = arith.remsi %0, %3 : vector<256x1xi32>
    %c0_i32_0 = arith.constant 0 : i32
    %5 = vector.broadcast %c0_i32_0 : i32 to vector<256x1xi32>
    %6 = arith.cmpi ne, %4, %5 : vector<256x1xi32>
    %c0_i32_1 = arith.constant 0 : i32
    %7 = vector.broadcast %c0_i32_1 : i32 to vector<256x1xi32>
    %8 = arith.cmpi slt, %4, %7 : vector<256x1xi32>
    %c0_i32_2 = arith.constant 0 : i32
    %9 = arith.cmpi slt, %2, %c0_i32_2 : i32
    %10 = vector.broadcast %9 : i1 to vector<256x1xi1>
    %11 = vector.broadcast %10 : vector<256x1xi1> to vector<256x1xi1>
    %12 = arith.xori %8, %11 : vector<256x1xi1>
    %13 = arith.andi %12, %6 : vector<256x1xi1>
    %14 = vector.broadcast %2 : i32 to vector<256x1xi32>
    %15 = arith.addi %4, %14 : vector<256x1xi32>
    %16 = arith.select %13, %15, %4 : vector<256x1xi1>, vector<256x1xi32>
    %c0_i32_3 = arith.constant 0 : i32
    %17 = vector.broadcast %c0_i32_3 : i32 to vector<256x1xi32>
    %18 = arith.cmpi ne, %16, %17 : vector<256x1xi32>
    %c15_i32 = arith.constant 15 : i32
    %19 = vector.broadcast %c15_i32 : i32 to vector<256x1xi32>
    %20 = arith.cmpi ne, %16, %19 : vector<256x1xi32>
    %cst = arith.constant 0.000000e+00 : f32
    %21 = vector.broadcast %cst : f32 to vector<256x4xf32>
    %c0 = arith.constant 0 : index
    %c0_4 = arith.constant 0 : index
    %22 = vector.load %arg9[%c0, %c0_4] : memref<256x4xf32, #tpu.memory_space<vmem>>, vector<256x4xf32>
    tpu.vector_store %arg9[%c0, %c0_4], %21 {strides = array<i32>} : memref<256x4xf32, #tpu.memory_space<vmem>>, vector<256x4xf32>,
    %cst_5 = arith.constant 0.000000e+00 : f32
    %23 = vector.broadcast %cst_5 : f32 to vector<256x4xf32>
    %c0_6 = arith.constant 0 : index
    %c15 = arith.constant 15 : index
    %c0_7 = arith.constant 0 : index
    %24 = vector.load %arg1[%c0_6, %c15, %c0_7] : memref<1x320x4xf32, #tpu.memory_space<vmem>>, vector<1x256x4xf32>
    %25 = vector.shape_cast %24 : vector<1x256x4xf32> to vector<256x4xf32>
    %c0_8 = arith.constant 0 : index
    %c0_9 = arith.constant 0 : index
    %c0_10 = arith.constant 0 : index
    %26 = vector.load %arg2[%c0_8, %c0_9, %c0_10] : memref<9x4x4xf32, #tpu.memory_space<vmem>>, vector<1x4x4xf32>
    %27 = vector.shape_cast %26 : vector<1x4x4xf32> to vector<4x4xf32>
    %cst_11 = arith.constant dense<0.000000e+00> : vector<256x4xf32>
    %28 = tpu.matmul %25, %27, %cst_11 {dimension_numbers = #tpu.dot_dimension_numbers<[1], [0], [0], [1], [0, 0, 1, 1], [], []>} : vector<256x4xf32>, vector<4x4xf32>, vector<256x4xf32> -> vector<256x4xf32>
    %29 = arith.addf %23, %28 : vector<256x4xf32>
    %c0_12 = arith.constant 0 : index
    %c31 = arith.constant 31 : index
    %c0_13 = arith.constant 0 : index
    %30 = vector.load %arg1[%c0_12, %c31, %c0_13] : memref<1x320x4xf32, #tpu.memory_space<vmem>>, vector<1x256x4xf32>
    %31 = vector.shape_cast %30 : vector<1x256x4xf32> to vector<256x4xf32>
    %c3 = arith.constant 3 : index
    %c0_14 = arith.constant 0 : index
    %c0_15 = arith.constant 0 : index
    %32 = vector.load %arg2[%c3, %c0_14, %c0_15] : memref<9x4x4xf32, #tpu.memory_space<vmem>>, vector<1x4x4xf32>
    %33 = vector.shape_cast %32 : vector<1x4x4xf32> to vector<4x4xf32>
    %cst_16 = arith.constant dense<0.000000e+00> : vector<256x4xf32>
    %34 = tpu.matmul %31, %33, %cst_16 {dimension_numbers = #tpu.dot_dimension_numbers<[1], [0], [0], [1], [0, 0, 1, 1], [], []>} : vector<256x4xf32>, vector<4x4xf32>, vector<256x4xf32> -> vector<256x4xf32>
    %35 = arith.addf %29, %34 : vector<256x4xf32>
    %c0_17 = arith.constant 0 : index
    %c47 = arith.constant 47 : index
    %c0_18 = arith.constant 0 : index
    %36 = vector.load %arg1[%c0_17, %c47, %c0_18] : memref<1x320x4xf32, #tpu.memory_space<vmem>>, vector<1x256x4xf32>
    %37 = vector.shape_cast %36 : vector<1x256x4xf32> to vector<256x4xf32>
    %c6 = arith.constant 6 : index
    %c0_19 = arith.constant 0 : index
    %c0_20 = arith.constant 0 : index
    %38 = vector.load %arg2[%c6, %c0_19, %c0_20] : memref<9x4x4xf32, #tpu.memory_space<vmem>>, vector<1x4x4xf32>
    %39 = vector.shape_cast %38 : vector<1x4x4xf32> to vector<4x4xf32>
    %cst_21 = arith.constant dense<0.000000e+00> : vector<256x4xf32>
    %40 = tpu.matmul %37, %39, %cst_21 {dimension_numbers = #tpu.dot_dimension_numbers<[1], [0], [0], [1], [0, 0, 1, 1], [], []>} : vector<256x4xf32>, vector<4x4xf32>, vector<256x4xf32> -> vector<256x4xf32>
    %41 = arith.addf %35, %40 : vector<256x4xf32>
    %cst_22 = arith.constant 0.000000e+00 : f32
    %42 = vector.shape_cast %18 : vector<256x1xi1> to vector<256x1xi1>
    %43 = vector.broadcast %42 : vector<256x1xi1> to vector<256x4xi1>
    %44 = vector.broadcast %cst_22 : f32 to vector<256x4xf32>
    %45 = arith.select %43, %41, %44 : vector<256x4xi1>, vector<256x4xf32>
    %c0_23 = arith.constant 0 : index
    %c0_24 = arith.constant 0 : index
    %46 = vector.load %arg9[%c0_23, %c0_24] : memref<256x4xf32, #tpu.memory_space<vmem>>, vector<256x4xf32>
    %47 = arith.addf %46, %45 : vector<256x4xf32>
    %c0_25 = arith.constant 0 : index
    %c0_26 = arith.constant 0 : index
    %48 = vector.load %arg9[%c0_25, %c0_26] : memref<256x4xf32, #tpu.memory_space<vmem>>, vector<256x4xf32>
    tpu.vector_store %arg9[%c0_25, %c0_26], %47 {strides = array<i32>} : memref<256x4xf32, #tpu.memory_space<vmem>>, vector<256x4xf32>,
    %cst_27 = arith.constant 0.000000e+00 : f32
    %49 = vector.broadcast %cst_27 : f32 to vector<256x4xf32>
    %c0_28 = arith.constant 0 : index
    %c16 = arith.constant 16 : index
    %c0_29 = arith.constant 0 : index
    %50 = vector.load %arg1[%c0_28, %c16, %c0_29] : memref<1x320x4xf32, #tpu.memory_space<vmem>>, vector<1x256x4xf32>
    %51 = vector.shape_cast %50 : vector<1x256x4xf32> to vector<256x4xf32>
    %c1 = arith.constant 1 : index
    %c0_30 = arith.constant 0 : index
    %c0_31 = arith.constant 0 : index
    %52 = vector.load %arg2[%c1, %c0_30, %c0_31] : memref<9x4x4xf32, #tpu.memory_space<vmem>>, vector<1x4x4xf32>
    %53 = vector.shape_cast %52 : vector<1x4x4xf32> to vector<4x4xf32>
    %cst_32 = arith.constant dense<0.000000e+00> : vector<256x4xf32>
    %54 = tpu.matmul %51, %53, %cst_32 {dimension_numbers = #tpu.dot_dimension_numbers<[1], [0], [0], [1], [0, 0, 1, 1], [], []>} : vector<256x4xf32>, vector<4x4xf32>, vector<256x4xf32> -> vector<256x4xf32>
    %55 = arith.addf %49, %54 : vector<256x4xf32>
    %c0_33 = arith.constant 0 : index
    %c32 = arith.constant 32 : index
    %c0_34 = arith.constant 0 : index
    %56 = vector.load %arg1[%c0_33, %c32, %c0_34] : memref<1x320x4xf32, #tpu.memory_space<vmem>>, vector<1x256x4xf32>
    %57 = vector.shape_cast %56 : vector<1x256x4xf32> to vector<256x4xf32>
    %c4 = arith.constant 4 : index
    %c0_35 = arith.constant 0 : index
    %c0_36 = arith.constant 0 : index
    %58 = vector.load %arg2[%c4, %c0_35, %c0_36] : memref<9x4x4xf32, #tpu.memory_space<vmem>>, vector<1x4x4xf32>
    %59 = vector.shape_cast %58 : vector<1x4x4xf32> to vector<4x4xf32>
    %cst_37 = arith.constant dense<0.000000e+00> : vector<256x4xf32>
    %60 = tpu.matmul %57, %59, %cst_37 {dimension_numbers = #tpu.dot_dimension_numbers<[1], [0], [0], [1], [0, 0, 1, 1], [], []>} : vector<256x4xf32>, vector<4x4xf32>, vector<256x4xf32> -> vector<256x4xf32>
    %61 = arith.addf %55, %60 : vector<256x4xf32>
    %c0_38 = arith.constant 0 : index
    %c48 = arith.constant 48 : index
    %c0_39 = arith.constant 0 : index
    %62 = vector.load %arg1[%c0_38, %c48, %c0_39] : memref<1x320x4xf32, #tpu.memory_space<vmem>>, vector<1x256x4xf32>
    %63 = vector.shape_cast %62 : vector<1x256x4xf32> to vector<256x4xf32>
    %c7 = arith.constant 7 : index
    %c0_40 = arith.constant 0 : index
    %c0_41 = arith.constant 0 : index
    %64 = vector.load %arg2[%c7, %c0_40, %c0_41] : memref<9x4x4xf32, #tpu.memory_space<vmem>>, vector<1x4x4xf32>
    %65 = vector.shape_cast %64 : vector<1x4x4xf32> to vector<4x4xf32>
    %cst_42 = arith.constant dense<0.000000e+00> : vector<256x4xf32>
    %66 = tpu.matmul %63, %65, %cst_42 {dimension_numbers = #tpu.dot_dimension_numbers<[1], [0], [0], [1], [0, 0, 1, 1], [], []>} : vector<256x4xf32>, vector<4x4xf32>, vector<256x4xf32> -> vector<256x4xf32>
    %67 = arith.addf %61, %66 : vector<256x4xf32>
    %c0_43 = arith.constant 0 : index
    %c0_44 = arith.constant 0 : index
    %68 = vector.load %arg9[%c0_43, %c0_44] : memref<256x4xf32, #tpu.memory_space<vmem>>, vector<256x4xf32>
    %69 = arith.addf %68, %67 : vector<256x4xf32>
    %c0_45 = arith.constant 0 : index
    %c0_46 = arith.constant 0 : index
    %70 = vector.load %arg9[%c0_45, %c0_46] : memref<256x4xf32, #tpu.memory_space<vmem>>, vector<256x4xf32>
    tpu.vector_store %arg9[%c0_45, %c0_46], %69 {strides = array<i32>} : memref<256x4xf32, #tpu.memory_space<vmem>>, vector<256x4xf32>,
    %cst_47 = arith.constant 0.000000e+00 : f32
    %71 = vector.broadcast %cst_47 : f32 to vector<256x4xf32>
    %c0_48 = arith.constant 0 : index
    %c17 = arith.constant 17 : index
    %c0_49 = arith.constant 0 : index
    %72 = vector.load %arg1[%c0_48, %c17, %c0_49] : memref<1x320x4xf32, #tpu.memory_space<vmem>>, vector<1x256x4xf32>
    %73 = vector.shape_cast %72 : vector<1x256x4xf32> to vector<256x4xf32>
    %c2 = arith.constant 2 : index
    %c0_50 = arith.constant 0 : index
    %c0_51 = arith.constant 0 : index
    %74 = vector.load %arg2[%c2, %c0_50, %c0_51] : memref<9x4x4xf32, #tpu.memory_space<vmem>>, vector<1x4x4xf32>
    %75 = vector.shape_cast %74 : vector<1x4x4xf32> to vector<4x4xf32>
    %cst_52 = arith.constant dense<0.000000e+00> : vector<256x4xf32>
    %76 = tpu.matmul %73, %75, %cst_52 {dimension_numbers = #tpu.dot_dimension_numbers<[1], [0], [0], [1], [0, 0, 1, 1], [], []>} : vector<256x4xf32>, vector<4x4xf32>, vector<256x4xf32> -> vector<256x4xf32>
    %77 = arith.addf %71, %76 : vector<256x4xf32>
    %c0_53 = arith.constant 0 : index
    %c33 = arith.constant 33 : index
    %c0_54 = arith.constant 0 : index
    %78 = vector.load %arg1[%c0_53, %c33, %c0_54] : memref<1x320x4xf32, #tpu.memory_space<vmem>>, vector<1x256x4xf32>
    %79 = vector.shape_cast %78 : vector<1x256x4xf32> to vector<256x4xf32>
    %c5 = arith.constant 5 : index
    %c0_55 = arith.constant 0 : index
    %c0_56 = arith.constant 0 : index
    %80 = vector.load %arg2[%c5, %c0_55, %c0_56] : memref<9x4x4xf32, #tpu.memory_space<vmem>>, vector<1x4x4xf32>
    %81 = vector.shape_cast %80 : vector<1x4x4xf32> to vector<4x4xf32>
    %cst_57 = arith.constant dense<0.000000e+00> : vector<256x4xf32>
    %82 = tpu.matmul %79, %81, %cst_57 {dimension_numbers = #tpu.dot_dimension_numbers<[1], [0], [0], [1], [0, 0, 1, 1], [], []>} : vector<256x4xf32>, vector<4x4xf32>, vector<256x4xf32> -> vector<256x4xf32>
    %83 = arith.addf %77, %82 : vector<256x4xf32>
    %c0_58 = arith.constant 0 : index
    %c49 = arith.constant 49 : index
    %c0_59 = arith.constant 0 : index
    %84 = vector.load %arg1[%c0_58, %c49, %c0_59] : memref<1x320x4xf32, #tpu.memory_space<vmem>>, vector<1x256x4xf32>
    %85 = vector.shape_cast %84 : vector<1x256x4xf32> to vector<256x4xf32>
    %c8 = arith.constant 8 : index
    %c0_60 = arith.constant 0 : index
    %c0_61 = arith.constant 0 : index
    %86 = vector.load %arg2[%c8, %c0_60, %c0_61] : memref<9x4x4xf32, #tpu.memory_space<vmem>>, vector<1x4x4xf32>
    %87 = vector.shape_cast %86 : vector<1x4x4xf32> to vector<4x4xf32>
    %cst_62 = arith.constant dense<0.000000e+00> : vector<256x4xf32>
    %88 = tpu.matmul %85, %87, %cst_62 {dimension_numbers = #tpu.dot_dimension_numbers<[1], [0], [0], [1], [0, 0, 1, 1], [], []>} : vector<256x4xf32>, vector<4x4xf32>, vector<256x4xf32> -> vector<256x4xf32>
    %89 = arith.addf %83, %88 : vector<256x4xf32>
    %cst_63 = arith.constant 0.000000e+00 : f32
    %90 = vector.shape_cast %20 : vector<256x1xi1> to vector<256x1xi1>
    %91 = vector.broadcast %90 : vector<256x1xi1> to vector<256x4xi1>
    %92 = vector.broadcast %cst_63 : f32 to vector<256x4xf32>
    %93 = arith.select %91, %89, %92 : vector<256x4xi1>, vector<256x4xf32>
    %c0_64 = arith.constant 0 : index
    %c0_65 = arith.constant 0 : index
    %94 = vector.load %arg9[%c0_64, %c0_65] : memref<256x4xf32, #tpu.memory_space<vmem>>, vector<256x4xf32>
    %95 = arith.addf %94, %93 : vector<256x4xf32>
    %c0_66 = arith.constant 0 : index
    %c0_67 = arith.constant 0 : index
    %96 = vector.load %arg9[%c0_66, %c0_67] : memref<256x4xf32, #tpu.memory_space<vmem>>, vector<256x4xf32>
    tpu.vector_store %arg9[%c0_66, %c0_67], %95 {strides = array<i32>} : memref<256x4xf32, #tpu.memory_space<vmem>>, vector<256x4xf32>,
    %c0_68 = arith.constant 0 : index
    %c0_69 = arith.constant 0 : index
    %97 = vector.load %arg9[%c0_68, %c0_69] : memref<256x4xf32, #tpu.memory_space<vmem>>, vector<256x4xf32>
    %c0_70 = arith.constant 0 : index
    %c0_71 = arith.constant 0 : index
    %98 = vector.load %arg3[%c0_70, %c0_71] : memref<1x4xf32, #tpu.memory_space<vmem>>, vector<1x4xf32>
    %99 = vector.broadcast %98 : vector<1x4xf32> to vector<256x4xf32>
    %100 = arith.addf %97, %99 : vector<256x4xf32>
    %cst_72 = arith.constant 0.000000e+00 : f32
    %101 = vector.broadcast %cst_72 : f32 to vector<256x4xf32>
    %102 = arith.maximumf %100, %101 : vector<256x4xf32>
    %c0_73 = arith.constant 0 : index
    %c0_74 = arith.constant 0 : index
    %c0_75 = arith.constant 0 : index
    %103 = vector.load %arg7[%c0_73, %c0_74, %c0_75] : memref<1x256x4xf32, #tpu.memory_space<vmem>>, vector<1x256x4xf32>
    %104 = vector.shape_cast %103 : vector<1x256x4xf32> to vector<256x4xf32>
    %105 = vector.shape_cast %102 : vector<256x4xf32> to vector<1x256x4xf32>
    tpu.vector_store %arg7[%c0_73, %c0_74, %c0_75], %105 {strides = array<i32>} : memref<1x256x4xf32, #tpu.memory_space<vmem>>, vector<1x256x4xf32>,
    %cst_76 = arith.constant 0.000000e+00 : f32
    %106 = vector.broadcast %cst_76 : f32 to vector<32x4xf32>
    %c0_77 = arith.constant 0 : index
    %c0_78 = arith.constant 0 : index
    %107 = vector.load %arg8[%c0_77, %c0_78] : memref<320x4xf32, #tpu.memory_space<vmem>>, vector<32x4xf32>
    tpu.vector_store %arg8[%c0_77, %c0_78], %106 {strides = array<i32>} : memref<320x4xf32, #tpu.memory_space<vmem>>, vector<32x4xf32>,
    %c288 = arith.constant 288 : index
    %c0_79 = arith.constant 0 : index
    %108 = vector.load %arg8[%c288, %c0_79] : memref<320x4xf32, #tpu.memory_space<vmem>>, vector<32x4xf32>
    tpu.vector_store %arg8[%c288, %c0_79], %106 {strides = array<i32>} : memref<320x4xf32, #tpu.memory_space<vmem>>, vector<32x4xf32>,
    %c32_80 = arith.constant 32 : index
    %c0_81 = arith.constant 0 : index
    %109 = vector.load %arg8[%c32_80, %c0_81] : memref<320x4xf32, #tpu.memory_space<vmem>>, vector<256x4xf32>
    tpu.vector_store %arg8[%c32_80, %c0_81], %102 {strides = array<i32>} : memref<320x4xf32, #tpu.memory_space<vmem>>, vector<256x4xf32>,
    %c0_82 = arith.constant 0 : index
    %c32_83 = arith.constant 32 : index
    %c0_84 = arith.constant 0 : index
    %110 = vector.load %arg1[%c0_82, %c32_83, %c0_84] : memref<1x320x4xf32, #tpu.memory_space<vmem>>, vector<1x256x4xf32>
    %111 = vector.shape_cast %110 : vector<1x256x4xf32> to vector<256x4xf32>
    %cst_85 = arith.constant 0.000000e+00 : f32
    %112 = vector.broadcast %cst_85 : f32 to vector<256x4xf32>
    %c0_86 = arith.constant 0 : index
    %c0_87 = arith.constant 0 : index
    %113 = vector.load %arg9[%c0_86, %c0_87] : memref<256x4xf32, #tpu.memory_space<vmem>>, vector<256x4xf32>
    tpu.vector_store %arg9[%c0_86, %c0_87], %112 {strides = array<i32>} : memref<256x4xf32, #tpu.memory_space<vmem>>, vector<256x4xf32>,
    %cst_88 = arith.constant 0.000000e+00 : f32
    %114 = vector.broadcast %cst_88 : f32 to vector<256x4xf32>
    %c15_89 = arith.constant 15 : index
    %c0_90 = arith.constant 0 : index
    %115 = vector.load %arg8[%c15_89, %c0_90] : memref<320x4xf32, #tpu.memory_space<vmem>>, vector<256x4xf32>
    %c0_91 = arith.constant 0 : index
    %c0_92 = arith.constant 0 : index
    %c0_93 = arith.constant 0 : index
    %116 = vector.load %arg4[%c0_91, %c0_92, %c0_93] : memref<9x4x4xf32, #tpu.memory_space<vmem>>, vector<1x4x4xf32>
    %117 = vector.shape_cast %116 : vector<1x4x4xf32> to vector<4x4xf32>
    %cst_94 = arith.constant dense<0.000000e+00> : vector<256x4xf32>
    %118 = tpu.matmul %115, %117, %cst_94 {dimension_numbers = #tpu.dot_dimension_numbers<[1], [0], [0], [1], [0, 0, 1, 1], [], []>} : vector<256x4xf32>, vector<4x4xf32>, vector<256x4xf32> -> vector<256x4xf32>
    %119 = arith.addf %114, %118 : vector<256x4xf32>
    %c31_95 = arith.constant 31 : index
    %c0_96 = arith.constant 0 : index
    %120 = vector.load %arg8[%c31_95, %c0_96] : memref<320x4xf32, #tpu.memory_space<vmem>>, vector<256x4xf32>
    %c3_97 = arith.constant 3 : index
    %c0_98 = arith.constant 0 : index
    %c0_99 = arith.constant 0 : index
    %121 = vector.load %arg4[%c3_97, %c0_98, %c0_99] : memref<9x4x4xf32, #tpu.memory_space<vmem>>, vector<1x4x4xf32>
    %122 = vector.shape_cast %121 : vector<1x4x4xf32> to vector<4x4xf32>
    %cst_100 = arith.constant dense<0.000000e+00> : vector<256x4xf32>
    %123 = tpu.matmul %120, %122, %cst_100 {dimension_numbers = #tpu.dot_dimension_numbers<[1], [0], [0], [1], [0, 0, 1, 1], [], []>} : vector<256x4xf32>, vector<4x4xf32>, vector<256x4xf32> -> vector<256x4xf32>
    %124 = arith.addf %119, %123 : vector<256x4xf32>
    %c47_101 = arith.constant 47 : index
    %c0_102 = arith.constant 0 : index
    %125 = vector.load %arg8[%c47_101, %c0_102] : memref<320x4xf32, #tpu.memory_space<vmem>>, vector<256x4xf32>
    %c6_103 = arith.constant 6 : index
    %c0_104 = arith.constant 0 : index
    %c0_105 = arith.constant 0 : index
    %126 = vector.load %arg4[%c6_103, %c0_104, %c0_105] : memref<9x4x4xf32, #tpu.memory_space<vmem>>, vector<1x4x4xf32>
    %127 = vector.shape_cast %126 : vector<1x4x4xf32> to vector<4x4xf32>
    %cst_106 = arith.constant dense<0.000000e+00> : vector<256x4xf32>
    %128 = tpu.matmul %125, %127, %cst_106 {dimension_numbers = #tpu.dot_dimension_numbers<[1], [0], [0], [1], [0, 0, 1, 1], [], []>} : vector<256x4xf32>, vector<4x4xf32>, vector<256x4xf32> -> vector<256x4xf32>
    %129 = arith.addf %124, %128 : vector<256x4xf32>
    %cst_107 = arith.constant 0.000000e+00 : f32
    %130 = vector.shape_cast %18 : vector<256x1xi1> to vector<256x1xi1>
    %131 = vector.broadcast %130 : vector<256x1xi1> to vector<256x4xi1>
    %132 = vector.broadcast %cst_107 : f32 to vector<256x4xf32>
    %133 = arith.select %131, %129, %132 : vector<256x4xi1>, vector<256x4xf32>
    %c0_108 = arith.constant 0 : index
    %c0_109 = arith.constant 0 : index
    %134 = vector.load %arg9[%c0_108, %c0_109] : memref<256x4xf32, #tpu.memory_space<vmem>>, vector<256x4xf32>
    %135 = arith.addf %134, %133 : vector<256x4xf32>
    %c0_110 = arith.constant 0 : index
    %c0_111 = arith.constant 0 : index
    %136 = vector.load %arg9[%c0_110, %c0_111] : memref<256x4xf32, #tpu.memory_space<vmem>>, vector<256x4xf32>
    tpu.vector_store %arg9[%c0_110, %c0_111], %135 {strides = array<i32>} : memref<256x4xf32, #tpu.memory_space<vmem>>, vector<256x4xf32>,
    %cst_112 = arith.constant 0.000000e+00 : f32
    %137 = vector.broadcast %cst_112 : f32 to vector<256x4xf32>
    %c16_113 = arith.constant 16 : index
    %c0_114 = arith.constant 0 : index
    %138 = vector.load %arg8[%c16_113, %c0_114] : memref<320x4xf32, #tpu.memory_space<vmem>>, vector<256x4xf32>
    %c1_115 = arith.constant 1 : index
    %c0_116 = arith.constant 0 : index
    %c0_117 = arith.constant 0 : index
    %139 = vector.load %arg4[%c1_115, %c0_116, %c0_117] : memref<9x4x4xf32, #tpu.memory_space<vmem>>, vector<1x4x4xf32>
    %140 = vector.shape_cast %139 : vector<1x4x4xf32> to vector<4x4xf32>
    %cst_118 = arith.constant dense<0.000000e+00> : vector<256x4xf32>
    %141 = tpu.matmul %138, %140, %cst_118 {dimension_numbers = #tpu.dot_dimension_numbers<[1], [0], [0], [1], [0, 0, 1, 1], [], []>} : vector<256x4xf32>, vector<4x4xf32>, vector<256x4xf32> -> vector<256x4xf32>
    %142 = arith.addf %137, %141 : vector<256x4xf32>
    %c32_119 = arith.constant 32 : index
    %c0_120 = arith.constant 0 : index
    %143 = vector.load %arg8[%c32_119, %c0_120] : memref<320x4xf32, #tpu.memory_space<vmem>>, vector<256x4xf32>
    %c4_121 = arith.constant 4 : index
    %c0_122 = arith.constant 0 : index
    %c0_123 = arith.constant 0 : index
    %144 = vector.load %arg4[%c4_121, %c0_122, %c0_123] : memref<9x4x4xf32, #tpu.memory_space<vmem>>, vector<1x4x4xf32>
    %145 = vector.shape_cast %144 : vector<1x4x4xf32> to vector<4x4xf32>
    %cst_124 = arith.constant dense<0.000000e+00> : vector<256x4xf32>
    %146 = tpu.matmul %143, %145, %cst_124 {dimension_numbers = #tpu.dot_dimension_numbers<[1], [0], [0], [1], [0, 0, 1, 1], [], []>} : vector<256x4xf32>, vector<4x4xf32>, vector<256x4xf32> -> vector<256x4xf32>
    %147 = arith.addf %142, %146 : vector<256x4xf32>
    %c48_125 = arith.constant 48 : index
    %c0_126 = arith.constant 0 : index
    %148 = vector.load %arg8[%c48_125, %c0_126] : memref<320x4xf32, #tpu.memory_space<vmem>>, vector<256x4xf32>
    %c7_127 = arith.constant 7 : index
    %c0_128 = arith.constant 0 : index
    %c0_129 = arith.constant 0 : index
    %149 = vector.load %arg4[%c7_127, %c0_128, %c0_129] : memref<9x4x4xf32, #tpu.memory_space<vmem>>, vector<1x4x4xf32>
    %150 = vector.shape_cast %149 : vector<1x4x4xf32> to vector<4x4xf32>
    %cst_130 = arith.constant dense<0.000000e+00> : vector<256x4xf32>
    %151 = tpu.matmul %148, %150, %cst_130 {dimension_numbers = #tpu.dot_dimension_numbers<[1], [0], [0], [1], [0, 0, 1, 1], [], []>} : vector<256x4xf32>, vector<4x4xf32>, vector<256x4xf32> -> vector<256x4xf32>
    %152 = arith.addf %147, %151 : vector<256x4xf32>
    %c0_131 = arith.constant 0 : index
    %c0_132 = arith.constant 0 : index
    %153 = vector.load %arg9[%c0_131, %c0_132] : memref<256x4xf32, #tpu.memory_space<vmem>>, vector<256x4xf32>
    %154 = arith.addf %153, %152 : vector<256x4xf32>
    %c0_133 = arith.constant 0 : index
    %c0_134 = arith.constant 0 : index
    %155 = vector.load %arg9[%c0_133, %c0_134] : memref<256x4xf32, #tpu.memory_space<vmem>>, vector<256x4xf32>
    tpu.vector_store %arg9[%c0_133, %c0_134], %154 {strides = array<i32>} : memref<256x4xf32, #tpu.memory_space<vmem>>, vector<256x4xf32>,
    %cst_135 = arith.constant 0.000000e+00 : f32
    %156 = vector.broadcast %cst_135 : f32 to vector<256x4xf32>
    %c17_136 = arith.constant 17 : index
    %c0_137 = arith.constant 0 : index
    %157 = vector.load %arg8[%c17_136, %c0_137] : memref<320x4xf32, #tpu.memory_space<vmem>>, vector<256x4xf32>
    %c2_138 = arith.constant 2 : index
    %c0_139 = arith.constant 0 : index
    %c0_140 = arith.constant 0 : index
    %158 = vector.load %arg4[%c2_138, %c0_139, %c0_140] : memref<9x4x4xf32, #tpu.memory_space<vmem>>, vector<1x4x4xf32>
    %159 = vector.shape_cast %158 : vector<1x4x4xf32> to vector<4x4xf32>
    %cst_141 = arith.constant dense<0.000000e+00> : vector<256x4xf32>
    %160 = tpu.matmul %157, %159, %cst_141 {dimension_numbers = #tpu.dot_dimension_numbers<[1], [0], [0], [1], [0, 0, 1, 1], [], []>} : vector<256x4xf32>, vector<4x4xf32>, vector<256x4xf32> -> vector<256x4xf32>
    %161 = arith.addf %156, %160 : vector<256x4xf32>
    %c33_142 = arith.constant 33 : index
    %c0_143 = arith.constant 0 : index
    %162 = vector.load %arg8[%c33_142, %c0_143] : memref<320x4xf32, #tpu.memory_space<vmem>>, vector<256x4xf32>
    %c5_144 = arith.constant 5 : index
    %c0_145 = arith.constant 0 : index
    %c0_146 = arith.constant 0 : index
    %163 = vector.load %arg4[%c5_144, %c0_145, %c0_146] : memref<9x4x4xf32, #tpu.memory_space<vmem>>, vector<1x4x4xf32>
    %164 = vector.shape_cast %163 : vector<1x4x4xf32> to vector<4x4xf32>
    %cst_147 = arith.constant dense<0.000000e+00> : vector<256x4xf32>
    %165 = tpu.matmul %162, %164, %cst_147 {dimension_numbers = #tpu.dot_dimension_numbers<[1], [0], [0], [1], [0, 0, 1, 1], [], []>} : vector<256x4xf32>, vector<4x4xf32>, vector<256x4xf32> -> vector<256x4xf32>
    %166 = arith.addf %161, %165 : vector<256x4xf32>
    %c49_148 = arith.constant 49 : index
    %c0_149 = arith.constant 0 : index
    %167 = vector.load %arg8[%c49_148, %c0_149] : memref<320x4xf32, #tpu.memory_space<vmem>>, vector<256x4xf32>
    %c8_150 = arith.constant 8 : index
    %c0_151 = arith.constant 0 : index
    %c0_152 = arith.constant 0 : index
    %168 = vector.load %arg4[%c8_150, %c0_151, %c0_152] : memref<9x4x4xf32, #tpu.memory_space<vmem>>, vector<1x4x4xf32>
    %169 = vector.shape_cast %168 : vector<1x4x4xf32> to vector<4x4xf32>
    %cst_153 = arith.constant dense<0.000000e+00> : vector<256x4xf32>
    %170 = tpu.matmul %167, %169, %cst_153 {dimension_numbers = #tpu.dot_dimension_numbers<[1], [0], [0], [1], [0, 0, 1, 1], [], []>} : vector<256x4xf32>, vector<4x4xf32>, vector<256x4xf32> -> vector<256x4xf32>
    %171 = arith.addf %166, %170 : vector<256x4xf32>
    %cst_154 = arith.constant 0.000000e+00 : f32
    %172 = vector.shape_cast %20 : vector<256x1xi1> to vector<256x1xi1>
    %173 = vector.broadcast %172 : vector<256x1xi1> to vector<256x4xi1>
    %174 = vector.broadcast %cst_154 : f32 to vector<256x4xf32>
    %175 = arith.select %173, %171, %174 : vector<256x4xi1>, vector<256x4xf32>
    %c0_155 = arith.constant 0 : index
    %c0_156 = arith.constant 0 : index
    %176 = vector.load %arg9[%c0_155, %c0_156] : memref<256x4xf32, #tpu.memory_space<vmem>>, vector<256x4xf32>
    %177 = arith.addf %176, %175 : vector<256x4xf32>
    %c0_157 = arith.constant 0 : index
    %c0_158 = arith.constant 0 : index
    %178 = vector.load %arg9[%c0_157, %c0_158] : memref<256x4xf32, #tpu.memory_space<vmem>>, vector<256x4xf32>
    tpu.vector_store %arg9[%c0_157, %c0_158], %177 {strides = array<i32>} : memref<256x4xf32, #tpu.memory_space<vmem>>, vector<256x4xf32>,
    %c0_159 = arith.constant 0 : index
    %c0_160 = arith.constant 0 : index
    %179 = vector.load %arg9[%c0_159, %c0_160] : memref<256x4xf32, #tpu.memory_space<vmem>>, vector<256x4xf32>
    %c0_161 = arith.constant 0 : index
    %c0_162 = arith.constant 0 : index
    %180 = vector.load %arg5[%c0_161, %c0_162] : memref<1x4xf32, #tpu.memory_space<vmem>>, vector<1x4xf32>
    %181 = vector.broadcast %180 : vector<1x4xf32> to vector<256x4xf32>
    %182 = arith.addf %179, %181 : vector<256x4xf32>
    %183 = arith.addf %182, %111 : vector<256x4xf32>
    %cst_163 = arith.constant 0.000000e+00 : f32
    %184 = vector.broadcast %cst_163 : f32 to vector<256x4xf32>
    %185 = arith.maximumf %183, %184 : vector<256x4xf32>
    %c0_164 = arith.constant 0 : index
    %c0_165 = arith.constant 0 : index
    %c0_166 = arith.constant 0 : index
    %186 = vector.load %arg6[%c0_164, %c0_165, %c0_166] : memref<1x256x4xf32, #tpu.memory_space<vmem>>, vector<1x256x4xf32>
    %187 = vector.shape_cast %186 : vector<1x256x4xf32> to vector<256x4xf32>
    %188 = vector.shape_cast %185 : vector<256x4xf32> to vector<1x256x4xf32>
    tpu.vector_store %arg6[%c0_164, %c0_165, %c0_166], %188 {strides = array<i32>} : memref<1x256x4xf32, #tpu.memory_space<vmem>>, vector<1x256x4xf32>,
    return
  }
  func.func @transform_0(%arg0: i32) -> (i32, i32, i32) {
    %c0_i32 = arith.constant 0 : i32
    %c0_i32_0 = arith.constant 0 : i32
    %c0_i32_1 = arith.constant 0 : i32
    return %arg0, %c0_i32, %c0_i32_0 : i32, i32, i32
  }
  func.func @transform_1(%arg0: i32) -> (i32, i32, i32) {
    %c0_i32 = arith.constant 0 : i32
    %c0_i32_0 = arith.constant 0 : i32
    %c0_i32_1 = arith.constant 0 : i32
    %c0_i32_2 = arith.constant 0 : i32
    return %c0_i32, %c0_i32_0, %c0_i32_1 : i32, i32, i32
  }
  func.func @transform_2(%arg0: i32) -> (i32, i32) {
    %c0_i32 = arith.constant 0 : i32
    %c0_i32_0 = arith.constant 0 : i32
    %c0_i32_1 = arith.constant 0 : i32
    return %c0_i32, %c0_i32_0 : i32, i32
  }
  func.func @transform_3(%arg0: i32) -> (i32, i32, i32) {
    %c0_i32 = arith.constant 0 : i32
    %c0_i32_0 = arith.constant 0 : i32
    %c0_i32_1 = arith.constant 0 : i32
    %c0_i32_2 = arith.constant 0 : i32
    return %c0_i32, %c0_i32_0, %c0_i32_1 : i32, i32, i32
  }
  func.func @transform_4(%arg0: i32) -> (i32, i32) {
    %c0_i32 = arith.constant 0 : i32
    %c0_i32_0 = arith.constant 0 : i32
    %c0_i32_1 = arith.constant 0 : i32
    return %c0_i32, %c0_i32_0 : i32, i32
  }
  func.func @transform_5(%arg0: i32) -> (i32, i32, i32) {
    %c0_i32 = arith.constant 0 : i32
    %c0_i32_0 = arith.constant 0 : i32
    %c0_i32_1 = arith.constant 0 : i32
    return %arg0, %c0_i32, %c0_i32_0 : i32, i32, i32
  }
  func.func @transform_6(%arg0: i32) -> (i32, i32, i32) {
    %c0_i32 = arith.constant 0 : i32
    %c0_i32_0 = arith.constant 0 : i32
    %c0_i32_1 = arith.constant 0 : i32
    return %arg0, %c0_i32, %c0_i32_0 : i32, i32, i32
  }
}

</mosaic_0001>

<bundles_post_ra>
// kernel: tpu_custom_call.1
= control target key start
LH: loop header
LB: loop body
LE: loop exit
PB: predicated region body
PF: predicated region fallthrough
CT: control target
= control target key end

     0   :  { %s10578_s21 = smov 0   ;;  %s13264_s0 = inlined_call_operand.vmem [shape: f32[2,320,4], index: 0, kind: input, shape index: {}]   ;;  %s13265_s1 = inlined_call_operand.vmem [shape: f32[9,4,4], index: 1, kind: input, shape index: {}]   ;;  %s13266_s2 = inlined_call_operand.vmem [shape: f32[1,4], index: 2, kind: input, shape index: {}]   ;;  %s13267_s3 = inlined_call_operand.vmem [shape: f32[9,4,4], index: 3, kind: input, shape index: {}]   ;;  %s13268_s4 = inlined_call_operand.vmem [shape: f32[1,4], index: 4, kind: input, shape index: {}]   ;;  %s13269_s5 = inlined_call_operand.vmem [shape: f32[2,256,4], index: 5, kind: output, shape index: {0}]   ;;  %s13270_s6 = inlined_call_operand.vmem [shape: f32[2,256,4], index: 6, kind: output, shape index: {1}]  }
   0x1 LB: > { %s8020_s22 = sadd.s32 4294967295, %s10540_s21   ;;  %p8024_p0 = scmp.ge.s32.totalorder %s10540_s21, 1  ;;  %s10540_s21 = sphi %s10578_s21, %s17_s21  }
   0x2   : > { %p215_p1 = scmp.lt.s32.totalorder %s10540_s21, 3 }
   0x4   : > { %p216_p2 = pnand %p8024_p0, %p215_p1 }
   0x6   : > { %219 = sbr.rel (%p216_p2) target bundleno = 1286 (0x506), region = 40 }
   0xd   : > { %v8030_v0 = vld [vmem:[%s13265_s1 + $0xc] sm:$0xf]  ;;  %vm13283_vm0 = vcmask 1043456   ;;  %p250_p3 = scmp.lt.s32.totalorder %s8020_s22, 1  ;;  %v811_v1 = vld [vmem:[%s13265_s1] sm:$0xf] }
   0xe   : > { %9240 = vmatprep.subr.msk.mxu0 %vm13283_vm0, %v8030_v0  ;;  %v8132_v2 = vld [vmem:[%s13265_s1 + $0x10] sm:$0xf]  ;;  %v8131_v3 = vld [vmem:[%s13265_s1 + $0x4] sm:$0xf]  ;;  %vm13288_vm1 = vcmask 31744  }
   0xf   : > { %9241 = vmatpush3.msk.msra.mxu0 %vm13283_vm0, %v8030_v0  ;;  %s14036_s22 = smov (!%p250_p3, %s8020_s22), 1  ;;  %9390 = vmatprep.subr.msk.mxu1 %vm13283_vm0, %v8132_v2  ;;  %v10626_v7 = vld [vmem:[%s13265_s1 + $0x18] sm:$0xf]  ;;  %v10745_v30 = vld [vmem:[%s13265_s1 + $0x1c] sm:$0xf] }
  0x10   : > { %9290 = vmatprep.subr.msk.mxu0 %vm13283_vm0, %v811_v1  ;;  %9391 = vmatpush3.msk.msra.mxu1 %vm13283_vm0, %v8132_v2  ;;  %s10524_s7 = smul.u32 320, %s14036_s22  ;;  %s8644_s9 = sshll.u32 %s14036_s22, 8 }
  0x11   : > { %9440 = vmatprep.subr.msk.mxu1 %vm13283_vm0, %v8131_v3  ;;  %s11852_s13 = scalar_lea.vmem %s13270_s6, %s8644_s9  ;;  %s13086_s30 = scalar_lea.vmem %s13269_s5, %s8644_s9 }
  0x12   : > { %s10610_s10 = scalar_lea.vmem %s13264_s0, %s10524_s7 }
  0x13   : > { %v10613_v4 = vld [vmem:[%s10610_s10 + $0x1f] sm:$0xff]  ;;  %v10616_v5 = vld [vmem:[%s10610_s10 + $0x27] sm:$0xff]  ;;  %v10619_v6 = vld [vmem:[%s10610_s10 + $0x2f] sm:$0xff] }
  0x14   : > { %9242 = vmatprep.mubr.msk.f32.mxu0 %vm13288_vm1, %v10613_v4  ;;  %v10631_v8 = vld [vmem:[%s10610_s10 + $0x20] sm:$0xff]  ;;  %v10634_v9 = vld [vmem:[%s10610_s10 + $0x28] sm:$0xff]  ;;  %v10640_v10 = vld [vmem:[%s10610_s10 + $0x37] sm:$0xff] }
  0x15   : > { %9243 = vmatmul.mubr.msk.f32.vlgmr.msra.gmra.mrb[0].mxu0 %vm13288_vm1, %v10616_v5  ;;  %v10643_v11 = vld [vmem:[%s10610_s10 + $0x30] sm:$0xff]  ;;  %v10646_v12 = vld [vmem:[%s10610_s10 + $0x3f] sm:$0xff]  ;;  %9392 = vmatprep.mubr.msk.f32.mxu1 %vm13288_vm1, %v10631_v8  ;;  %v10664_v14 = vld [vmem:[%s10610_s10 + $0x47] sm:$0xff] }
  0x16   : > { %9291 = vmatpush3.msk.msra.mxu0 %vm13283_vm0, %v811_v1  ;;  %9245 = vmatprep.mubr.msk.f32.mxu0 %vm13288_vm1, %v10619_v6  ;;  %v10659_v13 = vld [vmem:[%s10610_s10 + $0x38] sm:$0xff]  ;;  %v10667_v15 = vld [vmem:[%s10610_s10 + $0x40] sm:$0xff]  ;;  %v10671_v16 = vld [vmem:[%s10610_s10 + $0x4f] sm:$0xff] }
  0x17   : > { %9340 = vmatprep.subr.msk.mxu0 %vm13283_vm0, %v10626_v7  ;;  %9393 = vmatmul.mubr.msk.f32.vlgmr.msra.gmra.mrb[0].mxu1 %vm13288_vm1, %v10634_v9  ;;  %v10680_v17 = vld [vmem:[%s10610_s10 + $0x48] sm:$0xff]  ;;  %v10685_v18 = vld [vmem:[%s10610_s10 + $0x57] sm:$0xff]  ;;  %v10691_v20 = vld [vmem:[%s10610_s10 + $0x5f] sm:$0xff] }
  0x18   : > { %9395 = vmatprep.mubr.msk.f32.mxu1 %vm13288_vm1, %v10643_v11  ;;  %9441 = vmatpush3.msk.msra.mxu1 %vm13283_vm0, %v8131_v3  ;;  %v10688_v19 = vld [vmem:[%s10610_s10 + $0x50] sm:$0xff]  ;;  %v10700_v21 = vld [vmem:[%s10610_s10 + $0x58] sm:$0xff]  ;;  %v10705_v22 = vld [vmem:[%s10610_s10 + $0x67] sm:$0xff] }
  0x19   : > { %9246 = vmatmul.mubr.msk.f32.gmra.mrb[2].mxu0 %vm13288_vm1, %v10640_v10  ;;  %v10708_v23 = vld [vmem:[%s10610_s10 + $0x60] sm:$0xff]  ;;  %v10711_v24 = vld [vmem:[%s10610_s10 + $0x6f] sm:$0xff]  ;;  %v10725_v26 = vld [vmem:[%s10610_s10 + $0x77] sm:$0xff]  ;;  %9490 = vmatprep.subr.msk.mxu1 %vm13283_vm0, %v10745_v30 }
  0x1a   : > { %9248 = vmatprep.mubr.msk.f32.mxu0 %vm13288_vm1, %v10646_v12  ;;  %v10720_v25 = vld [vmem:[%s10610_s10 + $0x68] sm:$0xff]  ;;  %v10728_v27 = vld [vmem:[%s10610_s10 + $0x70] sm:$0xff]  ;;  %v10731_v28 = vld [vmem:[%s10610_s10 + $0x7f] sm:$0xff] }
  0x1b   : > { %9396 = vmatmul.mubr.msk.f32.gmra.mrb[2].mxu1 %vm13288_vm1, %v10659_v13  ;;  %v10740_v29 = vld [vmem:[%s10610_s10 + $0x78] sm:$0xff]  ;;  %v10750_v31 = vld [vmem:[%s10610_s10 + $0x87] sm:$0xff]  ;;  %v10758_v33 = vld [vmem:[%s10610_s10 + $0x8f] sm:$0xff] }
  0x1c   : > { %9398 = vmatprep.mubr.msk.f32.mxu1 %vm13288_vm1, %v10667_v15  ;;  %v10753_v32 = vld [vmem:[%s10610_s10 + $0x80] sm:$0xff]  ;;  %v10767_v34 = vld [vmem:[%s10610_s10 + $0x88] sm:$0xff]  ;;  %v10772_v35 = vld [vmem:[%s10610_s10 + $0x97] sm:$0xff] }
  0x1d   : > { %9249 = vmatmul.mubr.msk.f32.gmra.mrb[4].mxu0 %vm13288_vm1, %v10664_v14  ;;  %v10775_v36 = vld [vmem:[%s10610_s10 + $0x90] sm:$0xff]  ;;  %v10778_v37 = vld [vmem:[%s10610_s10 + $0x9f] sm:$0xff]  ;;  %v10792_v39 = vld [vmem:[%s10610_s10 + $0xa7] sm:$0xff] }
  0x1e   : > { %9251 = vmatprep.mubr.msk.f32.mxu0 %vm13288_vm1, %v10671_v16  ;;  %v10787_v38 = vld [vmem:[%s10610_s10 + $0x98] sm:$0xff]  ;;  %v10795_v40 = vld [vmem:[%s10610_s10 + $0xa0] sm:$0xff]  ;;  %v10798_v41 = vld [vmem:[%s10610_s10 + $0xaf] sm:$0xff] }
  0x1f   : > { %9399 = vmatmul.mubr.msk.f32.gmra.mrb[4].mxu1 %vm13288_vm1, %v10680_v17  ;;  %v10807_v42 = vld [vmem:[%s10610_s10 + $0xa8] sm:$0xff]  ;;  %v10812_v43 = vld [vmem:[%s10610_s10 + $0xb7] sm:$0xff]  ;;  %v10818_v45 = vld [vmem:[%s10610_s10 + $0xbf] sm:$0xff] }
  0x20   : > { %9401 = vmatprep.mubr.msk.f32.mxu1 %vm13288_vm1, %v10688_v19  ;;  %v10815_v44 = vld [vmem:[%s10610_s10 + $0xb0] sm:$0xff]  ;;  %v10827_v46 = vld [vmem:[%s10610_s10 + $0xb8] sm:$0xff]  ;;  %v10832_v47 = vld [vmem:[%s10610_s10 + $0xc7] sm:$0xff] }
  0x21   : > { %9252 = vmatmul.mubr.msk.f32.gmra.mrb[6].mxu0 %vm13288_vm1, %v10685_v18  ;;  %v10835_v48 = vld [vmem:[%s10610_s10 + $0xc0] sm:$0xff]  ;;  %v10838_v49 = vld [vmem:[%s10610_s10 + $0xcf] sm:$0xff]  ;;  %v10852_v51 = vld [vmem:[%s10610_s10 + $0xd7] sm:$0xff] }
  0x22   : > { %9254 = vmatprep.mubr.msk.f32.mxu0 %vm13288_vm1, %v10691_v20  ;;  %v10847_v50 = vld [vmem:[%s10610_s10 + $0xc8] sm:$0xff]  ;;  %v10855_v52 = vld [vmem:[%s10610_s10 + $0xd0] sm:$0xff]  ;;  %v10858_v53 = vld [vmem:[%s10610_s10 + $0xdf] sm:$0xff] }
  0x23   : > { %9402 = vmatmul.mubr.msk.f32.gmra.mrb[6].mxu1 %vm13288_vm1, %v10700_v21  ;;  %v10867_v54 = vld [vmem:[%s10610_s10 + $0xd8] sm:$0xff]  ;;  %v10872_v55 = vld [vmem:[%s10610_s10 + $0xe7] sm:$0xff]  ;;  %v10878_v57 = vld [vmem:[%s10610_s10 + $0xef] sm:$0xff] }
  0x24   : > { %9404 = vmatprep.mubr.msk.f32.mxu1 %vm13288_vm1, %v10708_v23  ;;  %v10875_v56 = vld [vmem:[%s10610_s10 + $0xe0] sm:$0xff]  ;;  %v10887_v58 = vld [vmem:[%s10610_s10 + $0xe8] sm:$0xff]  ;;  %v10892_v59 = vld [vmem:[%s10610_s10 + $0xf7] sm:$0xff] }
  0x25   : > { %9255 = vmatmul.mubr.msk.f32.gmra.mrb[8].mxu0 %vm13288_vm1, %v10705_v22  ;;  %v10895_v60 = vld [vmem:[%s10610_s10 + $0xf0] sm:$0xff]  ;;  %v10898_v61 = vld [vmem:[%s10610_s10 + $0xff] sm:$0xff]  ;;  %v10912_v63 = vld [vmem:[%s10610_s10 + $0x107] sm:$0xff] }
  0x26   : > { %9257 = vmatprep.mubr.msk.f32.mxu0 %vm13288_vm1, %v10711_v24  ;;  %13356 = vst [vmem:[#allocation4_spill] sm:$0xff] %v10895_v60  ;;  %13357 = vst [vmem:[#allocation5_spill] sm:$0xff] %v10898_v61  ;;  %v10907_v62 = vld [vmem:[%s10610_s10 + $0xf8] sm:$0xff]  ;;  %v10915_v0 = vld [vmem:[%s10610_s10 + $0x100] sm:$0xff] }
  0x27   : > { %9405 = vmatmul.mubr.msk.f32.gmra.mrb[8].mxu1 %vm13288_vm1, %v10720_v25  ;;  %13358 = vst [vmem:[#allocation6_spill] sm:$0xff] %v10907_v62  ;;  %13359 = vst [vmem:[#allocation7_spill] sm:$0xff] %v10912_v63  ;;  %v10918_v1 = vld [vmem:[%s10610_s10 + $0x10f] sm:$0xff]  ;;  %v10932_v3 = vld [vmem:[%s10610_s10 + $0x117] sm:$0xff] }
  0x28   : > { %9407 = vmatprep.mubr.msk.f32.mxu1 %vm13288_vm1, %v10728_v27  ;;  %13360 = vst [vmem:[#allocation8_spill] sm:$0xff] %v10915_v0  ;;  %13361 = vst [vmem:[#allocation9_spill] sm:$0xff] %v10918_v1  ;;  %v10927_v2 = vld [vmem:[%s10610_s10 + $0x108] sm:$0xff] }
  0x29   : > { %9258 = vmatmul.mubr.msk.f32.gmra.mrb[10].mxu0 %vm13288_vm1, %v10725_v26  ;;  %13362 = vst [vmem:[#allocation10_spill] sm:$0xff] %v10932_v3 }
  0x2a   : > { %9260 = vmatprep.mubr.msk.f32.mxu0 %vm13288_vm1, %v10731_v28 }
  0x2b   : > { %9408 = vmatmul.mubr.msk.f32.gmra.mrb[10].mxu1 %vm13288_vm1, %v10740_v29 }
  0x2c   : > { %9410 = vmatprep.mubr.msk.f32.mxu1 %vm13288_vm1, %v10753_v32 }
  0x2d   : > { %9261 = vmatmul.mubr.msk.f32.gmra.mrb[12].mxu0 %vm13288_vm1, %v10750_v31 }
  0x2e   : > { %9263 = vmatprep.mubr.msk.f32.mxu0 %vm13288_vm1, %v10758_v33 }
  0x2f   : > { %9411 = vmatmul.mubr.msk.f32.gmra.mrb[12].mxu1 %vm13288_vm1, %v10767_v34 }
  0x30   : > { %9413 = vmatprep.mubr.msk.f32.mxu1 %vm13288_vm1, %v10775_v36 }
  0x31   : > { %9264 = vmatmul.mubr.msk.f32.gmra.mrb[14].mxu0 %vm13288_vm1, %v10772_v35 }
  0x32   : > { %9266 = vmatprep.mubr.msk.f32.mxu0 %vm13288_vm1, %v10778_v37 }
  0x33   : > { %9414 = vmatmul.mubr.msk.f32.gmra.mrb[14].mxu1 %vm13288_vm1, %v10787_v38 }
  0x34   : > { %9416 = vmatprep.mubr.msk.f32.mxu1 %vm13288_vm1, %v10795_v40 }
  0x35   : > { %9267 = vmatmul.mubr.msk.f32.gmra.mrb[16].mxu0 %vm13288_vm1, %v10792_v39 }
  0x36   : > { %9269 = vmatprep.mubr.msk.f32.mxu0 %vm13288_vm1, %v10798_v41 }
  0x37   : > { %9417 = vmatmul.mubr.msk.f32.gmra.mrb[16].mxu1 %vm13288_vm1, %v10807_v42 }
  0x38   : > { %9419 = vmatprep.mubr.msk.f32.mxu1 %vm13288_vm1, %v10815_v44 }
  0x39   : > { %9270 = vmatmul.mubr.msk.f32.gmra.mrb[18].mxu0 %vm13288_vm1, %v10812_v43 }
  0x3a   : > { %9272 = vmatprep.mubr.msk.f32.mxu0 %vm13288_vm1, %v10818_v45 }
  0x3b   : > { %9420 = vmatmul.mubr.msk.f32.gmra.mrb[18].mxu1 %vm13288_vm1, %v10827_v46 }
  0x3c   : > { %9422 = vmatprep.mubr.msk.f32.mxu1 %vm13288_vm1, %v10835_v48 }
  0x3d   : > { %9273 = vmatmul.mubr.msk.f32.gmra.mrb[20].mxu0 %vm13288_vm1, %v10832_v47 }
  0x3e   : > { %9275 = vmatprep.mubr.msk.f32.mxu0 %vm13288_vm1, %v10838_v49 }
  0x3f   : > { %9423 = vmatmul.mubr.msk.f32.gmra.mrb[20].mxu1 %vm13288_vm1, %v10847_v50 }
  0x40   : > { %9425 = vmatprep.mubr.msk.f32.mxu1 %vm13288_vm1, %v10855_v52 }
  0x41   : > { %9276 = vmatmul.mubr.msk.f32.gmra.mrb[22].mxu0 %vm13288_vm1, %v10852_v51 }
  0x42   : > { %9278 = vmatprep.mubr.msk.f32.mxu0 %vm13288_vm1, %v10858_v53 }
  0x43   : > { %9426 = vmatmul.mubr.msk.f32.gmra.mrb[22].mxu1 %vm13288_vm1, %v10867_v54 }
  0x44   : > { %9428 = vmatprep.mubr.msk.f32.mxu1 %vm13288_vm1, %v10875_v56 }
  0x45   : > { %9279 = vmatmul.mubr.msk.f32.gmra.mrb[24].mxu0 %vm13288_vm1, %v10872_v55 }
  0x46   : > { %9281 = vmatprep.mubr.msk.f32.mxu0 %vm13288_vm1, %v10878_v57 }
  0x47   : > { %9429 = vmatmul.mubr.msk.f32.gmra.mrb[24].mxu1 %vm13288_vm1, %v10887_v58 }
  0x48   : > { %9431 = vmatprep.mubr.msk.f32.mxu1 %vm13288_vm1, %v10895_v60  ;;  %v779_v60 = vld [vmem:[%s10610_s10 + $0xf] sm:$0xff] }
  0x49   : > { %9282 = vmatmul.mubr.msk.f32.gmra.mrb[26].mxu0 %vm13288_vm1, %v10892_v59 }
  0x4a   : > { %9284 = vmatprep.mubr.msk.f32.mxu0 %vm13288_vm1, %v10898_v61  ;;  %v10935_v61 = vld [vmem:[%s10610_s10 + $0x110] sm:$0xff] }
  0x4b   : > { %9432 = vmatmul.mubr.msk.f32.gmra.mrb[26].mxu1 %vm13288_vm1, %v10907_v62  ;;  %v10955_v62 = vld [vmem:[%s13265_s1 + $0x14] sm:$0xf] }
  0x4c   : > { %9434 = vmatprep.mubr.msk.f32.mxu1 %vm13288_vm1, %v10915_v0  ;;  %v10945_v0 = vld [vmem:[%s10610_s10 + $0x118] sm:$0xff] }
  0x4d   : > { %9285 = vmatmul.mubr.msk.f32.gmra.mrb[28].mxu0 %vm13288_vm1, %v10912_v63  ;;  %v780_v63 = vld [vmem:[%s10610_s10 + $0x17] sm:$0xff] }
  0x4e   : > { %9287 = vmatprep.mubr.msk.f32.mxu0 %vm13288_vm1, %v10918_v1  ;;  %v1957_v1 = vld [vmem:[%s10610_s10 + $0x10] sm:$0xff] }
  0x4f   : > { %9435 = vmatmul.mubr.msk.f32.gmra.mrb[28].mxu1 %vm13288_vm1, %v10927_v2 }
  0x50   : > { %9437 = vmatprep.mubr.msk.f32.mxu1 %vm13288_vm1, %v10935_v61 }
  0x51   : > { %9288 = vmatmul.mubr.msk.f32.gmra.mrb[30].mxu0 %vm13288_vm1, %v10932_v3  ;;  %v1958_v3 = vld [vmem:[%s10610_s10 + $0x18] sm:$0xff] }
  0x52   : > { %9292 = vmatprep.mubr.msk.f32.mxu0 %vm13288_vm1, %v779_v60 }
  0x53   : > { %9438 = vmatmul.mubr.msk.f32.gmra.mrb[30].mxu1 %vm13288_vm1, %v10945_v0 }
  0x54   : > { %9442 = vmatprep.mubr.msk.f32.mxu1 %vm13288_vm1, %v1957_v1 }
  0x55   : > { %9293 = vmatmul.mubr.msk.f32.vlgmr.msra.gmra.mrb[0].mxu0 %vm13288_vm1, %v780_v63 }
  0x56   : > { %9341 = vmatpush3.msk.msra.mxu0 %vm13283_vm0, %v10626_v7  ;;  %9295 = vmatprep.mubr.msk.f32.mxu0 %vm13288_vm1, %v10613_v4  ;;  %v13363_v4 = vld [vmem:[#allocation4_spill] sm:$0xff]  ;;  %v13365_v7 = vld [vmem:[#allocation6_spill] sm:$0xff] }
  0x57   : > { %9540 = vmatprep.subr.msk.mxu0 %vm13283_vm0, %v10955_v62  ;;  %9443 = vmatmul.mubr.msk.f32.vlgmr.msra.gmra.mrb[0].mxu1 %vm13288_vm1, %v1958_v3 }
  0x58   : > { %9445 = vmatprep.mubr.msk.f32.mxu1 %vm13288_vm1, %v10631_v8  ;;  %9491 = vmatpush3.msk.msra.mxu1 %vm13283_vm0, %v10745_v30  ;;  %v13366_v8 = vld [vmem:[#allocation7_spill] sm:$0xff]  ;;  %v11092_v30 = vld [vmem:[%s13265_s1 + $0x8] sm:$0xf] }
  0x59   : > { %9296 = vmatmul.mubr.msk.f32.gmra.mrb[2].mxu0 %vm13288_vm1, %v10616_v5  ;;  %v13364_v5 = vld [vmem:[#allocation5_spill] sm:$0xff] }
  0x5a   : > { %9298 = vmatprep.mubr.msk.f32.mxu0 %vm13288_vm1, %v10619_v6 }
  0x5b   : > { %9446 = vmatmul.mubr.msk.f32.gmra.mrb[2].mxu1 %vm13288_vm1, %v10634_v9  ;;  %v13367_v9 = vld [vmem:[#allocation8_spill] sm:$0xff] }
  0x5c   : > { %9448 = vmatprep.mubr.msk.f32.mxu1 %vm13288_vm1, %v10643_v11 }
  0x5d   : > { %9299 = vmatmul.mubr.msk.f32.gmra.mrb[4].mxu0 %vm13288_vm1, %v10640_v10 }
  0x5e   : > { %9301 = vmatprep.mubr.msk.f32.mxu0 %vm13288_vm1, %v10646_v12 }
  0x5f   : > { %9449 = vmatmul.mubr.msk.f32.gmra.mrb[4].mxu1 %vm13288_vm1, %v10659_v13 }
  0x60   : > { %9451 = vmatprep.mubr.msk.f32.mxu1 %vm13288_vm1, %v10667_v15 }
  0x61   : > { %9302 = vmatmul.mubr.msk.f32.gmra.mrb[6].mxu0 %vm13288_vm1, %v10664_v14 }
  0x62   : > { %9304 = vmatprep.mubr.msk.f32.mxu0 %vm13288_vm1, %v10671_v16 }
  0x63   : > { %9452 = vmatmul.mubr.msk.f32.gmra.mrb[6].mxu1 %vm13288_vm1, %v10680_v17 }
  0x64   : > { %9454 = vmatprep.mubr.msk.f32.mxu1 %vm13288_vm1, %v10688_v19 }
  0x65   : > { %9305 = vmatmul.mubr.msk.f32.gmra.mrb[8].mxu0 %vm13288_vm1, %v10685_v18 }
  0x66   : > { %9307 = vmatprep.mubr.msk.f32.mxu0 %vm13288_vm1, %v10691_v20 }
  0x67   : > { %9455 = vmatmul.mubr.msk.f32.gmra.mrb[8].mxu1 %vm13288_vm1, %v10700_v21 }
  0x68   : > { %9457 = vmatprep.mubr.msk.f32.mxu1 %vm13288_vm1, %v10708_v23 }
  0x69   : > { %9308 = vmatmul.mubr.msk.f32.gmra.mrb[10].mxu0 %vm13288_vm1, %v10705_v22 }
  0x6a   : > { %9310 = vmatprep.mubr.msk.f32.mxu0 %vm13288_vm1, %v10711_v24 }
  0x6b   : > { %9458 = vmatmul.mubr.msk.f32.gmra.mrb[10].mxu1 %vm13288_vm1, %v10720_v25 }
  0x6c   : > { %9460 = vmatprep.mubr.msk.f32.mxu1 %vm13288_vm1, %v10728_v27 }
  0x6d   : > { %9311 = vmatmul.mubr.msk.f32.gmra.mrb[12].mxu0 %vm13288_vm1, %v10725_v26 }
  0x6e   : > { %9313 = vmatprep.mubr.msk.f32.mxu0 %vm13288_vm1, %v10731_v28 }
  0x6f   : > { %9461 = vmatmul.mubr.msk.f32.gmra.mrb[12].mxu1 %vm13288_vm1, %v10740_v29 }
  0x70   : > { %9463 = vmatprep.mubr.msk.f32.mxu1 %vm13288_vm1, %v10753_v32 }
  0x71   : > { %9314 = vmatmul.mubr.msk.f32.gmra.mrb[14].mxu0 %vm13288_vm1, %v10750_v31 }
  0x72   : > { %9316 = vmatprep.mubr.msk.f32.mxu0 %vm13288_vm1, %v10758_v33 }
  0x73   : > { %9464 = vmatmul.mubr.msk.f32.gmra.mrb[14].mxu1 %vm13288_vm1, %v10767_v34 }
  0x74   : > { %9466 = vmatprep.mubr.msk.f32.mxu1 %vm13288_vm1, %v10775_v36 }
  0x75   : > { %9317 = vmatmul.mubr.msk.f32.gmra.mrb[16].mxu0 %vm13288_vm1, %v10772_v35 }
  0x76   : > { %9319 = vmatprep.mubr.msk.f32.mxu0 %vm13288_vm1, %v10778_v37 }
  0x77   : > { %9467 = vmatmul.mubr.msk.f32.gmra.mrb[16].mxu1 %vm13288_vm1, %v10787_v38 }
  0x78   : > { %9469 = vmatprep.mubr.msk.f32.mxu1 %vm13288_vm1, %v10795_v40 }
  0x79   : > { %9320 = vmatmul.mubr.msk.f32.gmra.mrb[18].mxu0 %vm13288_vm1, %v10792_v39 }
  0x7a   : > { %9322 = vmatprep.mubr.msk.f32.mxu0 %vm13288_vm1, %v10798_v41 }
  0x7b   : > { %9470 = vmatmul.mubr.msk.f32.gmra.mrb[18].mxu1 %vm13288_vm1, %v10807_v42 }
  0x7c   : > { %9472 = vmatprep.mubr.msk.f32.mxu1 %vm13288_vm1, %v10815_v44 }
  0x7d   : > { %9323 = vmatmul.mubr.msk.f32.gmra.mrb[20].mxu0 %vm13288_vm1, %v10812_v43 }
  0x7e   : > { %9325 = vmatprep.mubr.msk.f32.mxu0 %vm13288_vm1, %v10818_v45 }
  0x7f   : > { %9473 = vmatmul.mubr.msk.f32.gmra.mrb[20].mxu1 %vm13288_vm1, %v10827_v46 }
  0x80   : > { %9475 = vmatprep.mubr.msk.f32.mxu1 %vm13288_vm1, %v10835_v48 }
  0x81   : > { %9326 = vmatmul.mubr.msk.f32.gmra.mrb[22].mxu0 %vm13288_vm1, %v10832_v47 }
  0x82   : > { %9328 = vmatprep.mubr.msk.f32.mxu0 %vm13288_vm1, %v10838_v49 }
  0x83   : > { %9476 = vmatmul.mubr.msk.f32.gmra.mrb[22].mxu1 %vm13288_vm1, %v10847_v50 }
  0x84   : > { %9478 = vmatprep.mubr.msk.f32.mxu1 %vm13288_vm1, %v10855_v52 }
  0x85   : > { %9329 = vmatmul.mubr.msk.f32.gmra.mrb[24].mxu0 %vm13288_vm1, %v10852_v51 }
  0x86   : > { %9331 = vmatprep.mubr.msk.f32.mxu0 %vm13288_vm1, %v10858_v53 }
  0x87   : > { %9479 = vmatmul.mubr.msk.f32.gmra.mrb[24].mxu1 %vm13288_vm1, %v10867_v54 }
  0x88   : > { %9481 = vmatprep.mubr.msk.f32.mxu1 %vm13288_vm1, %v10875_v56 }
  0x89   : > { %9332 = vmatmul.mubr.msk.f32.gmra.mrb[26].mxu0 %vm13288_vm1, %v10872_v55 }
  0x8a   : > { %9334 = vmatprep.mubr.msk.f32.mxu0 %vm13288_vm1, %v10878_v57 }
  0x8b   : > { %9482 = vmatmul.mubr.msk.f32.gmra.mrb[26].mxu1 %vm13288_vm1, %v10887_v58 }
  0x8c   : > { %9484 = vmatprep.mubr.msk.f32.mxu1 %vm13288_vm1, %v13363_v4 }
  0x8d   : > { %9335 = vmatmul.mubr.msk.f32.gmra.mrb[28].mxu0 %vm13288_vm1, %v10892_v59 }
  0x8e   : > { %9337 = vmatprep.mubr.msk.f32.mxu0 %vm13288_vm1, %v13364_v5 }
  0x8f   : > { %9485 = vmatmul.mubr.msk.f32.gmra.mrb[28].mxu1 %vm13288_vm1, %v13365_v7 }
  0x90   : > { %9487 = vmatprep.mubr.msk.f32.mxu1 %vm13288_vm1, %v13367_v9 }
  0x91   : > { %9338 = vmatmul.mubr.msk.f32.gmra.mrb[30].mxu0 %vm13288_vm1, %v13366_v8 }
  0x92   : > { %9342 = vmatprep.mubr.msk.f32.mxu0 %vm13288_vm1, %v10619_v6  ;;  %v13368_v6 = vld [vmem:[#allocation9_spill] sm:$0xff] }
  0x93   : > { %9488 = vmatmul.mubr.msk.f32.gmra.mrb[30].mxu1 %vm13288_vm1, %v10927_v2 }
  0x94   : > { %9492 = vmatprep.mubr.msk.f32.mxu1 %vm13288_vm1, %v10643_v11  ;;  %v13369_v11 = vld [vmem:[#allocation10_spill] sm:$0xff] }
  0x95   : > { %9343 = vmatmul.mubr.msk.f32.vlgmr.msra.gmra.mrb[0].mxu0 %vm13288_vm1, %v10640_v10  ;;  %v1405_v10 = vld [vmem:[%s10610_s10 + $0x11f] sm:$0xff] }
  0x96   : > { %9541 = vmatpush3.msk.msra.mxu0 %vm13283_vm0, %v10955_v62  ;;  %9345 = vmatprep.mubr.msk.f32.mxu0 %vm13288_vm1, %v10646_v12  ;;  %v1406_v12 = vld [vmem:[%s10610_s10 + $0x127] sm:$0xff] }
  0x97   : > { %9590 = vmatprep.subr.msk.mxu0 %vm13283_vm0, %v11092_v30  ;;  %9493 = vmatmul.mubr.msk.f32.vlgmr.msra.gmra.mrb[0].mxu1 %vm13288_vm1, %v10659_v13  ;;  %v2583_v13 = vld [vmem:[%s10610_s10 + $0x120] sm:$0xff] }
  0x98   : > { %9495 = vmatprep.mubr.msk.f32.mxu1 %vm13288_vm1, %v10667_v15  ;;  %v2584_v15 = vld [vmem:[%s10610_s10 + $0x128] sm:$0xff] }
  0x99   : > { %9346 = vmatmul.mubr.msk.f32.gmra.mrb[2].mxu0 %vm13288_vm1, %v10664_v14  ;;  %v11219_v14 = vld [vmem:[%s10610_s10 + $0x21] sm:$0xff] }
  0x9a   : > { %9348 = vmatprep.mubr.msk.f32.mxu0 %vm13288_vm1, %v10671_v16  ;;  %v11229_v16 = vld [vmem:[%s10610_s10 + $0x29] sm:$0xff] }
  0x9b   : > { %9496 = vmatmul.mubr.msk.f32.gmra.mrb[2].mxu1 %vm13288_vm1, %v10680_v17  ;;  %v11232_v17 = vld [vmem:[%s10610_s10 + $0x31] sm:$0xff] }
  0x9c   : > { %9498 = vmatprep.mubr.msk.f32.mxu1 %vm13288_vm1, %v10688_v19  ;;  %v11247_v19 = vld [vmem:[%s10610_s10 + $0x39] sm:$0xff] }
  0x9d   : > { %9349 = vmatmul.mubr.msk.f32.gmra.mrb[4].mxu0 %vm13288_vm1, %v10685_v18  ;;  %v11238_v18 = vld [vmem:[%s13265_s1 + $0x20] sm:$0xf] }
  0x9e   : > { %9351 = vmatprep.mubr.msk.f32.mxu0 %vm13288_vm1, %v10691_v20  ;;  %v11250_v20 = vld [vmem:[%s10610_s10 + $0x41] sm:$0xff] }
  0x9f   : > { %9499 = vmatmul.mubr.msk.f32.gmra.mrb[4].mxu1 %vm13288_vm1, %v10700_v21  ;;  %v11259_v21 = vld [vmem:[%s10610_s10 + $0x49] sm:$0xff] }
  0xa0   : > { %9501 = vmatprep.mubr.msk.f32.mxu1 %vm13288_vm1, %v10708_v23  ;;  %v11269_v23 = vld [vmem:[%s10610_s10 + $0x59] sm:$0xff] }
  0xa1   : > { %9352 = vmatmul.mubr.msk.f32.gmra.mrb[6].mxu0 %vm13288_vm1, %v10705_v22  ;;  %v11262_v22 = vld [vmem:[%s10610_s10 + $0x51] sm:$0xff] }
  0xa2   : > { %9354 = vmatprep.mubr.msk.f32.mxu0 %vm13288_vm1, %v10711_v24  ;;  %v11272_v24 = vld [vmem:[%s10610_s10 + $0x61] sm:$0xff] }
  0xa3   : > { %9502 = vmatmul.mubr.msk.f32.gmra.mrb[6].mxu1 %vm13288_vm1, %v10720_v25  ;;  %v13302_v25 = vmov 0.0  }
  0xa4   : > { %9504 = vmatprep.mubr.msk.f32.mxu1 %vm13288_vm1, %v10728_v27  ;;  %748 = vst.msk [vmem:[#allocation3 + $0x8] sm:$0xff] %vm13288_vm1, %v13302_v25  ;;  %747 = vst.msk [vmem:[#allocation3] sm:$0xff] %vm13288_vm1, %v13302_v25  ;;  %v11358_v27 = vld [vmem:[%s10610_s10 + $0x71] sm:$0xff] }
  0xa5   : > { %9355 = vmatmul.mubr.msk.f32.gmra.mrb[8].mxu0 %vm13288_vm1, %v10725_v26  ;;  %749 = vst.msk [vmem:[#allocation3 + $0x10] sm:$0xff] %vm13288_vm1, %v13302_v25  ;;  %750 = vst.msk [vmem:[#allocation3 + $0x18] sm:$0xff] %vm13288_vm1, %v13302_v25  ;;  %v11355_v26 = vld [vmem:[%s10610_s10 + $0x69] sm:$0xff] }
  0xa6   : > { %9357 = vmatprep.mubr.msk.f32.mxu0 %vm13288_vm1, %v10731_v28  ;;  %751 = vst.msk [vmem:[#allocation3 + $0x20] sm:$0xff] %vm13288_vm1, %v13302_v25  ;;  %752 = vst.msk [vmem:[#allocation3 + $0x28] sm:$0xff] %vm13288_vm1, %v13302_v25  ;;  %v11365_v28 = vld [vmem:[%s10610_s10 + $0x79] sm:$0xff] }
  0xa7   : > { %9505 = vmatmul.mubr.msk.f32.gmra.mrb[8].mxu1 %vm13288_vm1, %v10740_v29  ;;  %753 = vst.msk [vmem:[#allocation3 + $0x30] sm:$0xff] %vm13288_vm1, %v13302_v25  ;;  %754 = vst.msk [vmem:[#allocation3 + $0x38] sm:$0xff] %vm13288_vm1, %v13302_v25  ;;  %v11368_v29 = vld [vmem:[%s10610_s10 + $0x81] sm:$0xff] }
  0xa8   : > { %9507 = vmatprep.mubr.msk.f32.mxu1 %vm13288_vm1, %v10753_v32  ;;  %755 = vst.msk [vmem:[#allocation3 + $0x40] sm:$0xff] %vm13288_vm1, %v13302_v25  ;;  %756 = vst.msk [vmem:[#allocation3 + $0x48] sm:$0xff] %vm13288_vm1, %v13302_v25  ;;  %v11378_v32 = vld [vmem:[%s10610_s10 + $0x91] sm:$0xff] }
  0xa9   : > { %9358 = vmatmul.mubr.msk.f32.gmra.mrb[10].mxu0 %vm13288_vm1, %v10750_v31  ;;  %757 = vst.msk [vmem:[#allocation3 + $0x50] sm:$0xff] %vm13288_vm1, %v13302_v25  ;;  %758 = vst.msk [vmem:[#allocation3 + $0x58] sm:$0xff] %vm13288_vm1, %v13302_v25  ;;  %v11375_v31 = vld [vmem:[%s10610_s10 + $0x89] sm:$0xff] }
  0xaa   : > { %9360 = vmatprep.mubr.msk.f32.mxu0 %vm13288_vm1, %v10758_v33  ;;  %759 = vst.msk [vmem:[#allocation3 + $0x60] sm:$0xff] %vm13288_vm1, %v13302_v25  ;;  %760 = vst.msk [vmem:[#allocation3 + $0x68] sm:$0xff] %vm13288_vm1, %v13302_v25  ;;  %v11385_v33 = vld [vmem:[%s10610_s10 + $0x99] sm:$0xff] }
  0xab   : > { %9508 = vmatmul.mubr.msk.f32.gmra.mrb[10].mxu1 %vm13288_vm1, %v10767_v34  ;;  %761 = vst.msk [vmem:[#allocation3 + $0x70] sm:$0xff] %vm13288_vm1, %v13302_v25  ;;  %762 = vst.msk [vmem:[#allocation3 + $0x78] sm:$0xff] %vm13288_vm1, %v13302_v25  ;;  %v11388_v34 = vld [vmem:[%s10610_s10 + $0xa1] sm:$0xff] }
  0xac   : > { %9510 = vmatprep.mubr.msk.f32.mxu1 %vm13288_vm1, %v10775_v36  ;;  %763 = vst.msk [vmem:[#allocation3 + $0x80] sm:$0xff] %vm13288_vm1, %v13302_v25  ;;  %764 = vst.msk [vmem:[#allocation3 + $0x88] sm:$0xff] %vm13288_vm1, %v13302_v25  ;;  %v11398_v36 = vld [vmem:[%s10610_s10 + $0xb1] sm:$0xff]  ;;  %v1861_v62 = vld [vmem:[#allocation3] sm:$0xff] }
  0xad   : > { %9361 = vmatmul.mubr.msk.f32.gmra.mrb[12].mxu0 %vm13288_vm1, %v10772_v35  ;;  %765 = vst.msk [vmem:[#allocation3 + $0x90] sm:$0xff] %vm13288_vm1, %v13302_v25  ;;  %766 = vst.msk [vmem:[#allocation3 + $0x98] sm:$0xff] %vm13288_vm1, %v13302_v25  ;;  %v11395_v35 = vld [vmem:[%s10610_s10 + $0xa9] sm:$0xff] }
  0xae   : > { %9363 = vmatprep.mubr.msk.f32.mxu0 %vm13288_vm1, %v10778_v37  ;;  %767 = vst.msk [vmem:[#allocation3 + $0xa0] sm:$0xff] %vm13288_vm1, %v13302_v25  ;;  %768 = vst.msk [vmem:[#allocation3 + $0xa8] sm:$0xff] %vm13288_vm1, %v13302_v25  ;;  %v11405_v37 = vld [vmem:[%s10610_s10 + $0xb9] sm:$0xff] }
  0xaf   : > { %9511 = vmatmul.mubr.msk.f32.gmra.mrb[12].mxu1 %vm13288_vm1, %v10787_v38  ;;  %769 = vst.msk [vmem:[#allocation3 + $0xb0] sm:$0xff] %vm13288_vm1, %v13302_v25  ;;  %770 = vst.msk [vmem:[#allocation3 + $0xb8] sm:$0xff] %vm13288_vm1, %v13302_v25  ;;  %v11408_v38 = vld [vmem:[%s10610_s10 + $0xc1] sm:$0xff] }
  0xb0   : > { %9513 = vmatprep.mubr.msk.f32.mxu1 %vm13288_vm1, %v10795_v40  ;;  %771 = vst.msk [vmem:[#allocation3 + $0xc0] sm:$0xff] %vm13288_vm1, %v13302_v25  ;;  %772 = vst.msk [vmem:[#allocation3 + $0xc8] sm:$0xff] %vm13288_vm1, %v13302_v25  ;;  %v11418_v40 = vld [vmem:[%s10610_s10 + $0xd1] sm:$0xff] }
  0xb1   : > { %9364 = vmatmul.mubr.msk.f32.gmra.mrb[14].mxu0 %vm13288_vm1, %v10792_v39  ;;  %773 = vst.msk [vmem:[#allocation3 + $0xd0] sm:$0xff] %vm13288_vm1, %v13302_v25  ;;  %774 = vst.msk [vmem:[#allocation3 + $0xd8] sm:$0xff] %vm13288_vm1, %v13302_v25  ;;  %v11415_v39 = vld [vmem:[%s10610_s10 + $0xc9] sm:$0xff] }
  0xb2   : > { %9366 = vmatprep.mubr.msk.f32.mxu0 %vm13288_vm1, %v10798_v41  ;;  %775 = vst.msk [vmem:[#allocation3 + $0xe0] sm:$0xff] %vm13288_vm1, %v13302_v25  ;;  %776 = vst.msk [vmem:[#allocation3 + $0xe8] sm:$0xff] %vm13288_vm1, %v13302_v25  ;;  %v11425_v41 = vld [vmem:[%s10610_s10 + $0xd9] sm:$0xff] }
  0xb3   : > { %9514 = vmatmul.mubr.msk.f32.gmra.mrb[14].mxu1 %vm13288_vm1, %v10807_v42  ;;  %777 = vst.msk [vmem:[#allocation3 + $0xf0] sm:$0xff] %vm13288_vm1, %v13302_v25  ;;  %778 = vst.msk [vmem:[#allocation3 + $0xf8] sm:$0xff] %vm13288_vm1, %v13302_v25  ;;  %v11428_v42 = vld [vmem:[%s10610_s10 + $0xe1] sm:$0xff] }
  0xb4   : > { %9516 = vmatprep.mubr.msk.f32.mxu1 %vm13288_vm1, %v10815_v44  ;;  %4353 = vst.msk [vmem:[#allocation2 + $0x8] sm:$0xff] %vm13288_vm1, %v13302_v25  ;;  %4354 = vst.msk [vmem:[#allocation2 + $0x10] sm:$0xff] %vm13288_vm1, %v13302_v25  ;;  %v11438_v44 = vld [vmem:[%s10610_s10 + $0xf1] sm:$0xff] }
  0xb5   : > { %9367 = vmatmul.mubr.msk.f32.gmra.mrb[16].mxu0 %vm13288_vm1, %v10812_v43  ;;  %4355 = vst.msk [vmem:[#allocation2 + $0x18] sm:$0xff] %vm13288_vm1, %v13302_v25  ;;  %4356 = vst.msk [vmem:[#allocation2 + $0x120] sm:$0xff] %vm13288_vm1, %v13302_v25  ;;  %v11435_v43 = vld [vmem:[%s10610_s10 + $0xe9] sm:$0xff] }
  0xb6   : > { %9369 = vmatprep.mubr.msk.f32.mxu0 %vm13288_vm1, %v10818_v45  ;;  %4357 = vst.msk [vmem:[#allocation2 + $0x128] sm:$0xff] %vm13288_vm1, %v13302_v25  ;;  %4358 = vst.msk [vmem:[#allocation2 + $0x130] sm:$0xff] %vm13288_vm1, %v13302_v25  ;;  %v11445_v45 = vld [vmem:[%s10610_s10 + $0xf9] sm:$0xff] }
  0xb7   : > { %9517 = vmatmul.mubr.msk.f32.gmra.mrb[16].mxu1 %vm13288_vm1, %v10827_v46  ;;  %v11448_v46 = vld [vmem:[%s10610_s10 + $0x101] sm:$0xff] }
  0xb8   : > { %9519 = vmatprep.mubr.msk.f32.mxu1 %vm13288_vm1, %v10835_v48  ;;  %v11458_v48 = vld [vmem:[%s10610_s10 + $0x111] sm:$0xff] }
  0xb9   : > { %9370 = vmatmul.mubr.msk.f32.gmra.mrb[18].mxu0 %vm13288_vm1, %v10832_v47  ;;  %v11455_v47 = vld [vmem:[%s10610_s10 + $0x109] sm:$0xff] }
  0xba   : > { %9372 = vmatprep.mubr.msk.f32.mxu0 %vm13288_vm1, %v10838_v49  ;;  %v11465_v49 = vld [vmem:[%s10610_s10 + $0x119] sm:$0xff] }
  0xbb   : > { %9520 = vmatmul.mubr.msk.f32.gmra.mrb[18].mxu1 %vm13288_vm1, %v10847_v50  ;;  %v3039_v50 = vld [vmem:[%s10610_s10 + $0x11] sm:$0xff] }
  0xbc   : > { %9522 = vmatprep.mubr.msk.f32.mxu1 %vm13288_vm1, %v10855_v52  ;;  %v8336_v52 = vld [vmem:[%s13267_s3 + $0xc] sm:$0xf] }
  0xbd   : > { %9373 = vmatmul.mubr.msk.f32.gmra.mrb[20].mxu0 %vm13288_vm1, %v10852_v51  ;;  %v3040_v51 = vld [vmem:[%s10610_s10 + $0x19] sm:$0xff]  ;;  %9690 = vmatprep.subr.msk.mxu1 %vm13283_vm0, %v8336_v52 }
  0xbe   : > { %9375 = vmatprep.mubr.msk.f32.mxu0 %vm13288_vm1, %v10858_v53  ;;  %9691 = vmatpush3.msk.msra.mxu1 %vm13283_vm0, %v8336_v52  ;;  %v265_v53 = vlaneseq }
  0xbf   : > { %9523 = vmatmul.mubr.msk.f32.gmra.mrb[20].mxu1 %vm13288_vm1, %v10867_v54 }
  0xc0   : > { %9525 = vmatprep.mubr.msk.f32.mxu1 %vm13288_vm1, %v10875_v56  ;;  %v11554_v54 = vshrl.u32 %v265_v53, 7 }
  0xc1   : > { %9376 = vmatmul.mubr.msk.f32.gmra.mrb[22].mxu0 %vm13288_vm1, %v10872_v55 }
  0xc2   : > { %9378 = vmatprep.mubr.msk.f32.mxu0 %vm13288_vm1, %v10878_v57  ;;  %v302_v55 = vand.u32 15, %v11554_v54  ;;  %v268_v56 = vadd.s32 16, %v11554_v54  ;;  %v1862_v57 = vld [vmem:[#allocation3 + $0x8] sm:$0xff]  ;;  %v270_v60 = vadd.s32 32, %v11554_v54 }
  0xc3   : > { %9526 = vmatmul.mubr.msk.f32.gmra.mrb[22].mxu1 %vm13288_vm1, %v10887_v58  ;;  %v13370_v58 = vmov 0 }
  0xc4   : > { %9528 = vmatprep.mubr.msk.f32.mxu1 %vm13288_vm1, %v13363_v4  ;;  %vm11566_vm2 = vcmp.ne.s32.totalorder %v302_v55, 0  ;;  %v13373_v4 = vmov 0 }
  0xc5   : > { %9379 = vmatmul.mubr.msk.f32.gmra.mrb[24].mxu0 %vm13288_vm1, %v10892_v59  ;;  %v13371_v58 = vsel %vm11566_vm2, 4294967295, %v13370_v58  ;;  %v316_v59 = vand.u32 15, %v268_v56 }
  0xc6   : > { %9381 = vmatprep.mubr.msk.f32.mxu0 %vm13288_vm1, %v13364_v5  ;;  %13372 = vst [vmem:[#allocation4_spill] sm:$0xff] %v13371_v58  ;;  %v330_v5 = vand.u32 15, %v270_v60  ;;  %v13382_v60 = vmov 0 }
  0xc7   : > { %9529 = vmatmul.mubr.msk.f32.gmra.mrb[24].mxu1 %vm13288_vm1, %v13365_v7  ;;  %vm11578_vm3 = vcmp.ne.s32.totalorder %v316_v59, 0  ;;  %v1870_v59 = vld [vmem:[#allocation3 + $0x48] sm:$0xff] }
  0xc8   : > { %9531 = vmatprep.mubr.msk.f32.mxu1 %vm13288_vm1, %v13367_v9  ;;  %v13374_v4 = vsel %vm11578_vm3, 4294967295, %v13373_v4  ;;  %vm11592_vm4 = vcmp.ne.s32.totalorder %v330_v5, 0 }
  0xc9   : > { %9382 = vmatmul.mubr.msk.f32.gmra.mrb[26].mxu0 %vm13288_vm1, %v13366_v8  ;;  %13375 = vst [vmem:[#allocation5_spill] sm:$0xff] %v13374_v4  ;;  %v272_v8 = vadd.s32 48, %v11554_v54 }
  0xca   : > { %9384 = vmatprep.mubr.msk.f32.mxu0 %vm13288_vm1, %v13368_v6 }
  0xcb   : > { %9532 = vmatmul.mubr.msk.f32.gmra.mrb[26].mxu1 %vm13288_vm1, %v10927_v2  ;;  %v1864_v2 = vld [vmem:[#allocation3 + $0x18] sm:$0xff] }
  0xcc   : > { %9534 = vmatprep.mubr.msk.f32.mxu1 %vm13288_vm1, %v10935_v61 }
  0xcd   : > { %9385 = vmatmul.mubr.msk.f32.gmra.mrb[28].mxu0 %vm13288_vm1, %v13369_v11 }
  0xce   : > { %9387 = vmatprep.mubr.msk.f32.mxu0 %vm13288_vm1, %v1405_v10 }
  0xcf   : > { %9535 = vmatmul.mubr.msk.f32.gmra.mrb[28].mxu1 %vm13288_vm1, %v10945_v0 }
  0xd0   : > { %9537 = vmatprep.mubr.msk.f32.mxu1 %vm13288_vm1, %v2583_v13  ;;  %v1866_v13 = vld [vmem:[#allocation3 + $0x28] sm:$0xff] }
  0xd1   : > { %9388 = vmatmul.mubr.msk.f32.gmra.mrb[30].mxu0 %vm13288_vm1, %v1406_v12 }
  0xd2   : > { %9542 = vmatprep.mubr.msk.f32.mxu0 %vm13288_vm1, %v11219_v14 }
  0xd3   : > { %9538 = vmatmul.mubr.msk.f32.gmra.mrb[30].mxu1 %vm13288_vm1, %v2584_v15 }
  0xd5   : > { %9543 = vmatmul.mubr.msk.f32.vlgmr.msra.gmra.mrb[32].mxu0 %vm13288_vm1, %v11229_v16 }
  0xd6   : > { %9591 = vmatpush3.msk.msra.mxu0 %vm13283_vm0, %v11092_v30  ;;  %9545 = vmatprep.mubr.msk.f32.mxu0 %vm13288_vm1, %v11232_v17  ;;  %v1863_v30 = vld [vmem:[#allocation3 + $0x10] sm:$0xff] }
  0xd7   : > { %9640 = vmatprep.subr.msk.mxu0 %vm13283_vm0, %v11238_v18 }
  0xd9   : > { %9546 = vmatmul.mubr.msk.f32.gmra.mrb[34].mxu0 %vm13288_vm1, %v11247_v19 }
  0xda   : > { %9548 = vmatprep.mubr.msk.f32.mxu0 %vm13288_vm1, %v11250_v20 }
  0xdd   : > { %9549 = vmatmul.mubr.msk.f32.gmra.mrb[36].mxu0 %vm13288_vm1, %v11259_v21 }
  0xde   : > { %9551 = vmatprep.mubr.msk.f32.mxu0 %vm13288_vm1, %v11262_v22 }
  0xe1   : > { %9552 = vmatmul.mubr.msk.f32.gmra.mrb[38].mxu0 %vm13288_vm1, %v11269_v23 }
  0xe2   : > { %9554 = vmatprep.mubr.msk.f32.mxu0 %vm13288_vm1, %v11272_v24 }
  0xe5   : > { %9555 = vmatmul.mubr.msk.f32.gmra.mrb[40].mxu0 %vm13288_vm1, %v11355_v26 }
  0xe6   : > { %9557 = vmatprep.mubr.msk.f32.mxu0 %vm13288_vm1, %v11358_v27 }
  0xe9   : > { %9558 = vmatmul.mubr.msk.f32.gmra.mrb[42].mxu0 %vm13288_vm1, %v11365_v28 }
  0xea   : > { %9560 = vmatprep.mubr.msk.f32.mxu0 %vm13288_vm1, %v11368_v29 }
  0xed   : > { %9561 = vmatmul.mubr.msk.f32.gmra.mrb[44].mxu0 %vm13288_vm1, %v11375_v31 }
  0xee   : > { %9563 = vmatprep.mubr.msk.f32.mxu0 %vm13288_vm1, %v11378_v32 }
  0xf1   : > { %9564 = vmatmul.mubr.msk.f32.gmra.mrb[46].mxu0 %vm13288_vm1, %v11385_v33 }
  0xf2   : > { %9566 = vmatprep.mubr.msk.f32.mxu0 %vm13288_vm1, %v11388_v34 }
  0xf5   : > { %9567 = vmatmul.mubr.msk.f32.gmra.mrb[48].mxu0 %vm13288_vm1, %v11395_v35 }
  0xf6   : > { %9569 = vmatprep.mubr.msk.f32.mxu0 %vm13288_vm1, %v11398_v36 }
  0xf9   : > { %9570 = vmatmul.mubr.msk.f32.gmra.mrb[50].mxu0 %vm13288_vm1, %v11405_v37 }
  0xfa   : > { %9572 = vmatprep.mubr.msk.f32.mxu0 %vm13288_vm1, %v11408_v38 }
  0xfd   : > { %9573 = vmatmul.mubr.msk.f32.gmra.mrb[52].mxu0 %vm13288_vm1, %v11415_v39 }
  0xfe   : > { %9575 = vmatprep.mubr.msk.f32.mxu0 %vm13288_vm1, %v11418_v40 }
 0x101   : > { %9576 = vmatmul.mubr.msk.f32.gmra.mrb[54].mxu0 %vm13288_vm1, %v11425_v41 }
 0x102   : > { %9578 = vmatprep.mubr.msk.f32.mxu0 %vm13288_vm1, %v11428_v42 }
 0x105   : > { %9579 = vmatmul.mubr.msk.f32.gmra.mrb[56].mxu0 %vm13288_vm1, %v11435_v43 }
 0x106   : > { %9581 = vmatprep.mubr.msk.f32.mxu0 %vm13288_vm1, %v11438_v44 }
 0x109   : > { %9582 = vmatmul.mubr.msk.f32.gmra.mrb[58].mxu0 %vm13288_vm1, %v11445_v45 }
 0x10a   : > { %9584 = vmatprep.mubr.msk.f32.mxu0 %vm13288_vm1, %v11448_v46 }
 0x10d   : > { %9585 = vmatmul.mubr.msk.f32.gmra.mrb[60].mxu0 %vm13288_vm1, %v11455_v47 }
 0x10e   : > { %9587 = vmatprep.mubr.msk.f32.mxu0 %vm13288_vm1, %v11458_v48 }
 0x111   : > { %9588 = vmatmul.mubr.msk.f32.gmra.mrb[62].mxu0 %vm13288_vm1, %v11465_v49 }
 0x112   : > { %9592 = vmatprep.mubr.msk.f32.mxu0 %vm13288_vm1, %v3039_v50 }
 0x115   : > { %9593 = vmatmul.mubr.msk.f32.vlgmr.msra.gmra.mrb[32].mxu0 %vm13288_vm1, %v3040_v51  ;;  %v1867_v51 = vld [vmem:[#allocation3 + $0x30] sm:$0xff] }
 0x116   : > { %9641 = vmatpush3.msk.msra.mxu0 %vm13283_vm0, %v11238_v18  ;;  %9595 = vmatprep.mubr.msk.f32.mxu0 %vm13288_vm1, %v11219_v14  ;;  %v274_v14 = vadd.s32 64, %v11554_v54 }
 0x119   : > { %9596 = vmatmul.mubr.msk.f32.gmra.mrb[34].mxu0 %vm13288_vm1, %v11229_v16  ;;  %v13376_v16 = vmov 0 }
 0x11a   : > { %9598 = vmatprep.mubr.msk.f32.mxu0 %vm13288_vm1, %v11232_v17  ;;  %v13377_v16 = vsel %vm11592_vm4, 4294967295, %v13376_v16 }
 0x11b   : > { %13378 = vst [vmem:[#allocation6_spill] sm:$0xff] %v13377_v16 }
 0x11d   : > { %9599 = vmatmul.mubr.msk.f32.gmra.mrb[36].mxu0 %vm13288_vm1, %v11247_v19 }
 0x11e   : > { %9601 = vmatprep.mubr.msk.f32.mxu0 %vm13288_vm1, %v11250_v20 }
 0x121   : > { %9602 = vmatmul.mubr.msk.f32.gmra.mrb[38].mxu0 %vm13288_vm1, %v11259_v21 }
 0x122   : > { %9604 = vmatprep.mubr.msk.f32.mxu0 %vm13288_vm1, %v11262_v22 }
 0x125   : > { %9605 = vmatmul.mubr.msk.f32.gmra.mrb[40].mxu0 %vm13288_vm1, %v11269_v23 }
 0x126   : > { %9607 = vmatprep.mubr.msk.f32.mxu0 %vm13288_vm1, %v11272_v24 }
 0x129   : > { %9608 = vmatmul.mubr.msk.f32.gmra.mrb[42].mxu0 %vm13288_vm1, %v11355_v26 }
 0x12a   : > { %9610 = vmatprep.mubr.msk.f32.mxu0 %vm13288_vm1, %v11358_v27 }
 0x12d   : > { %9611 = vmatmul.mubr.msk.f32.gmra.mrb[44].mxu0 %vm13288_vm1, %v11365_v28 }
 0x12e   : > { %9613 = vmatprep.mubr.msk.f32.mxu0 %vm13288_vm1, %v11368_v29 }
 0x131   : > { %9614 = vmatmul.mubr.msk.f32.gmra.mrb[46].mxu0 %vm13288_vm1, %v11375_v31 }
 0x132   : > { %9616 = vmatprep.mubr.msk.f32.mxu0 %vm13288_vm1, %v11378_v32 }
 0x135   : > { %9617 = vmatmul.mubr.msk.f32.gmra.mrb[48].mxu0 %vm13288_vm1, %v11385_v33 }
 0x136   : > { %9619 = vmatprep.mubr.msk.f32.mxu0 %vm13288_vm1, %v11388_v34 }
 0x139   : > { %9620 = vmatmul.mubr.msk.f32.gmra.mrb[50].mxu0 %vm13288_vm1, %v11395_v35 }
 0x13a   : > { %9622 = vmatprep.mubr.msk.f32.mxu0 %vm13288_vm1, %v11398_v36 }
 0x13d   : > { %9623 = vmatmul.mubr.msk.f32.gmra.mrb[52].mxu0 %vm13288_vm1, %v11405_v37 }
 0x13e   : > { %9625 = vmatprep.mubr.msk.f32.mxu0 %vm13288_vm1, %v11408_v38 }
 0x141   : > { %9626 = vmatmul.mubr.msk.f32.gmra.mrb[54].mxu0 %vm13288_vm1, %v11415_v39 }
 0x142   : > { %9628 = vmatprep.mubr.msk.f32.mxu0 %vm13288_vm1, %v11418_v40 }
 0x145   : > { %9629 = vmatmul.mubr.msk.f32.gmra.mrb[56].mxu0 %vm13288_vm1, %v11425_v41 }
 0x146   : > { %9631 = vmatprep.mubr.msk.f32.mxu0 %vm13288_vm1, %v11428_v42 }
 0x149   : > { %9632 = vmatmul.mubr.msk.f32.gmra.mrb[58].mxu0 %vm13288_vm1, %v11435_v43 }
 0x14a   : > { %9634 = vmatprep.mubr.msk.f32.mxu0 %vm13288_vm1, %v11438_v44 }
 0x14d   : > { %9635 = vmatmul.mubr.msk.f32.gmra.mrb[60].mxu0 %vm13288_vm1, %v11445_v45 }
 0x14e   : > { %9637 = vmatprep.mubr.msk.f32.mxu0 %vm13288_vm1, %v11448_v46 }
 0x151   : > { %9638 = vmatmul.mubr.msk.f32.gmra.mrb[62].mxu0 %vm13288_vm1, %v11455_v47 }
 0x152   : > { %9642 = vmatprep.mubr.msk.f32.mxu0 %vm13288_vm1, %v11232_v17  ;;  %v344_v17 = vand.u32 15, %v272_v8 }
 0x154   : > { %vm11604_vm5 = vcmp.ne.s32.totalorder %v344_v17, 0 }
 0x155   : > { %9643 = vmatmul.mubr.msk.f32.vlgmr.msra.gmra.mrb[32].mxu0 %vm13288_vm1, %v11247_v19 }
 0x156   : > { %9645 = vmatprep.mubr.msk.f32.mxu0 %vm13288_vm1, %v11250_v20  ;;  %v1865_v20 = vld [vmem:[#allocation3 + $0x20] sm:$0xff] }
 0x159   : > { %9646 = vmatmul.mubr.msk.f32.gmra.mrb[34].mxu0 %vm13288_vm1, %v11259_v21 }
 0x15a   : > { %9648 = vmatprep.mubr.msk.f32.mxu0 %vm13288_vm1, %v11262_v22 }
 0x15d   : > { %9649 = vmatmul.mubr.msk.f32.gmra.mrb[36].mxu0 %vm13288_vm1, %v11269_v23 }
 0x15e   : > { %9651 = vmatprep.mubr.msk.f32.mxu0 %vm13288_vm1, %v11272_v24 }
 0x161   : > { %9652 = vmatmul.mubr.msk.f32.gmra.mrb[38].mxu0 %vm13288_vm1, %v11355_v26 }
 0x162   : > { %9654 = vmatprep.mubr.msk.f32.mxu0 %vm13288_vm1, %v11358_v27  ;;  %v1868_v27 = vld [vmem:[#allocation3 + $0x38] sm:$0xff] }
 0x165   : > { %9655 = vmatmul.mubr.msk.f32.gmra.mrb[40].mxu0 %vm13288_vm1, %v11365_v28  ;;  %v358_v28 = vand.u32 15, %v274_v14 }
 0x166   : > { %9657 = vmatprep.mubr.msk.f32.mxu0 %vm13288_vm1, %v11368_v29 }
 0x167   : > { %vm11617_vm6 = vcmp.ne.s32.totalorder %v358_v28, 0 }
 0x168   : > { %v9344_v61 = vpop.f32.mrb[0].mxu0  ;;  %v13383_v60 = vsel %vm11617_vm6, 4294967295, %v13382_v60 }
 0x169   : > { %v1894_v63 = vadd.f32 %v9344_v61, %v1862_v57  ;;  %v1574_v0 = vpop.f32.mrb[1].mxu0  ;;  %9658 = vmatmul.mubr.msk.f32.gmra.mrb[42].mxu0 %vm13288_vm1, %v11375_v31  ;;  %13384 = vst [vmem:[#allocation8_spill] sm:$0xff] %v13383_v60 }
 0x16a   : > { %v1829_v1 = vsel %vm11566_vm2, %v1574_v0, 0.0  ;;  %9660 = vmatprep.mubr.msk.f32.mxu0 %vm13288_vm1, %v11378_v32  ;;  %v9494_v7 = vpop.f32.mrb[0].mxu1  ;;  %v13379_v32 = vmov 0  ;;  %v278_v0 = vadd.s32 96, %v11554_v54 }
 0x16b   : > { %1926 = vst.msk [vmem:[#allocation3 + $0x8] sm:$0xff] %vm13288_vm1, %v1894_v63  ;;  %v1893_v3 = vadd.f32 %v1861_v62, %v1829_v1  ;;  %v2752_v6 = vpop.f32.mrb[1].mxu1  ;;  %v13380_v32 = vsel %vm11604_vm5, 4294967295, %v13379_v32 }
 0x16c   : > { %v9347_v9 = vpop.f32.mrb[2].mxu0  ;;  %13381 = vst [vmem:[#allocation7_spill] sm:$0xff] %v13380_v32 }
 0x16d   : > { %1925 = vst.msk [vmem:[#allocation3] sm:$0xff] %vm13288_vm1, %v1893_v3  ;;  %v1896_v10 = vadd.f32 %v9347_v9, %v1864_v2  ;;  %v1584_v11 = vpop.f32.mrb[3].mxu0  ;;  %9661 = vmatmul.mubr.msk.f32.gmra.mrb[44].mxu0 %vm13288_vm1, %v11385_v33  ;;  %v1869_v3 = vld [vmem:[#allocation3 + $0x40] sm:$0xff] }
 0x16e   : > { %v1831_v12 = vsel %vm11578_vm3, %v1584_v11, 0.0  ;;  %9663 = vmatprep.mubr.msk.f32.mxu0 %vm13288_vm1, %v11388_v34  ;;  %v9497_v18 = vpop.f32.mrb[2].mxu1  ;;  %v276_v34 = vadd.s32 80, %v11554_v54 }
 0x16f   : > { %1928 = vst.msk [vmem:[#allocation3 + $0x18] sm:$0xff] %vm13288_vm1, %v1896_v10  ;;  %v1895_v15 = vadd.f32 %v1863_v30, %v1831_v12  ;;  %v2762_v21 = vpop.f32.mrb[3].mxu1  ;;  %v280_v10 = vadd.s32 112, %v11554_v54 }
 0x170   : > { %v9350_v19 = vpop.f32.mrb[4].mxu0  ;;  %v372_v63 = vand.u32 15, %v276_v34 }
 0x171   : > { %1927 = vst.msk [vmem:[#allocation3 + $0x10] sm:$0xff] %vm13288_vm1, %v1895_v15  ;;  %v1898_v22 = vadd.f32 %v9350_v19, %v1866_v13  ;;  %v1594_v23 = vpop.f32.mrb[5].mxu0  ;;  %9664 = vmatmul.mubr.msk.f32.gmra.mrb[46].mxu0 %vm13288_vm1, %v11395_v35  ;;  %v13385_v13 = vmov 0 }
 0x172   : > { %v1833_v24 = vsel %vm11592_vm4, %v1594_v23, 0.0  ;;  %v2944_v26 = vld [vmem:[#allocation3 + $0x8] sm:$0xff]  ;;  %9666 = vmatprep.mubr.msk.f32.mxu0 %vm13288_vm1, %v11398_v36  ;;  %v9500_v33 = vpop.f32.mrb[4].mxu1  ;;  %vm11635_vm7 = vcmp.ne.s32.totalorder %v372_v63, 0 }
 0x173   : > { %1930 = vst.msk [vmem:[#allocation3 + $0x28] sm:$0xff] %vm13288_vm1, %v1898_v22  ;;  %v1897_v29 = vadd.f32 %v1865_v20, %v1833_v24  ;;  %v2976_v31 = vadd.f32 %v9494_v7, %v2944_v26  ;;  %v2772_v52 = vpop.f32.mrb[5].mxu1  ;;  %v13386_v13 = vsel %vm11635_vm7, 4294967295, %v13385_v13  ;;  %v1874_v24 = vld [vmem:[#allocation3 + $0x68] sm:$0xff]  ;;  %v400_v26 = vand.u32 15, %v280_v10 }
 0x174   : > { %v9353_v35 = vpop.f32.mrb[6].mxu0  ;;  %v2943_v50 = vld [vmem:[#allocation3] sm:$0xff]  ;;  %13387 = vst [vmem:[#allocation9_spill] sm:$0xff] %v13386_v13 }
 0x175   : > { %1929 = vst.msk [vmem:[#allocation3 + $0x20] sm:$0xff] %vm13288_vm1, %v1897_v29  ;;  %3008 = vst.msk [vmem:[#allocation3 + $0x8] sm:$0xff] %vm13288_vm1, %v2976_v31  ;;  %v1900_v36 = vadd.f32 %v9353_v35, %v1868_v27  ;;  %v2975_v53 = vadd.f32 %v2943_v50, %v2752_v6  ;;  %v1604_v55 = vpop.f32.mrb[7].mxu0  ;;  %9667 = vmatmul.mubr.msk.f32.gmra.mrb[48].mxu0 %vm13288_vm1, %v11405_v37  ;;  %v1872_v6 = vld [vmem:[#allocation3 + $0x58] sm:$0xff]  ;;  %v13388_v29 = vmov 0  ;;  %v282_v31 = vadd.s32 128, %v11554_v54 }
 0x176   : > { %v1835_v56 = vsel %vm11604_vm5, %v1604_v55, 0.0  ;;  %v2946_v57 = vld [vmem:[#allocation3 + $0x18] sm:$0xff]  ;;  %9669 = vmatprep.mubr.msk.f32.mxu0 %vm13288_vm1, %v11408_v38  ;;  %v9503_v37 = vpop.f32.mrb[6].mxu1  ;;  %v1873_v35 = vld [vmem:[#allocation3 + $0x60] sm:$0xff]  ;;  %vm11662_vm9 = vcmp.ne.s32.totalorder %v400_v26, 0  ;;  %v288_v26 = vadd.s32 176, %v11554_v54 }
 0x177   : > { %1932 = vst.msk [vmem:[#allocation3 + $0x38] sm:$0xff] %vm13288_vm1, %v1900_v36  ;;  %3007 = vst.msk [vmem:[#allocation3] sm:$0xff] %vm13288_vm1, %v2975_v53  ;;  %v1899_v61 = vadd.f32 %v1867_v51, %v1835_v56  ;;  %v2978_v62 = vadd.f32 %v9497_v18, %v2946_v57  ;;  %v2782_v5 = vpop.f32.mrb[7].mxu1  ;;  %v1871_v18 = vld [vmem:[#allocation3 + $0x50] sm:$0xff]  ;;  %v1876_v55 = vld [vmem:[#allocation3 + $0x78] sm:$0xff]  ;;  %v13391_v56 = vmov 0 }
 0x178   : > { %v9356_v1 = vpop.f32.mrb[8].mxu0  ;;  %v2945_v2 = vld [vmem:[#allocation3 + $0x10] sm:$0xff]  ;;  %v13392_v56 = vsel %vm11662_vm9, 4294967295, %v13391_v56 }
 0x179   : > { %1931 = vst.msk [vmem:[#allocation3 + $0x30] sm:$0xff] %vm13288_vm1, %v1899_v61  ;;  %3010 = vst.msk [vmem:[#allocation3 + $0x18] sm:$0xff] %vm13288_vm1, %v2978_v62  ;;  %v1902_v38 = vadd.f32 %v9356_v1, %v1870_v59  ;;  %v2977_v7 = vadd.f32 %v2945_v2, %v2762_v21  ;;  %v1614_v8 = vpop.f32.mrb[9].mxu0  ;;  %9670 = vmatmul.mubr.msk.f32.gmra.mrb[50].mxu0 %vm13288_vm1, %v11415_v39  ;;  %v386_v39 = vand.u32 15, %v278_v0  ;;  %v414_v61 = vand.u32 15, %v282_v31  ;;  %v1875_v0 = vld [vmem:[#allocation3 + $0x70] sm:$0xff] }
 0x17a   : > { %v1837_v9 = vsel %vm11617_vm6, %v1614_v8, 0.0  ;;  %v2948_v30 = vld [vmem:[#allocation3 + $0x28] sm:$0xff]  ;;  %9672 = vmatprep.mubr.msk.f32.mxu0 %vm13288_vm1, %v11418_v40  ;;  %v9506_v14 = vpop.f32.mrb[8].mxu1  ;;  %13393 = vst [vmem:[#allocation11_spill] sm:$0xff] %v13392_v56  ;;  %v284_v62 = vadd.s32 144, %v11554_v54  ;;  %v286_v8 = vadd.s32 160, %v11554_v54 }
 0x17b   : > { %1934 = vst.msk [vmem:[#allocation3 + $0x48] sm:$0xff] %vm13288_vm1, %v1902_v38  ;;  %3009 = vst.msk [vmem:[#allocation3 + $0x10] sm:$0xff] %vm13288_vm1, %v2977_v7  ;;  %v1901_v11 = vadd.f32 %v1869_v3, %v1837_v9  ;;  %v2980_v12 = vadd.f32 %v9500_v33, %v2948_v30  ;;  %v2792_v19 = vpop.f32.mrb[9].mxu1  ;;  %vm11649_vm8 = vcmp.ne.s32.totalorder %v386_v39, 0  ;;  %v1878_v7 = vld [vmem:[#allocation3 + $0x88] sm:$0xff]  ;;  %vm11680_vm10 = vcmp.ne.s32.totalorder %v414_v61, 0 }
 0x17c   : > { %v9359_v15 = vpop.f32.mrb[10].mxu0  ;;  %v2947_v17 = vld [vmem:[#allocation3 + $0x20] sm:$0xff]  ;;  %v13389_v29 = vsel %vm11649_vm8, 4294967295, %v13388_v29 }
 0x17d   : > { %1933 = vst.msk [vmem:[#allocation3 + $0x40] sm:$0xff] %vm13288_vm1, %v1901_v11  ;;  %3012 = vst.msk [vmem:[#allocation3 + $0x28] sm:$0xff] %vm13288_vm1, %v2980_v12  ;;  %v1904_v40 = vadd.f32 %v9359_v15, %v1872_v6  ;;  %v2979_v20 = vadd.f32 %v2947_v17, %v2772_v52  ;;  %v1624_v21 = vpop.f32.mrb[11].mxu0  ;;  %9673 = vmatmul.mubr.msk.f32.gmra.mrb[52].mxu0 %vm13288_vm1, %v11425_v41  ;;  %v13394_v6 = vmov 0  ;;  %v1877_v39 = vld [vmem:[#allocation3 + $0x80] sm:$0xff] }
 0x17e   : > { %v1839_v22 = vsel %vm11635_vm7, %v1624_v21, 0.0  ;;  %v2950_v23 = vld [vmem:[#allocation3 + $0x38] sm:$0xff]  ;;  %9675 = vmatprep.mubr.msk.f32.mxu0 %vm13288_vm1, %v11428_v42  ;;  %13390 = vst [vmem:[#allocation10_spill] sm:$0xff] %v13389_v29  ;;  %v9509_v41 = vpop.f32.mrb[10].mxu1  ;;  %v13395_v6 = vsel %vm11680_vm10, 4294967295, %v13394_v6 }
 0x17f   : > { %1936 = vst.msk [vmem:[#allocation3 + $0x58] sm:$0xff] %vm13288_vm1, %v1904_v40  ;;  %3011 = vst.msk [vmem:[#allocation3 + $0x20] sm:$0xff] %vm13288_vm1, %v2979_v20  ;;  %v1903_v27 = vadd.f32 %v1871_v18, %v1839_v22  ;;  %v2982_v28 = vadd.f32 %v9503_v37, %v2950_v23  ;;  %v2802_v50 = vpop.f32.mrb[11].mxu1  ;;  %v1880_v40 = vld [vmem:[#allocation3 + $0x98] sm:$0xff]  ;;  %v442_v20 = vand.u32 15, %v286_v8  ;;  %v13397_v23 = vmov 0 }
 0x180   : > { %v9362_v33 = vpop.f32.mrb[12].mxu0  ;;  %v2949_v34 = vld [vmem:[#allocation3 + $0x30] sm:$0xff]  ;;  %13396 = vst [vmem:[#allocation12_spill] sm:$0xff] %v13395_v6 }
 0x181   : > { %1935 = vst.msk [vmem:[#allocation3 + $0x50] sm:$0xff] %vm13288_vm1, %v1903_v27  ;;  %3014 = vst.msk [vmem:[#allocation3 + $0x38] sm:$0xff] %vm13288_vm1, %v2982_v28  ;;  %v1906_v42 = vadd.f32 %v9362_v33, %v1874_v24  ;;  %v2981_v51 = vadd.f32 %v2949_v34, %v2782_v5  ;;  %v1634_v52 = vpop.f32.mrb[13].mxu0  ;;  %9676 = vmatmul.mubr.msk.f32.gmra.mrb[54].mxu0 %vm13288_vm1, %v11435_v43  ;;  %vm11707_vm12 = vcmp.ne.s32.totalorder %v442_v20, 0  ;;  %v13406_v20 = vmov 0 }
 0x182   : > { %v1841_v36 = vsel %vm11649_vm8, %v1634_v52, 0.0  ;;  %v2952_v53 = vld [vmem:[#allocation3 + $0x48] sm:$0xff]  ;;  %9678 = vmatprep.mubr.msk.f32.mxu0 %vm13288_vm1, %v11438_v44  ;;  %v9512_v43 = vpop.f32.mrb[12].mxu1 }
 0x183   : > { %1938 = vst.msk [vmem:[#allocation3 + $0x68] sm:$0xff] %vm13288_vm1, %v1906_v42  ;;  %3013 = vst.msk [vmem:[#allocation3 + $0x30] sm:$0xff] %vm13288_vm1, %v2981_v51  ;;  %v1905_v57 = vadd.f32 %v1873_v35, %v1841_v36  ;;  %v2984_v59 = vadd.f32 %v9506_v14, %v2952_v53  ;;  %v2812_v1 = vpop.f32.mrb[13].mxu1  ;;  %v1882_v42 = vld [vmem:[#allocation3 + $0xa8] sm:$0xff]  ;;  %v13400_v51 = vmov 0 }
 0x184   : > { %v9365_v63 = vpop.f32.mrb[14].mxu0  ;;  %v2951_v37 = vld [vmem:[#allocation3 + $0x40] sm:$0xff]  ;;  %v13401_v51 = vsel %vm11707_vm12, 4294967295, %v13400_v51  ;;  %v3666_v52 = vld [vmem:[%s10610_s10 + $0x129] sm:$0xff] }
 0x185   : > { %1937 = vst.msk [vmem:[#allocation3 + $0x60] sm:$0xff] %vm13288_vm1, %v1905_v57  ;;  %3016 = vst.msk [vmem:[#allocation3 + $0x48] sm:$0xff] %vm13288_vm1, %v2984_v59  ;;  %v1908_v44 = vadd.f32 %v9365_v63, %v1876_v55  ;;  %v2983_v2 = vadd.f32 %v2951_v37, %v2792_v19  ;;  %v1644_v3 = vpop.f32.mrb[15].mxu0  ;;  %9679 = vmatmul.mubr.msk.f32.gmra.mrb[56].mxu0 %vm13288_vm1, %v11445_v45  ;;  %v428_v45 = vand.u32 15, %v284_v62  ;;  %v456_v55 = vand.u32 15, %v288_v26  ;;  %v1885_v26 = vld [vmem:[#allocation3 + $0xc0] sm:$0xff] }
 0x186   : > { %v1843_v5 = vsel %vm11662_vm9, %v1644_v3, 0.0  ;;  %v2954_v38 = vld [vmem:[#allocation3 + $0x58] sm:$0xff]  ;;  %9681 = vmatprep.mubr.msk.f32.mxu0 %vm13288_vm1, %v11448_v46  ;;  %v9515_v10 = vpop.f32.mrb[14].mxu1  ;;  %13402 = vst [vmem:[#allocation14_spill] sm:$0xff] %v13401_v51  ;;  %v290_v57 = vadd.s32 192, %v11554_v54  ;;  %v292_v3 = vadd.s32 208, %v11554_v54 }
 0x187   : > { %1940 = vst.msk [vmem:[#allocation3 + $0x78] sm:$0xff] %vm13288_vm1, %v1908_v44  ;;  %3015 = vst.msk [vmem:[#allocation3 + $0x40] sm:$0xff] %vm13288_vm1, %v2983_v2  ;;  %v1907_v9 = vadd.f32 %v1875_v0, %v1843_v5  ;;  %v2986_v30 = vadd.f32 %v9509_v41, %v2954_v38  ;;  %v2822_v14 = vpop.f32.mrb[15].mxu1  ;;  %vm11694_vm11 = vcmp.ne.s32.totalorder %v428_v45, 0  ;;  %v1879_v41 = vld [vmem:[#allocation3 + $0x90] sm:$0xff]  ;;  %v1884_v2 = vld [vmem:[#allocation3 + $0xb8] sm:$0xff] }
 0x188   : > { %v9368_v11 = vpop.f32.mrb[16].mxu0  ;;  %v2953_v12 = vld [vmem:[#allocation3 + $0x50] sm:$0xff]  ;;  %v13398_v23 = vsel %vm11694_vm11, 4294967295, %v13397_v23  ;;  %vm11723_vm13 = vcmp.ne.s32.totalorder %v456_v55, 0  ;;  %v470_v8 = vand.u32 15, %v290_v57 }
 0x189   : > { %1939 = vst.msk [vmem:[#allocation3 + $0x70] sm:$0xff] %vm13288_vm1, %v1907_v9  ;;  %3018 = vst.msk [vmem:[#allocation3 + $0x58] sm:$0xff] %vm13288_vm1, %v2986_v30  ;;  %v1910_v46 = vadd.f32 %v9368_v11, %v1878_v7  ;;  %v2985_v15 = vadd.f32 %v2953_v12, %v2802_v50  ;;  %v1654_v17 = vpop.f32.mrb[17].mxu0  ;;  %9682 = vmatmul.mubr.msk.f32.gmra.mrb[58].mxu0 %vm13288_vm1, %v11455_v47  ;;  %v3665_v47 = vld [vmem:[%s10610_s10 + $0x121] sm:$0xff]  ;;  %v13403_v7 = vmov 0  ;;  %v1887_v57 = vld [vmem:[#allocation3 + $0xd0] sm:$0xff] }
 0x18a   : > { %v1845_v18 = vsel %vm11680_vm10, %v1654_v17, 0.0  ;;  %v2956_v19 = vld [vmem:[#allocation3 + $0x68] sm:$0xff]  ;;  %9684 = vmatprep.mubr.msk.f32.mxu0 %vm13288_vm1, %v11458_v48  ;;  %13399 = vst [vmem:[#allocation13_spill] sm:$0xff] %v13398_v23  ;;  %v9518_v24 = vpop.f32.mrb[16].mxu1  ;;  %v13404_v7 = vsel %vm11723_vm13, 4294967295, %v13403_v7  ;;  %vm11733_vm14 = vcmp.ne.s32.totalorder %v470_v8, 0 }
 0x18b   : > { %1942 = vst.msk [vmem:[#allocation3 + $0x88] sm:$0xff] %vm13288_vm1, %v1910_v46  ;;  %3017 = vst.msk [vmem:[#allocation3 + $0x50] sm:$0xff] %vm13288_vm1, %v2985_v15  ;;  %v1909_v21 = vadd.f32 %v1877_v39, %v1845_v18  ;;  %v2988_v22 = vadd.f32 %v9512_v43, %v2956_v19  ;;  %v2832_v48 = vpop.f32.mrb[17].mxu1  ;;  %v1881_v43 = vld [vmem:[#allocation3 + $0xa0] sm:$0xff]  ;;  %v1886_v17 = vld [vmem:[#allocation3 + $0xc8] sm:$0xff]  ;;  %v484_v18 = vand.u32 15, %v292_v3 }
 0x18c   : > { %v9371_v27 = vpop.f32.mrb[18].mxu0  ;;  %v2955_v28 = vld [vmem:[#allocation3 + $0x60] sm:$0xff]  ;;  %13405 = vst [vmem:[#allocation15_spill] sm:$0xff] %v13404_v7  ;;  %v13407_v20 = vsel %vm11733_vm14, 4294967295, %v13406_v20 }
 0x18d   : > { %1941 = vst.msk [vmem:[#allocation3 + $0x80] sm:$0xff] %vm13288_vm1, %v1909_v21  ;;  %3020 = vst.msk [vmem:[#allocation3 + $0x68] sm:$0xff] %vm13288_vm1, %v2988_v22  ;;  %v1912_v31 = vadd.f32 %v9371_v27, %v1880_v40  ;;  %v2987_v33 = vadd.f32 %v2955_v28, %v2812_v1  ;;  %v1664_v34 = vpop.f32.mrb[19].mxu0  ;;  %9685 = vmatmul.mubr.msk.f32.gmra.mrb[60].mxu0 %vm13288_vm1, %v11465_v49  ;;  %v294_v22 = vadd.s32 224, %v11554_v54  ;;  %vm11742_vm15 = vcmp.ne.s32.totalorder %v484_v18, 0 }
 0x18e   : > { %v1847_v35 = vsel %vm11694_vm11, %v1664_v34, 0.0  ;;  %v2958_v50 = vld [vmem:[#allocation3 + $0x78] sm:$0xff]  ;;  %9687 = vmatprep.mubr.msk.f32.mxu0 %vm13288_vm1, %v3665_v47  ;;  %v9521_v49 = vpop.f32.mrb[18].mxu1  ;;  %13408 = vst [vmem:[#allocation16_spill] sm:$0xff] %v13407_v20 }
 0x18f   : > { %1944 = vst.msk [vmem:[#allocation3 + $0x98] sm:$0xff] %vm13288_vm1, %v1912_v31  ;;  %3019 = vst.msk [vmem:[#allocation3 + $0x60] sm:$0xff] %vm13288_vm1, %v2987_v33  ;;  %v1911_v36 = vadd.f32 %v1879_v41, %v1847_v35  ;;  %v2990_v53 = vadd.f32 %v9515_v10, %v2958_v50  ;;  %v2842_v62 = vpop.f32.mrb[19].mxu1  ;;  %v1883_v10 = vld [vmem:[#allocation3 + $0xb0] sm:$0xff]  ;;  %v1888_v34 = vld [vmem:[#allocation3 + $0xd8] sm:$0xff]  ;;  %v13409_v35 = vmov 0 }
 0x190   : > { %v9374_v59 = vpop.f32.mrb[20].mxu0  ;;  %v2957_v61 = vld [vmem:[#allocation3 + $0x70] sm:$0xff]  ;;  %v13410_v35 = vsel %vm11742_vm15, 4294967295, %v13409_v35 }
 0x191   : > { %1943 = vst.msk [vmem:[#allocation3 + $0x90] sm:$0xff] %vm13288_vm1, %v1911_v36  ;;  %3022 = vst.msk [vmem:[#allocation3 + $0x78] sm:$0xff] %vm13288_vm1, %v2990_v53  ;;  %v1914_v63 = vadd.f32 %v9374_v59, %v1882_v42  ;;  %v2989_v37 = vadd.f32 %v2957_v61, %v2822_v14  ;;  %v1674_v0 = vpop.f32.mrb[21].mxu0  ;;  %9688 = vmatmul.mubr.msk.f32.gmra.mrb[62].mxu0 %vm13288_vm1, %v3666_v52  ;;  %v498_v52 = vand.u32 15, %v294_v22  ;;  %v296_v53 = vadd.s32 240, %v11554_v54 }
 0x192   : > { %v1849_v1 = vsel %vm11707_vm12, %v1674_v0, 0.0  ;;  %v2960_v44 = vld [vmem:[#allocation3 + $0x88] sm:$0xff]  ;;  %v9524_v9 = vpop.f32.mrb[20].mxu1  ;;  %13411 = vst [vmem:[#allocation17_spill] sm:$0xff] %v13410_v35 }
 0x193   : > { %1946 = vst.msk [vmem:[#allocation3 + $0xa8] sm:$0xff] %vm13288_vm1, %v1914_v63  ;;  %3021 = vst.msk [vmem:[#allocation3 + $0x70] sm:$0xff] %vm13288_vm1, %v2989_v37  ;;  %v1913_v5 = vadd.f32 %v1881_v43, %v1849_v1  ;;  %v2992_v38 = vadd.f32 %v9518_v24, %v2960_v44  ;;  %v2852_v11 = vpop.f32.mrb[21].mxu1  ;;  %v1890_v0 = vld [vmem:[#allocation3 + $0xe8] sm:$0xff]  ;;  %vm11755_vm0 = vcmp.ne.s32.totalorder %v498_v52, 0  ;;  %v512_v3 = vand.u32 15, %v296_v53 }
 0x194   : > { %v9377_v30 = vpop.f32.mrb[22].mxu0  ;;  %v2959_v45 = vld [vmem:[#allocation3 + $0x80] sm:$0xff] }
 0x195   : > { %1945 = vst.msk [vmem:[#allocation3 + $0xa0] sm:$0xff] %vm13288_vm1, %v1913_v5  ;;  %3024 = vst.msk [vmem:[#allocation3 + $0x88] sm:$0xff] %vm13288_vm1, %v2992_v38  ;;  %v1916_v12 = vadd.f32 %v9377_v30, %v1884_v2  ;;  %v2991_v39 = vadd.f32 %v2959_v45, %v2832_v48  ;;  %v1684_v14 = vpop.f32.mrb[23].mxu0  ;;  %v13412_v2 = vmov 0 }
 0x196   : > { %v1851_v46 = vsel %vm11723_vm13, %v1684_v14, 0.0  ;;  %v2962_v15 = vld [vmem:[#allocation3 + $0x98] sm:$0xff]  ;;  %v9527_v21 = vpop.f32.mrb[22].mxu1  ;;  %v13413_v2 = vsel %vm11755_vm0, 4294967295, %v13412_v2 }
 0x197   : > { %1948 = vst.msk [vmem:[#allocation3 + $0xb8] sm:$0xff] %vm13288_vm1, %v1916_v12  ;;  %3023 = vst.msk [vmem:[#allocation3 + $0x80] sm:$0xff] %vm13288_vm1, %v2991_v39  ;;  %v1915_v19 = vadd.f32 %v1883_v10, %v1851_v46  ;;  %v2994_v40 = vadd.f32 %v9521_v49, %v2962_v15  ;;  %v2862_v27 = vpop.f32.mrb[23].mxu1  ;;  %v1892_v14 = vld [vmem:[#allocation3 + $0xf8] sm:$0xff] }
 0x198   : > { %v9380_v47 = vpop.f32.mrb[24].mxu0  ;;  %v2961_v24 = vld [vmem:[#allocation3 + $0x90] sm:$0xff]  ;;  %13414 = vst [vmem:[#allocation18_spill] sm:$0xff] %v13413_v2 }
 0x199   : > { %1947 = vst.msk [vmem:[#allocation3 + $0xb0] sm:$0xff] %vm13288_vm1, %v1915_v19  ;;  %3026 = vst.msk [vmem:[#allocation3 + $0x98] sm:$0xff] %vm13288_vm1, %v2994_v40  ;;  %v1918_v28 = vadd.f32 %v9380_v47, %v1886_v17  ;;  %v2993_v41 = vadd.f32 %v2961_v24, %v2842_v62  ;;  %v1694_v48 = vpop.f32.mrb[25].mxu0  ;;  %v13415_v17 = vmov 0 }
 0x19a   : > { %v1853_v31 = vsel %vm11733_vm14, %v1694_v48, 0.0  ;;  %v2964_v33 = vld [vmem:[#allocation3 + $0xa8] sm:$0xff]  ;;  %v9530_v36 = vpop.f32.mrb[24].mxu1 }
 0x19b   : > { %1950 = vst.msk [vmem:[#allocation3 + $0xc8] sm:$0xff] %vm13288_vm1, %v1918_v28  ;;  %3025 = vst.msk [vmem:[#allocation3 + $0x90] sm:$0xff] %vm13288_vm1, %v2993_v41  ;;  %v1917_v50 = vadd.f32 %v1885_v26, %v1853_v31  ;;  %v2996_v42 = vadd.f32 %v9524_v9, %v2964_v33  ;;  %v2872_v59 = vpop.f32.mrb[25].mxu1  ;;  %v1889_v9 = vld [vmem:[#allocation3 + $0xe0] sm:$0xff] }
 0x19c   : > { %v9383_v55 = vpop.f32.mrb[26].mxu0  ;;  %v2963_v49 = vld [vmem:[#allocation3 + $0xa0] sm:$0xff] }
 0x19d   : > { %1949 = vst.msk [vmem:[#allocation3 + $0xc0] sm:$0xff] %vm13288_vm1, %v1917_v50  ;;  %3028 = vst.msk [vmem:[#allocation3 + $0xa8] sm:$0xff] %vm13288_vm1, %v2996_v42  ;;  %v1920_v61 = vadd.f32 %v9383_v55, %v1888_v34  ;;  %v2995_v43 = vadd.f32 %v2963_v49, %v2852_v11  ;;  %v1704_v62 = vpop.f32.mrb[27].mxu0 }
 0x19e   : > { %v1855_v63 = vsel %vm11742_vm15, %v1704_v62, 0.0  ;;  %v2966_v37 = vld [vmem:[#allocation3 + $0xb8] sm:$0xff]  ;;  %v9533_v5 = vpop.f32.mrb[26].mxu1  ;;  %vm11765_vm15 = vcmp.ne.s32.totalorder %v512_v3, 0  ;;  %v11797_v62 = vld [vmem:[%s13267_s3 + $0x4] sm:$0xf] }
 0x19f   : > { %1952 = vst.msk [vmem:[#allocation3 + $0xd8] sm:$0xff] %vm13288_vm1, %v1920_v61  ;;  %3027 = vst.msk [vmem:[#allocation3 + $0xa0] sm:$0xff] %vm13288_vm1, %v2995_v43  ;;  %v1919_v1 = vadd.f32 %v1887_v57, %v1855_v63  ;;  %v2998_v44 = vadd.f32 %v9527_v21, %v2966_v37  ;;  %v2882_v30 = vpop.f32.mrb[27].mxu1  ;;  %v13416_v17 = vsel %vm11765_vm15, 4294967295, %v13415_v17  ;;  %v1891_v21 = vld [vmem:[#allocation3 + $0xf0] sm:$0xff]  ;;  %v267_v63 = vadd.s32 8, %v11554_v54 }
 0x1a0   : > { %v9386_v38 = vpop.f32.mrb[28].mxu0  ;;  %v2965_v8 = vld [vmem:[#allocation3 + $0xb0] sm:$0xff]  ;;  %13417 = vst [vmem:[#allocation19_spill] sm:$0xff] %v13416_v17  ;;  %v11790_v43 = vld [vmem:[%s13267_s3] sm:$0xf]  ;;  %v269_v37 = vadd.s32 24, %v11554_v54 }
 0x1a1   : > { %1951 = vst.msk [vmem:[#allocation3 + $0xd0] sm:$0xff] %vm13288_vm1, %v1919_v1  ;;  %3030 = vst.msk [vmem:[#allocation3 + $0xb8] sm:$0xff] %vm13288_vm1, %v2998_v44  ;;  %v1922_v45 = vadd.f32 %v9386_v38, %v1890_v0  ;;  %v2997_v10 = vadd.f32 %v2965_v8, %v2862_v27  ;;  %v1714_v11 = vpop.f32.mrb[29].mxu0  ;;  %v8438_v61 = vld [vmem:[%s13267_s3 + $0x10] sm:$0xf]  ;;  %v309_v0 = vand.u32 15, %v267_v63 }
 0x1a2   : > { %v1857_v12 = vsel %vm11755_vm0, %v1714_v11, 0.0  ;;  %v2968_v39 = vld [vmem:[#allocation3 + $0xc8] sm:$0xff]  ;;  %v9536_v18 = vpop.f32.mrb[28].mxu1  ;;  %v323_v1 = vand.u32 15, %v269_v37  ;;  %v13422_v44 = vmov 0  ;;  %v271_v3 = vadd.s32 40, %v11554_v54 }
 0x1a3   : > { %1954 = vst.msk [vmem:[#allocation3 + $0xe8] sm:$0xff] %vm13288_vm1, %v1922_v45  ;;  %3029 = vst.msk [vmem:[#allocation3 + $0xb0] sm:$0xff] %vm13288_vm1, %v2997_v10  ;;  %v1921_v46 = vadd.f32 %v1889_v9, %v1857_v12  ;;  %v3000_v15 = vadd.f32 %v9530_v36, %v2968_v39  ;;  %v2892_v22 = vpop.f32.mrb[29].mxu1  ;;  %v4122_v8 = vld [vmem:[#allocation3 + $0x8] sm:$0xff]  ;;  %v13425_v45 = vmov 0  ;;  %v273_v39 = vadd.s32 56, %v11554_v54 }
 0x1a4   : > { %v9389_v19 = vpop.f32.mrb[30].mxu0  ;;  %v2967_v40 = vld [vmem:[#allocation3 + $0xc0] sm:$0xff]  ;;  %v337_v12 = vand.u32 15, %v271_v3  ;;  %v4127_v37 = vld [vmem:[#allocation3 + $0x30] sm:$0xff]  ;;  %v279_v3 = vadd.s32 104, %v11554_v54 }
 0x1a5   : > { %1953 = vst.msk [vmem:[#allocation3 + $0xe0] sm:$0xff] %vm13288_vm1, %v1921_v46  ;;  %3032 = vst.msk [vmem:[#allocation3 + $0xc8] sm:$0xff] %vm13288_vm1, %v3000_v15  ;;  %v1924_v47 = vadd.f32 %v9389_v19, %v1892_v14  ;;  %v2999_v24 = vadd.f32 %v2967_v40, %v2872_v59  ;;  %v1724_v26 = vpop.f32.mrb[31].mxu0  ;;  %v4124_v15 = vld [vmem:[#allocation3 + $0x18] sm:$0xff]  ;;  %v4123_v19 = vld [vmem:[#allocation3 + $0x10] sm:$0xff]  ;;  %v275_v40 = vadd.s32 72, %v11554_v54 }
 0x1a6   : > { %v1859_v27 = vsel %vm11765_vm15, %v1724_v26, 0.0  ;;  %v2970_v28 = vld [vmem:[#allocation3 + $0xd8] sm:$0xff]  ;;  %v9539_v31 = vpop.f32.mrb[30].mxu1  ;;  %vm13418_vm15 = vcmask 1043456  }
 0x1a7   : > { %1956 = vst.msk [vmem:[#allocation3 + $0xf8] sm:$0xff] %vm13288_vm1, %v1924_v47  ;;  %3031 = vst.msk [vmem:[#allocation3 + $0xc0] sm:$0xff] %vm13288_vm1, %v2999_v24  ;;  %v1923_v41 = vadd.f32 %v1891_v21, %v1859_v27  ;;  %v3002_v48 = vadd.f32 %v9533_v5, %v2970_v28  ;;  %v2902_v34 = vpop.f32.mrb[31].mxu1  ;;  %9840 = vmatprep.subr.msk.mxu0 %vm13418_vm15, %v8438_v61  ;;  %v13430_v47 = vmov 0  ;;  %v351_v24 = vand.u32 15, %v273_v39  ;;  %v4126_v27 = vld [vmem:[#allocation3 + $0x28] sm:$0xff] }
 0x1a8   : > { %v2969_v33 = vld [vmem:[#allocation3 + $0xd0] sm:$0xff]  ;;  %vm13419_vm0 = vmmov %vm13418_vm15  ;;  %v4125_v28 = vld [vmem:[#allocation3 + $0x20] sm:$0xff]  ;;  %v281_v39 = vadd.s32 120, %v11554_v54 }
 0x1a9   : > { %1955 = vst.msk [vmem:[#allocation3 + $0xf0] sm:$0xff] %vm13288_vm1, %v1923_v41  ;;  %3034 = vst.msk [vmem:[#allocation3 + $0xd8] sm:$0xff] %vm13288_vm1, %v3002_v48  ;;  %v3001_v50 = vadd.f32 %v2969_v33, %v2882_v30  ;;  %9841 = vmatpush3.msk.msra.mxu0 %vm13419_vm0, %v8438_v61  ;;  %v4121_v30 = vld [vmem:[#allocation3] sm:$0xff]  ;;  %v365_v33 = vand.u32 15, %v275_v40  ;;  %v13450_v40 = vmov 0 }
 0x1aa   : > { %v2972_v42 = vld [vmem:[#allocation3 + $0xe8] sm:$0xff]  ;;  %vm13420_vm14 = vmmov %vm13419_vm0  ;;  %v11829_v41 = vld [vmem:[%s13266_s2] ss:$0 sm:$0xff] }
 0x1ab   : > { %3033 = vst.msk [vmem:[#allocation3 + $0xd0] sm:$0xff] %vm13288_vm1, %v3001_v50  ;;  %v3004_v52 = vadd.f32 %v9536_v18, %v2972_v42  ;;  %9740 = vmatprep.subr.msk.mxu1 %vm13420_vm14, %v11790_v43  ;;  %vm13428_vm14 = vcmask 31744  }
 0x1ac   : > { %v2971_v36 = vld [vmem:[#allocation3 + $0xe0] sm:$0xff]  ;;  %vm13429_vm15 = vmmov %vm13428_vm14 }
 0x1ad   : > { %3036 = vst.msk [vmem:[#allocation3 + $0xe8] sm:$0xff] %vm13288_vm1, %v3004_v52  ;;  %v3003_v53 = vadd.f32 %v2971_v36, %v2892_v22  ;;  %v13434_v52 = vmov 0 }
 0x1ae   : > { %v2974_v55 = vld [vmem:[#allocation3 + $0xf8] sm:$0xff] }
 0x1af   : > { %3035 = vst.msk [vmem:[#allocation3 + $0xe0] sm:$0xff] %vm13288_vm1, %v3003_v53  ;;  %v3006_v49 = vadd.f32 %v9539_v31, %v2974_v55 }
 0x1b0   : > { %v2973_v57 = vld [vmem:[#allocation3 + $0xf0] sm:$0xff] }
 0x1b1   : > { %3038 = vst.msk [vmem:[#allocation3 + $0xf8] sm:$0xff] %vm13288_vm1, %v3006_v49  ;;  %v3005_v59 = vadd.f32 %v2973_v57, %v2902_v34  ;;  %v277_v34 = vadd.s32 88, %v11554_v54 }
 0x1b3   : > { %3037 = vst.msk [vmem:[#allocation3 + $0xf0] sm:$0xff] %vm13288_vm1, %v3005_v59  ;;  %vm13421_vm1 = vmmov %vm13419_vm0  ;;  %vm11803_vm0 = vcmp.ne.s32.totalorder %v309_v0, 15  ;;  %v4128_v59 = vld [vmem:[#allocation3 + $0x38] sm:$0xff]  ;;  %v13440_v0 = vmov 0 }
 0x1b4   : > { %9890 = vmatprep.subr.msk.mxu0 %vm13421_vm1, %v11797_v62  ;;  %v13423_v44 = vsel %vm11803_vm0, 4294967295, %v13422_v44  ;;  %vm11810_vm1 = vcmp.ne.s32.totalorder %v323_v1, 15  ;;  %v379_v1 = vand.u32 15, %v277_v34  ;;  %v407_v34 = vand.u32 15, %v281_v39 }
 0x1b5   : > { %13424 = vst [vmem:[#allocation20_spill] sm:$0xff] %v13423_v44  ;;  %v13426_v45 = vsel %vm11810_vm1, 4294967295, %v13425_v45 }
 0x1b6   : > { %13427 = vst [vmem:[#allocation21_spill] sm:$0xff] %v13426_v45  ;;  %v4146_v45 = vld [vmem:[#allocation3 + $0xc8] sm:$0xff] }
 0x228   : > { %v9644_v5 = vpop.f32.mrb[32].mxu0 }
 0x229   : > { %v4090_v38 = vsel %vm11803_vm0, %v9644_v5, 0.0  ;;  %v3834_v9 = vpop.f32.mrb[33].mxu0  ;;  %vm11820_vm0 = vcmp.ne.s32.totalorder %v337_v12, 15 }
 0x22a   : > { %v4154_v10 = vadd.f32 %v4122_v8, %v4090_v38  ;;  %v4153_v11 = vadd.f32 %v4121_v30, %v3834_v9  ;;  %v13431_v47 = vsel %vm11820_vm0, 4294967295, %v13430_v47 }
 0x22b   : > { %13432 = vst [vmem:[#allocation22_spill] sm:$0xff] %v13431_v47 }
 0x22c   : > { %4186 = vst.msk [vmem:[#allocation3 + $0x8] sm:$0xff] %vm13428_vm14, %v4154_v10  ;;  %v9647_v14 = vpop.f32.mrb[34].mxu0 }
 0x22d   : > { %4185 = vst.msk [vmem:[#allocation3] sm:$0xff] %vm13429_vm15, %v4153_v11  ;;  %v4092_v46 = vsel %vm11810_vm1, %v9647_v14, 0.0  ;;  %v3844_v18 = vpop.f32.mrb[35].mxu0  ;;  %vm13433_vm15 = vmmov %vm13428_vm14 }
 0x22e   : > { %v4156_v21 = vadd.f32 %v4124_v15, %v4092_v46  ;;  %v4155_v22 = vadd.f32 %v4123_v19, %v3844_v18  ;;  %v4130_v15 = vld [vmem:[#allocation3 + $0x48] sm:$0xff]  ;;  %v4129_v19 = vld [vmem:[#allocation3 + $0x40] sm:$0xff] }
 0x230   : > { %4188 = vst.msk [vmem:[#allocation3 + $0x18] sm:$0xff] %vm13428_vm14, %v4156_v21  ;;  %v9650_v26 = vpop.f32.mrb[36].mxu0  ;;  %vm11835_vm14 = vcmp.ne.s32.totalorder %v351_v24, 15  ;;  %v393_v21 = vand.u32 15, %v279_v3 }
 0x231   : > { %4187 = vst.msk [vmem:[#allocation3 + $0x10] sm:$0xff] %vm13433_vm15, %v4155_v22  ;;  %v4094_v48 = vsel %vm11820_vm0, %v9650_v26, 0.0  ;;  %v3854_v31 = vpop.f32.mrb[37].mxu0  ;;  %v13435_v52 = vsel %vm11835_vm14, 4294967295, %v13434_v52  ;;  %vm13437_vm0 = vmmov %vm13433_vm15 }
 0x232   : > { %v4158_v50 = vadd.f32 %v4126_v27, %v4094_v48  ;;  %v4157_v42 = vadd.f32 %v4125_v28, %v3854_v31  ;;  %13436 = vst [vmem:[#allocation23_spill] sm:$0xff] %v13435_v52  ;;  %vm13438_vm1 = vmmov %vm13437_vm0 }
 0x233   : > { %v4218_v36 = vld [vmem:[#allocation3 + $0x8] sm:$0xff]  ;;  %vm13439_vm13 = vmmov %vm13437_vm0 }
 0x234   : > { %v4217_v53 = vld [vmem:[#allocation3] sm:$0xff]  ;;  %v4257_v55 = vadd.f32 %v11829_v41, %v4218_v36  ;;  %4425 = vst.msk [vmem:[#allocation3 + $0x8] sm:$0xff] %vm13433_vm15, %v13302_v25  ;;  %v9653_v57 = vpop.f32.mrb[38].mxu0  ;;  %vm13444_vm15 = vmmov %vm13438_vm1  ;;  %v4132_v36 = vld [vmem:[#allocation3 + $0x58] sm:$0xff] }
 0x235   : > { %v4256_v49 = vadd.f32 %v11829_v41, %v4217_v53  ;;  %4424 = vst.msk [vmem:[#allocation3] sm:$0xff] %vm13437_vm0, %v13302_v25  ;;  %v4096_v61 = vsel %vm11835_vm14, %v9653_v57, 0.0  ;;  %v3864_v63 = vpop.f32.mrb[39].mxu0  ;;  %vm11856_vm0 = vcmp.ne.s32.totalorder %v365_v33, 15  ;;  %vm13445_vm14 = vmmov %vm13438_vm1  ;;  %v11903_v57 = vadd.s32 136, %v11554_v54 }
 0x236   : > { %4190 = vst.msk [vmem:[#allocation3 + $0x28] sm:$0xff] %vm13438_vm1, %v4158_v50  ;;  %v13441_v0 = vsel %vm11856_vm0, 4294967295, %v13440_v0  ;;  %v4289_v5 = vmax.f32 %v4257_v55, 0.0  ;;  %v4160_v8 = vadd.f32 %v4128_v59, %v4096_v61  ;;  %v4159_v9 = vadd.f32 %v4127_v37, %v3864_v63  ;;  %vm13446_vm12 = vmmov %vm13438_vm1  ;;  %v4131_v55 = vld [vmem:[#allocation3 + $0x50] sm:$0xff] }
 0x237   : > { %4189 = vst.msk [vmem:[#allocation3 + $0x20] sm:$0xff] %vm13439_vm13, %v4157_v42  ;;  %13442 = vst [vmem:[#allocation24_spill] sm:$0xff] %v13441_v0  ;;  %v4288_v38 = vmax.f32 %v4256_v49, 0.0  ;;  %v4220_v30 = vld [vmem:[#allocation3 + $0x18] sm:$0xff]  ;;  %v13460_v49 = vmov 0 }
 0x238   : > { %v4219_v10 = vld [vmem:[#allocation3 + $0x10] sm:$0xff]  ;;  %vm13443_vm13 = vmmov %vm13438_vm1  ;;  %4361 = vst.msk [vmem:[#allocation2 + $0x28] sm:$0xff] %vm13438_vm1, %v4289_v5  ;;  %v9656_v12 = vpop.f32.mrb[40].mxu0  ;;  %v4259_v14 = vadd.f32 %v11829_v41, %v4220_v30 }
 0x239   : > { %4321 = vst.msk [vmem:[%s11852_s13 + $0x8] sm:$0xff] %vm13443_vm13, %v4289_v5  ;;  %v4258_v11 = vadd.f32 %v11829_v41, %v4219_v10  ;;  %vm13447_vm11 = vmmov %vm13438_vm1  ;;  %v4098_v46 = vsel %vm11856_vm0, %v9656_v12, 0.0  ;;  %v3874_v18 = vpop.f32.mrb[41].mxu0 }
 0x23a   : > { %4320 = vst.msk [vmem:[%s11852_s13] sm:$0xff] %vm13444_vm15, %v4288_v38  ;;  %vm13448_vm10 = vmmov %vm13438_vm1  ;;  %v4162_v24 = vadd.f32 %v4130_v15, %v4098_v46  ;;  %v4161_v26 = vadd.f32 %v4129_v19, %v3874_v18  ;;  %v4291_v27 = vmax.f32 %v4259_v14, 0.0  ;;  %v13469_v14 = vmov 0 }
 0x23b   : > { %4360 = vst.msk [vmem:[#allocation2 + $0x20] sm:$0xff] %vm13445_vm14, %v4288_v38  ;;  %vm13449_vm9 = vmmov %vm13438_vm1  ;;  %v4290_v22 = vmax.f32 %v4258_v11, 0.0  ;;  %v4134_v38 = vld [vmem:[#allocation3 + $0x68] sm:$0xff]  ;;  %v421_v19 = vand.u32 15, %v11903_v57 }
 0x23c   : > { %4427 = vst.msk [vmem:[#allocation3 + $0x18] sm:$0xff] %vm13446_vm12, %v13302_v25  ;;  %vm11878_vm12 = vcmp.ne.s32.totalorder %v379_v1, 15  ;;  %vm13456_vm14 = vmmov %vm13438_vm1  ;;  %v9659_v33 = vpop.f32.mrb[42].mxu0  ;;  %v11908_v1 = vld [vmem:[%s13267_s3 + $0x18] sm:$0xf] }
 0x23d   : > { %4426 = vst.msk [vmem:[#allocation3 + $0x10] sm:$0xff] %vm13447_vm11, %v13302_v25  ;;  %v13451_v40 = vsel %vm11878_vm12, 4294967295, %v13450_v40  ;;  %v4222_v28 = vld [vmem:[#allocation3 + $0x28] sm:$0xff]  ;;  %vm13455_vm11 = vmmov %vm13438_vm1  ;;  %v4100_v42 = vsel %vm11878_vm12, %v9659_v33, 0.0  ;;  %v3884_v53 = vpop.f32.mrb[43].mxu0  ;;  %v4136_v33 = vld [vmem:[#allocation3 + $0x78] sm:$0xff] }
 0x23e   : > { %4192 = vst.msk [vmem:[#allocation3 + $0x38] sm:$0xff] %vm13448_vm10, %v4160_v8  ;;  %13452 = vst [vmem:[#allocation25_spill] sm:$0xff] %v13451_v40  ;;  %v4221_v48 = vld [vmem:[#allocation3 + $0x20] sm:$0xff]  ;;  %v4261_v50 = vadd.f32 %v11829_v41, %v4222_v28  ;;  %v4164_v61 = vadd.f32 %v4132_v36, %v4100_v42  ;;  %v4163_v63 = vadd.f32 %v4131_v55, %v3884_v53  ;;  %v4144_v40 = vld [vmem:[#allocation3 + $0xb8] sm:$0xff] }
 0x23f   : > { %4191 = vst.msk [vmem:[#allocation3 + $0x30] sm:$0xff] %vm13449_vm9, %v4159_v9  ;;  %vm13453_vm9 = vmmov %vm13438_vm1  ;;  %v4260_v31 = vadd.f32 %v11829_v41, %v4221_v48  ;;  %v4133_v9 = vld [vmem:[#allocation3 + $0x60] sm:$0xff]  ;;  %v11928_v39 = vld [vmem:[#allocation2 + $0x28] sm:$0xff] }
 0x240   : > { %4322 = vst.msk [vmem:[%s11852_s13 + $0x10] sm:$0xff] %vm13453_vm9, %v4290_v22  ;;  %vm13454_vm10 = vmmov %vm13438_vm1  ;;  %vm11898_vm9 = vcmp.ne.s32.totalorder %v393_v21, 15  ;;  %v4293_v37 = vmax.f32 %v4261_v50, 0.0  ;;  %v9662_v10 = vpop.f32.mrb[44].mxu0  ;;  %v11946_v21 = vadd.s32 152, %v11554_v54 }
 0x241   : > { %4362 = vst.msk [vmem:[#allocation2 + $0x30] sm:$0xff] %vm13454_vm10, %v4290_v22  ;;  %vm13457_vm13 = vmmov %vm13438_vm1  ;;  %v13461_v49 = vsel %vm11898_vm9, 4294967295, %v13460_v49  ;;  %v4292_v59 = vmax.f32 %v4260_v31, 0.0  ;;  %v4102_v15 = vsel %vm11898_vm9, %v9662_v10, 0.0  ;;  %v3894_v18 = vpop.f32.mrb[45].mxu0 }
 0x242   : > { %4429 = vst.msk [vmem:[#allocation3 + $0x28] sm:$0xff] %vm13455_vm11, %v13302_v25  ;;  %vm13458_vm15 = vmmov %vm13438_vm1  ;;  %v11910_v8 = vld [vmem:[#allocation2 + $0x1f] sm:$0xff]  ;;  %v11926_v12 = vld [vmem:[#allocation2 + $0x27] sm:$0xff] }
 0x243   : > { %4428 = vst.msk [vmem:[#allocation3 + $0x20] sm:$0xff] %vm13456_vm14, %v13302_v25  ;;  %vm13459_vm0 = vmmov %vm13438_vm1  ;;  %v11924_v11 = vld [vmem:[#allocation2 + $0x20] sm:$0xff]  ;;  %v11951_v22 = vld [vmem:[%s13267_s3 + $0x1c] sm:$0xf] }
 0x244   : > { %4194 = vst.msk [vmem:[#allocation3 + $0x48] sm:$0xff] %vm13457_vm13, %v4162_v24  ;;  %13462 = vst [vmem:[#allocation26_spill] sm:$0xff] %v13461_v49  ;;  %v9665_v50 = vpop.f32.mrb[46].mxu0 }
 0x245   : > { %4193 = vst.msk [vmem:[#allocation3 + $0x40] sm:$0xff] %vm13438_vm1, %v4161_v26  ;;  %v4224_v3 = vld [vmem:[#allocation3 + $0x38] sm:$0xff]  ;;  %vm13463_vm10 = vmmov %vm13459_vm0  ;;  %v4166_v26 = vadd.f32 %v4134_v38, %v4102_v15  ;;  %v3904_v57 = vpop.f32.mrb[47].mxu0 }
 0x246   : > { %4323 = vst.msk [vmem:[%s11852_s13 + $0x18] sm:$0xff] %vm13458_vm15, %v4291_v27  ;;  %v4223_v5 = vld [vmem:[#allocation3 + $0x30] sm:$0xff]  ;;  %vm13464_vm11 = vmmov %vm13459_vm0  ;;  %v4263_v46 = vadd.f32 %v11829_v41, %v4224_v3 }
 0x247   : > { %4363 = vst.msk [vmem:[#allocation2 + $0x38] sm:$0xff] %vm13459_vm0, %v4291_v27  ;;  %4324 = vst.msk [vmem:[%s11852_s13 + $0x20] sm:$0xff] %vm13459_vm0, %v4292_v59  ;;  %v4262_v30 = vadd.f32 %v11829_v41, %v4223_v5  ;;  %v4165_v27 = vadd.f32 %v4133_v9, %v3894_v18 }
 0x248   : > { %4364 = vst.msk [vmem:[#allocation2 + $0x40] sm:$0xff] %vm13463_vm10, %v4292_v59  ;;  %vm13465_vm14 = vmmov %vm13459_vm0  ;;  %v4295_v28 = vmax.f32 %v4263_v46, 0.0  ;;  %v4135_v59 = vld [vmem:[#allocation3 + $0x70] sm:$0xff]  ;;  %v4138_v46 = vld [vmem:[#allocation3 + $0x88] sm:$0xff] }
 0x249   : > { %4431 = vst.msk [vmem:[#allocation3 + $0x38] sm:$0xff] %vm13464_vm11, %v13302_v25  ;;  %vm13466_vm13 = vmmov %vm13459_vm0  ;;  %v4294_v24 = vmax.f32 %v4262_v30, 0.0  ;;  %v4167_v38 = vadd.f32 %v4135_v59, %v3904_v57 }
 0x24a   : > { %4430 = vst.msk [vmem:[#allocation3 + $0x30] sm:$0xff] %vm13465_vm14, %v13302_v25  ;;  %vm13467_vm1 = vmmov %vm13459_vm0 }
 0x24b   : > { %4196 = vst.msk [vmem:[#allocation3 + $0x58] sm:$0xff] %vm13466_vm13, %v4164_v61  ;;  %vm13468_vm15 = vmmov %vm13459_vm0  ;;  %vm11930_vm0 = vcmp.ne.s32.totalorder %v407_v34, 15  ;;  %v4226_v48 = vld [vmem:[#allocation3 + $0x48] sm:$0xff]  ;;  %v13491_v61 = vmov 0 }
 0x24c   : > { %4195 = vst.msk [vmem:[#allocation3 + $0x50] sm:$0xff] %vm13467_vm1, %v4163_v63  ;;  %9692 = vmatprep.mubr.msk.f32.mxu1 %vm13468_vm15, %v11910_v8  ;;  %v13470_v14 = vsel %vm11930_vm0, 4294967295, %v13469_v14  ;;  %vm13472_vm10 = vmmov %vm13467_vm1  ;;  %v4225_v31 = vld [vmem:[#allocation3 + $0x40] sm:$0xff]  ;;  %v11957_v34 = vld [vmem:[#allocation2 + $0x2f] sm:$0xff]  ;;  %v4265_v53 = vadd.f32 %v11829_v41, %v4226_v48  ;;  %v4104_v55 = vsel %vm11930_vm0, %v9665_v50, 0.0  ;;  %v435_v63 = vand.u32 15, %v11946_v21 }
 0x24d   : > { %13471 = vst [vmem:[#allocation27_spill] sm:$0xff] %v13470_v14  ;;  %4325 = vst.msk [vmem:[%s11852_s13 + $0x28] sm:$0xff] %vm13472_vm10, %v4293_v37  ;;  %v4168_v5 = vadd.f32 %v4136_v33, %v4104_v55  ;;  %v13504_v33 = vmov 0  ;;  %v289_v50 = vadd.s32 184, %v11554_v54 }
 0x24e   : > { %vm13473_vm11 = vmmov %vm13467_vm1  ;;  %v11977_v42 = vld [vmem:[#allocation2 + $0x37] sm:$0xff]  ;;  %v4297_v9 = vmax.f32 %v4265_v53, 0.0 }
 0x24f   : > { %4365 = vst.msk [vmem:[#allocation2 + $0x48] sm:$0xff] %vm13473_vm11, %v4293_v37  ;;  %vm13474_vm14 = vmmov %vm13467_vm1  ;;  %v11979_v36 = vld [vmem:[#allocation2 + $0x38] sm:$0xff]  ;;  %v287_v37 = vadd.s32 168, %v11554_v54  ;;  %v12015_v21 = vld [vmem:[#allocation2 + $0x40] sm:$0xff] }
 0x250   : > { %9842 = vmatprep.mubr.msk.f32.mxu0 %vm13474_vm14, %v11924_v11  ;;  %vm13475_vm13 = vmmov %vm13467_vm1  ;;  %vm13476_vm1 = vcmask 1043456   ;;  %v12001_v15 = vld [vmem:[#allocation2 + $0x3f] sm:$0xff] }
 0x251   : > { %9693 = vmatmul.mubr.msk.f32.vlgmr.msra.gmra.mrb[32].mxu1 %vm13475_vm13, %v11926_v12  ;;  %vm13477_vm15 = vmmov %vm13472_vm10  ;;  %4366 = vst.msk [vmem:[#allocation2 + $0x50] sm:$0xff] %vm13475_vm13, %v4294_v24 }
 0x252   : > { %9741 = vmatpush3.msk.msra.mxu1 %vm13476_vm1, %v11790_v43  ;;  %9843 = vmatmul.mubr.msk.f32.vlgmr.msra.gmra.mrb[64].mxu0 %vm13477_vm15, %v11928_v39  ;;  %vm13478_vm10 = vmmov %vm13476_vm1  ;;  %v4264_v43 = vadd.f32 %v11829_v41, %v4225_v31  ;;  %v4228_v30 = vld [vmem:[#allocation3 + $0x58] sm:$0xff]  ;;  %v4137_v31 = vld [vmem:[#allocation3 + $0x80] sm:$0xff] }
 0x253   : > { %9790 = vmatprep.subr.msk.mxu1 %vm13478_vm10, %v11908_v1  ;;  %vm13479_vm11 = vmmov %vm13476_vm1  ;;  %v4227_v10 = vld [vmem:[#allocation3 + $0x50] sm:$0xff] }
 0x254   : > { %9891 = vmatpush3.msk.msra.mxu0 %vm13479_vm11, %v11797_v62  ;;  %vm13480_vm14 = vmmov %vm13475_vm13  ;;  %v11975_v62 = vld [vmem:[#allocation2 + $0x30] sm:$0xff]  ;;  %v4296_v3 = vmax.f32 %v4264_v43, 0.0  ;;  %v4266_v18 = vadd.f32 %v11829_v41, %v4227_v10  ;;  %v449_v43 = vand.u32 15, %v287_v37 }
 0x255   : > { %4326 = vst.msk [vmem:[%s11852_s13 + $0x30] sm:$0xff] %vm13480_vm14, %v4294_v24  ;;  %vm13481_vm1 = vmmov %vm13475_vm13 }
 0x256   : > { %4433 = vst.msk [vmem:[#allocation3 + $0x48] sm:$0xff] %vm13481_vm1, %v13302_v25  ;;  %vm13482_vm15 = vmmov %vm13481_vm1  ;;  %v12017_v24 = vld [vmem:[#allocation2 + $0x47] sm:$0xff]  ;;  %v4298_v53 = vmax.f32 %v4266_v18, 0.0 }
 0x257   : > { %4432 = vst.msk [vmem:[#allocation3 + $0x40] sm:$0xff] %vm13482_vm15, %v13302_v25  ;;  %vm13483_vm9 = vmmov %vm13481_vm1 }
 0x258   : > { %4198 = vst.msk [vmem:[#allocation3 + $0x68] sm:$0xff] %vm13483_vm9, %v4166_v26  ;;  %vm13484_vm12 = vmmov %vm13481_vm1  ;;  %vm13488_vm9 = vcmask 1043456   ;;  %v12019_v26 = vld [vmem:[#allocation2 + $0x48] sm:$0xff] }
 0x259   : > { %4197 = vst.msk [vmem:[#allocation3 + $0x60] sm:$0xff] %vm13484_vm12, %v4165_v27  ;;  %vm13485_vm10 = vmmov %vm13481_vm1  ;;  %9940 = vmatprep.subr.msk.mxu0 %vm13488_vm9, %v11951_v22  ;;  %v4267_v27 = vadd.f32 %v11829_v41, %v4228_v30  ;;  %v12052_v30 = vld [vmem:[#allocation2 + $0x50] sm:$0xff] }
 0x25a   : > { %9695 = vmatprep.mubr.msk.f32.mxu1 %vm13485_vm10, %v11957_v34  ;;  %vm13486_vm11 = vmmov %vm13481_vm1  ;;  %4328 = vst.msk [vmem:[%s11852_s13 + $0x40] sm:$0xff] %vm13485_vm10, %v4296_v3 }
 0x25b   : > { %4327 = vst.msk [vmem:[%s11852_s13 + $0x38] sm:$0xff] %vm13486_vm11, %v4295_v28  ;;  %vm13487_vm14 = vmmov %vm13481_vm1  ;;  %v4299_v59 = vmax.f32 %v4267_v27, 0.0 }
 0x25c   : > { %4367 = vst.msk [vmem:[#allocation2 + $0x58] sm:$0xff] %vm13487_vm14, %v4295_v28  ;;  %vm13489_vm12 = vmmov %vm13481_vm1 }
 0x25d   : > { %9845 = vmatprep.mubr.msk.f32.mxu0 %vm13489_vm12, %v11975_v62  ;;  %vm13490_vm13 = vmmov %vm13481_vm1  ;;  %vm11993_vm1 = vcmp.ne.s32.totalorder %v421_v19, 15  ;;  %v9668_v19 = vpop.f32.mrb[48].mxu0 }
 0x25e   : > { %9696 = vmatmul.mubr.msk.f32.gmra.mrb[34].mxu1 %vm13490_vm13, %v11977_v42  ;;  %v13492_v61 = vsel %vm11993_vm1, 4294967295, %v13491_v61  ;;  %vm13494_vm15 = vmmov %vm13485_vm10  ;;  %v4106_v28 = vsel %vm11993_vm1, %v9668_v19, 0.0  ;;  %v3914_v48 = vpop.f32.mrb[49].mxu0 }
 0x25f   : > { %13493 = vst [vmem:[#allocation28_spill] sm:$0xff] %v13492_v61  ;;  %9846 = vmatmul.mubr.msk.f32.gmra.mrb[66].mxu0 %vm13494_vm15, %v11979_v36  ;;  %vm13495_vm11 = vmmov %vm13485_vm10  ;;  %v4170_v55 = vadd.f32 %v4138_v46, %v4106_v28  ;;  %v4169_v57 = vadd.f32 %v4137_v31, %v3914_v48  ;;  %v9671_v37 = vpop.f32.mrb[50].mxu0  ;;  %v4139_v28 = vld [vmem:[#allocation3 + $0x90] sm:$0xff]  ;;  %v13517_v48 = vmov 0  ;;  %v463_v31 = vand.u32 15, %v289_v50 }
 0x260   : > { %4368 = vst.msk [vmem:[#allocation2 + $0x60] sm:$0xff] %vm13495_vm11, %v4296_v3  ;;  %vm13496_vm14 = vmmov %vm13485_vm10  ;;  %v4230_v3 = vld [vmem:[#allocation3 + $0x68] sm:$0xff]  ;;  %v3924_v27 = vpop.f32.mrb[51].mxu0 }
 0x261   : > { %4435 = vst.msk [vmem:[#allocation3 + $0x58] sm:$0xff] %vm13496_vm14, %v13302_v25  ;;  %vm13497_vm9 = vmmov %vm13485_vm10  ;;  %v4269_v18 = vadd.f32 %v11829_v41, %v4230_v3 }
 0x262   : > { %4434 = vst.msk [vmem:[#allocation3 + $0x50] sm:$0xff] %vm13497_vm9, %v13302_v25  ;;  %vm13498_vm12 = vmmov %vm13497_vm9 }
 0x263   : > { %4200 = vst.msk [vmem:[#allocation3 + $0x78] sm:$0xff] %vm13498_vm12, %v4168_v5  ;;  %vm13499_vm13 = vmmov %vm13497_vm9  ;;  %vm12031_vm12 = vcmp.ne.s32.totalorder %v435_v63, 15  ;;  %v4229_v5 = vld [vmem:[#allocation3 + $0x60] sm:$0xff]  ;;  %v12054_v10 = vld [vmem:[#allocation2 + $0x57] sm:$0xff]  ;;  %v4301_v3 = vmax.f32 %v4269_v18, 0.0 }
 0x264   : > { %4199 = vst.msk [vmem:[#allocation3 + $0x70] sm:$0xff] %vm13499_vm13, %v4167_v38  ;;  %vm13500_vm15 = vmmov %vm13497_vm9  ;;  %v13505_v33 = vsel %vm12031_vm12, 4294967295, %v13504_v33  ;;  %v4140_v38 = vld [vmem:[#allocation3 + $0x98] sm:$0xff]  ;;  %v4268_v63 = vadd.f32 %v11829_v41, %v4229_v5  ;;  %v4108_v19 = vsel %vm12031_vm12, %v9671_v37, 0.0 }
 0x265   : > { %9698 = vmatprep.mubr.msk.f32.mxu1 %vm13500_vm15, %v12001_v15  ;;  %vm13501_vm10 = vmmov %vm13497_vm9  ;;  %13506 = vst [vmem:[#allocation29_spill] sm:$0xff] %v13505_v33  ;;  %v12056_v46 = vld [vmem:[#allocation2 + $0x58] sm:$0xff] }
 0x266   : > { %4329 = vst.msk [vmem:[%s11852_s13 + $0x48] sm:$0xff] %vm13501_vm10, %v4297_v9  ;;  %vm13502_vm11 = vmmov %vm13497_vm9  ;;  %9699 = vmatmul.mubr.msk.f32.gmra.mrb[36].mxu1 %vm13497_vm9, %v12017_v24 }
 0x267   : > { %4369 = vst.msk [vmem:[#allocation2 + $0x68] sm:$0xff] %vm13502_vm11, %v4297_v9  ;;  %vm13503_vm14 = vmmov %vm13497_vm9  ;;  %v12038_v9 = vld [vmem:[#allocation2 + $0x4f] sm:$0xff]  ;;  %v12075_v33 = vld [vmem:[#allocation2 + $0x5f] sm:$0xff] }
 0x268   : > { %9848 = vmatprep.mubr.msk.f32.mxu0 %vm13503_vm14, %v12015_v21  ;;  %vm13507_vm13 = vmmov %vm13497_vm9  ;;  %4202 = vst.msk [vmem:[#allocation3 + $0x88] sm:$0xff] %vm13497_vm9, %v4170_v55  ;;  %v4300_v55 = vmax.f32 %v4268_v63, 0.0  ;;  %v12089_v63 = vld [vmem:[#allocation2 + $0x60] sm:$0xff] }
 0x269   : > { %9849 = vmatmul.mubr.msk.f32.gmra.mrb[68].mxu0 %vm13507_vm13, %v12019_v26  ;;  %vm13508_vm15 = vmmov %vm13497_vm9 }
 0x26a   : > { %4330 = vst.msk [vmem:[%s11852_s13 + $0x50] sm:$0xff] %vm13508_vm15, %v4298_v53  ;;  %vm13509_vm10 = vmmov %vm13497_vm9  ;;  %v4232_v5 = vld [vmem:[#allocation3 + $0x78] sm:$0xff] }
 0x26b   : > { %4370 = vst.msk [vmem:[#allocation2 + $0x70] sm:$0xff] %vm13509_vm10, %v4298_v53  ;;  %vm13510_vm11 = vmmov %vm13497_vm9  ;;  %v291_v53 = vadd.s32 200, %v11554_v54  ;;  %v4231_v37 = vld [vmem:[#allocation3 + $0x70] sm:$0xff] }
 0x26c   : > { %4437 = vst.msk [vmem:[#allocation3 + $0x68] sm:$0xff] %vm13510_vm11, %v13302_v25  ;;  %vm13511_vm14 = vmmov %vm13497_vm9  ;;  %v4270_v50 = vadd.f32 %v11829_v41, %v4231_v37 }
 0x26d   : > { %4436 = vst.msk [vmem:[#allocation3 + $0x60] sm:$0xff] %vm13511_vm14, %v13302_v25  ;;  %vm13512_vm13 = vmmov %vm13497_vm9  ;;  %vm12068_vm14 = vcmp.ne.s32.totalorder %v449_v43, 15  ;;  %v4142_v25 = vld [vmem:[#allocation3 + $0xa8] sm:$0xff]  ;;  %v13523_v43 = vmov 0.0   ;;  %v477_v37 = vand.u32 15, %v291_v53 }
 0x26e   : > { %4201 = vst.msk [vmem:[#allocation3 + $0x80] sm:$0xff] %vm13512_vm13, %v4169_v57  ;;  %vm13513_vm1 = vmmov %vm13497_vm9  ;;  %v13518_v48 = vsel %vm12068_vm14, 4294967295, %v13517_v48  ;;  %v4172_v57 = vadd.f32 %v4140_v38, %v4108_v19  ;;  %v9674_v38 = vpop.f32.mrb[52].mxu0  ;;  %v12091_v18 = vld [vmem:[#allocation2 + $0x67] sm:$0xff] }
 0x26f   : > { %9701 = vmatprep.mubr.msk.f32.mxu1 %vm13513_vm1, %v12038_v9  ;;  %vm13514_vm15 = vmmov %vm13513_vm1  ;;  %13519 = vst [vmem:[#allocation30_spill] sm:$0xff] %v13518_v48  ;;  %v12093_v19 = vld [vmem:[#allocation2 + $0x68] sm:$0xff] }
 0x270   : > { %4331 = vst.msk [vmem:[%s11852_s13 + $0x58] sm:$0xff] %vm13514_vm15, %v4299_v59  ;;  %vm13515_vm10 = vmmov %vm13513_vm1  ;;  %9702 = vmatmul.mubr.msk.f32.gmra.mrb[38].mxu1 %vm13513_vm1, %v12054_v10  ;;  %v4234_v14 = vld [vmem:[#allocation3 + $0x88] sm:$0xff] }
 0x271   : > { %4371 = vst.msk [vmem:[#allocation2 + $0x78] sm:$0xff] %vm13515_vm10, %v4299_v59  ;;  %vm13516_vm11 = vmmov %vm13513_vm1  ;;  %v4171_v59 = vadd.f32 %v4139_v28, %v3924_v27  ;;  %v4271_v27 = vadd.f32 %v11829_v41, %v4232_v5  ;;  %v4110_v28 = vsel %vm12068_vm14, %v9674_v38, 0.0  ;;  %v4302_v5 = vmax.f32 %v4270_v50, 0.0 }
 0x272   : > { %9851 = vmatprep.mubr.msk.f32.mxu0 %vm13516_vm11, %v12052_v30  ;;  %vm13520_vm9 = vmmov %vm13513_vm1  ;;  %4204 = vst.msk [vmem:[#allocation3 + $0x98] sm:$0xff] %vm13513_vm1, %v4172_v57  ;;  %v4141_v57 = vld [vmem:[#allocation3 + $0xa0] sm:$0xff]  ;;  %v4174_v61 = vadd.f32 %v4142_v25, %v4110_v28  ;;  %v12112_v0 = vld [vmem:[#allocation2 + $0x6f] sm:$0xff] }
 0x273   : > { %9852 = vmatmul.mubr.msk.f32.gmra.mrb[70].mxu0 %vm13520_vm9, %v12056_v46  ;;  %vm13521_vm13 = vmmov %vm13513_vm1  ;;  %v4303_v38 = vmax.f32 %v4271_v27, 0.0  ;;  %v12126_v53 = vld [vmem:[#allocation2 + $0x70] sm:$0xff] }
 0x274   : > { %4332 = vst.msk [vmem:[%s11852_s13 + $0x60] sm:$0xff] %vm13521_vm13, %v4300_v55  ;;  %vm13522_vm15 = vmmov %vm13513_vm1  ;;  %v4143_v28 = vld [vmem:[#allocation3 + $0xb0] sm:$0xff] }
 0x275   : > { %4372 = vst.msk [vmem:[#allocation2 + $0x80] sm:$0xff] %vm13522_vm15, %v4300_v55  ;;  %vm13524_vm10 = vmmov %vm13513_vm1  ;;  %v3934_v55 = vpop.f32.mrb[53].mxu0  ;;  %v4233_v49 = vld [vmem:[#allocation3 + $0x80] sm:$0xff] }
 0x276   : > { %4439 = vst.msk [vmem:[#allocation3 + $0x78] sm:$0xff] %vm13524_vm10, %v13523_v43  ;;  %vm13525_vm11 = vmmov %vm13513_vm1  ;;  %v4173_v48 = vadd.f32 %v4141_v57, %v3934_v55  ;;  %v4272_v25 = vadd.f32 %v11829_v41, %v4233_v49  ;;  %v4273_v49 = vadd.f32 %v11829_v41, %v4234_v14  ;;  %v13545_v55 = vmov 0 }
 0x277   : > { %4438 = vst.msk [vmem:[#allocation3 + $0x70] sm:$0xff] %vm13525_vm11, %v13523_v43  ;;  %vm13526_vm9 = vmmov %vm13513_vm1  ;;  %vm12105_vm11 = vcmp.ne.s32.totalorder %v463_v31, 15  ;;  %v9677_v31 = vpop.f32.mrb[54].mxu0 }
 0x278   : > { %4203 = vst.msk [vmem:[#allocation3 + $0x90] sm:$0xff] %vm13526_vm9, %v4171_v59  ;;  %vm13527_vm12 = vmmov %vm13513_vm1  ;;  %v13532_v59 = vmov 0  ;;  %v12128_v50 = vld [vmem:[#allocation2 + $0x77] sm:$0xff]  ;;  %v4304_v14 = vmax.f32 %v4272_v25, 0.0 }
 0x279   : > { %9704 = vmatprep.mubr.msk.f32.mxu1 %vm13527_vm12, %v12075_v33  ;;  %vm13528_vm13 = vmmov %vm13513_vm1  ;;  %v13533_v59 = vsel %vm12105_vm11, 4294967295, %v13532_v59  ;;  %4205 = vst.msk [vmem:[#allocation3 + $0xa0] sm:$0xff] %vm13513_vm1, %v4173_v48  ;;  %v12130_v27 = vld [vmem:[#allocation2 + $0x78] sm:$0xff]  ;;  %v3944_v48 = vpop.f32.mrb[55].mxu0 }
 0x27a   : > { %4333 = vst.msk [vmem:[%s11852_s13 + $0x68] sm:$0xff] %vm13528_vm13, %v4301_v3  ;;  %vm13529_vm15 = vmmov %vm13513_vm1  ;;  %v4236_v52 = vld [vmem:[#allocation3 + $0x98] sm:$0xff] }
 0x27b   : > { %4373 = vst.msk [vmem:[#allocation2 + $0x88] sm:$0xff] %vm13529_vm15, %v4301_v3  ;;  %vm13530_vm10 = vmmov %vm13513_vm1  ;;  %v293_v3 = vadd.s32 216, %v11554_v54 }
 0x27c   : > { %9854 = vmatprep.mubr.msk.f32.mxu0 %vm13530_vm10, %v12089_v63  ;;  %vm13531_vm12 = vmmov %vm13513_vm1  ;;  %13534 = vst [vmem:[#allocation31_spill] sm:$0xff] %v13533_v59  ;;  %v4175_v59 = vadd.f32 %v4143_v28, %v3944_v48  ;;  %v12149_v44 = vld [vmem:[#allocation2 + $0x7f] sm:$0xff]  ;;  %v13558_v28 = vmov 0 }
 0x27d   : > { %9705 = vmatmul.mubr.msk.f32.gmra.mrb[40].mxu1 %vm13531_vm12, %v12091_v18  ;;  %9855 = vmatmul.mubr.msk.f32.gmra.mrb[72].mxu0 %vm13513_vm1, %v12093_v19  ;;  %vm13535_vm9 = vmmov %vm13513_vm1  ;;  %v491_v57 = vand.u32 15, %v293_v3  ;;  %4336 = vst.msk [vmem:[%s11852_s13 + $0x80] sm:$0xff] %vm13513_vm1, %v4304_v14  ;;  %v12163_v3 = vld [vmem:[#allocation2 + $0x80] sm:$0xff] }
 0x27e   : > { %4334 = vst.msk [vmem:[%s11852_s13 + $0x70] sm:$0xff] %vm13535_vm9, %v4302_v5  ;;  %vm13536_vm13 = vmmov %vm13513_vm1  ;;  %v4145_v48 = vld [vmem:[#allocation3 + $0xc0] sm:$0xff] }
 0x27f   : > { %4374 = vst.msk [vmem:[#allocation2 + $0x90] sm:$0xff] %vm13536_vm13, %v4302_v5  ;;  %vm13537_vm15 = vmmov %vm13513_vm1  ;;  %v295_v5 = vadd.s32 232, %v11554_v54  ;;  %v4235_v47 = vld [vmem:[#allocation3 + $0x90] sm:$0xff] }
 0x280   : > { %4441 = vst.msk [vmem:[#allocation3 + $0x88] sm:$0xff] %vm13537_vm15, %v13523_v43  ;;  %vm13538_vm10 = vmmov %vm13513_vm1  ;;  %v4237_v2 = vld [vmem:[#allocation3 + $0xa0] sm:$0xff] }
 0x281   : > { %4440 = vst.msk [vmem:[#allocation3 + $0x80] sm:$0xff] %vm13538_vm10, %v13523_v43  ;;  %vm13539_vm12 = vmmov %vm13513_vm1  ;;  %vm12142_vm10 = vcmp.ne.s32.totalorder %v477_v37, 15  ;;  %v9680_v37 = vpop.f32.mrb[56].mxu0 }
 0x282   : > { %4206 = vst.msk [vmem:[#allocation3 + $0xa8] sm:$0xff] %vm13539_vm12, %v4174_v61  ;;  %vm13540_vm14 = vmmov %vm13513_vm1  ;;  %v4112_v61 = vsel %vm12105_vm11, %v9677_v31, 0.0  ;;  %v13546_v55 = vsel %vm12142_vm10, 4294967295, %v13545_v55  ;;  %v4305_v31 = vmax.f32 %v4273_v49, 0.0  ;;  %v12165_v25 = vld [vmem:[#allocation2 + $0x87] sm:$0xff] }
 0x283   : > { %9707 = vmatprep.mubr.msk.f32.mxu1 %vm13540_vm14, %v12112_v0  ;;  %vm13541_vm9 = vmmov %vm13513_vm1  ;;  %13547 = vst [vmem:[#allocation32_spill] sm:$0xff] %v13546_v55  ;;  %v12167_v49 = vld [vmem:[#allocation2 + $0x88] sm:$0xff] }
 0x284   : > { %4335 = vst.msk [vmem:[%s11852_s13 + $0x78] sm:$0xff] %vm13541_vm9, %v4303_v38  ;;  %vm13542_vm13 = vmmov %vm13513_vm1 }
 0x285   : > { %4375 = vst.msk [vmem:[#allocation2 + $0x98] sm:$0xff] %vm13542_vm13, %v4303_v38  ;;  %vm13543_vm15 = vmmov %vm13513_vm1  ;;  %v4176_v38 = vadd.f32 %v4144_v40, %v4112_v61  ;;  %v4274_v40 = vadd.f32 %v11829_v41, %v4235_v47  ;;  %v4275_v47 = vadd.f32 %v11829_v41, %v4236_v52  ;;  %v4114_v61 = vsel %vm12142_vm10, %v9680_v37, 0.0 }
 0x286   : > { %9857 = vmatprep.mubr.msk.f32.mxu0 %vm13543_vm15, %v12126_v53  ;;  %vm13544_vm14 = vmmov %vm13513_vm1  ;;  %4337 = vst.msk [vmem:[%s11852_s13 + $0x88] sm:$0xff] %vm13513_vm1, %v4305_v31  ;;  %v12186_v35 = vld [vmem:[#allocation2 + $0x8f] sm:$0xff] }
 0x287   : > { %9708 = vmatmul.mubr.msk.f32.gmra.mrb[42].mxu1 %vm13544_vm14, %v12128_v50  ;;  %vm13548_vm12 = vmmov %vm13513_vm1  ;;  %v4306_v52 = vmax.f32 %v4274_v40, 0.0  ;;  %v4307_v37 = vmax.f32 %v4275_v47, 0.0 }
 0x288   : > { %9858 = vmatmul.mubr.msk.f32.gmra.mrb[74].mxu0 %vm13548_vm12, %v12130_v27  ;;  %vm13549_vm9 = vmmov %vm13513_vm1 }
 0x289   : > { %4376 = vst.msk [vmem:[#allocation2 + $0xa0] sm:$0xff] %vm13549_vm9, %v4304_v14  ;;  %vm13550_vm13 = vmmov %vm13513_vm1  ;;  %v505_v14 = vand.u32 15, %v295_v5  ;;  %v4238_v17 = vld [vmem:[#allocation3 + $0xa8] sm:$0xff] }
 0x28a   : > { %4443 = vst.msk [vmem:[#allocation3 + $0x98] sm:$0xff] %vm13550_vm13, %v13523_v43  ;;  %vm13551_vm15 = vmmov %vm13513_vm1 }
 0x28b   : > { %4442 = vst.msk [vmem:[#allocation3 + $0x90] sm:$0xff] %vm13551_vm15, %v13523_v43  ;;  %vm13552_vm14 = vmmov %vm13513_vm1  ;;  %vm12179_vm15 = vcmp.ne.s32.totalorder %v491_v57, 15  ;;  %v12200_v57 = vld [vmem:[#allocation2 + $0x90] sm:$0xff] }
 0x28c   : > { %4208 = vst.msk [vmem:[#allocation3 + $0xb8] sm:$0xff] %vm13552_vm14, %v4176_v38  ;;  %vm13553_vm12 = vmmov %vm13513_vm1  ;;  %v13559_v28 = vsel %vm12179_vm15, 4294967295, %v13558_v28  ;;  %v297_v38 = vadd.s32 248, %v11554_v54  ;;  %v4276_v54 = vadd.f32 %v11829_v41, %v4237_v2  ;;  %v12202_v5 = vld [vmem:[#allocation2 + $0x97] sm:$0xff]  ;;  %v4277_v2 = vadd.f32 %v11829_v41, %v4238_v17 }
 0x28d   : > { %4207 = vst.msk [vmem:[#allocation3 + $0xb0] sm:$0xff] %vm13553_vm12, %v4175_v59  ;;  %vm13554_vm11 = vmmov %vm13513_vm1  ;;  %v3954_v59 = vpop.f32.mrb[57].mxu0  ;;  %v12204_v40 = vld [vmem:[#allocation2 + $0x98] sm:$0xff] }
 0x28e   : > { %9710 = vmatprep.mubr.msk.f32.mxu1 %vm13554_vm11, %v12149_v44  ;;  %vm13555_vm9 = vmmov %vm13513_vm1  ;;  %13560 = vst [vmem:[#allocation33_spill] sm:$0xff] %v13559_v28  ;;  %v4177_v55 = vadd.f32 %v4145_v48, %v3954_v59  ;;  %v4147_v59 = vld [vmem:[#allocation3 + $0xd0] sm:$0xff]  ;;  %v13571_v48 = vmov 0 }
 0x28f   : > { %4377 = vst.msk [vmem:[#allocation2 + $0xa8] sm:$0xff] %vm13555_vm9, %v4305_v31  ;;  %vm13556_vm13 = vmmov %vm13513_vm1  ;;  %v4178_v31 = vadd.f32 %v4146_v45, %v4114_v61  ;;  %v9683_v45 = vpop.f32.mrb[58].mxu0 }
 0x290   : > { %9860 = vmatprep.mubr.msk.f32.mxu0 %vm13556_vm13, %v12163_v3  ;;  %vm13557_vm11 = vmmov %vm13513_vm1  ;;  %4378 = vst.msk [vmem:[#allocation2 + $0xb0] sm:$0xff] %vm13513_vm1, %v4306_v52  ;;  %v4116_v47 = vsel %vm12179_vm15, %v9683_v45, 0.0  ;;  %v3964_v61 = vpop.f32.mrb[59].mxu0  ;;  %v4309_v45 = vmax.f32 %v4277_v2, 0.0  ;;  %v12222_v7 = vld [vmem:[#allocation2 + $0x9f] sm:$0xff] }
 0x291   : > { %9711 = vmatmul.mubr.msk.f32.gmra.mrb[44].mxu1 %vm13557_vm11, %v12165_v25  ;;  %vm13561_vm14 = vmmov %vm13513_vm1  ;;  %4379 = vst.msk [vmem:[#allocation2 + $0xb8] sm:$0xff] %vm13513_vm1, %v4307_v37 }
 0x292   : > { %9861 = vmatmul.mubr.msk.f32.gmra.mrb[76].mxu0 %vm13561_vm14, %v12167_v49  ;;  %vm13562_vm12 = vmmov %vm13513_vm1 }
 0x293   : > { %4338 = vst.msk [vmem:[%s11852_s13 + $0x90] sm:$0xff] %vm13562_vm12, %v4306_v52  ;;  %vm13563_vm9 = vmmov %vm13513_vm1  ;;  %v519_v52 = vand.u32 15, %v297_v38  ;;  %v4240_v28 = vld [vmem:[#allocation3 + $0xb8] sm:$0xff]  ;;  %v9686_v38 = vpop.f32.mrb[60].mxu0 }
 0x294   : > { %4445 = vst.msk [vmem:[#allocation3 + $0xa8] sm:$0xff] %vm13563_vm9, %v13523_v43  ;;  %vm13564_vm13 = vmmov %vm13513_vm1  ;;  %v4239_v20 = vld [vmem:[#allocation3 + $0xb0] sm:$0xff] }
 0x295   : > { %4444 = vst.msk [vmem:[#allocation3 + $0xa0] sm:$0xff] %vm13564_vm13, %v13523_v43  ;;  %vm13565_vm11 = vmmov %vm13513_vm1  ;;  %vm12216_vm13 = vcmp.ne.s32.totalorder %v505_v14, 15  ;;  %v4278_v14 = vadd.f32 %v11829_v41, %v4239_v20  ;;  %v4279_v20 = vadd.f32 %v11829_v41, %v4240_v28 }
 0x296   : > { %4210 = vst.msk [vmem:[#allocation3 + $0xc8] sm:$0xff] %vm13565_vm11, %v4178_v31  ;;  %vm13566_vm14 = vmmov %vm13513_vm1  ;;  %v13572_v48 = vsel %vm12216_vm13, 4294967295, %v13571_v48  ;;  %v4308_v31 = vmax.f32 %v4276_v54, 0.0  ;;  %v12236_v54 = vld [vmem:[#allocation2 + $0xa0] sm:$0xff] }
 0x297   : > { %4209 = vst.msk [vmem:[#allocation3 + $0xc0] sm:$0xff] %vm13566_vm14, %v4177_v55  ;;  %vm13567_vm10 = vmmov %vm13513_vm1  ;;  %v4148_v55 = vld [vmem:[#allocation3 + $0xd8] sm:$0xff]  ;;  %v12238_v2 = vld [vmem:[#allocation2 + $0xa7] sm:$0xff] }
 0x298   : > { %9713 = vmatprep.mubr.msk.f32.mxu1 %vm13567_vm10, %v12186_v35  ;;  %vm13568_vm12 = vmmov %vm13513_vm1  ;;  %13573 = vst [vmem:[#allocation34_spill] sm:$0xff] %v13572_v48  ;;  %v4180_v17 = vadd.f32 %v4148_v55, %v4116_v47  ;;  %v12240_v47 = vld [vmem:[#allocation2 + $0xa8] sm:$0xff]  ;;  %v4118_v55 = vsel %vm12216_vm13, %v9686_v38, 0.0  ;;  %v4311_v38 = vmax.f32 %v4279_v20, 0.0  ;;  %v12272_v20 = vld [vmem:[#allocation2 + $0xb0] sm:$0xff] }
 0x299   : > { %4339 = vst.msk [vmem:[%s11852_s13 + $0x98] sm:$0xff] %vm13568_vm12, %v4307_v37  ;;  %vm13569_vm9 = vmmov %vm13513_vm1  ;;  %v4179_v37 = vadd.f32 %v4147_v59, %v3964_v61  ;;  %v4150_v61 = vld [vmem:[#allocation3 + $0xe8] sm:$0xff]  ;;  %v3974_v59 = vpop.f32.mrb[61].mxu0 }
 0x29a   : > { %9863 = vmatprep.mubr.msk.f32.mxu0 %vm13569_vm9, %v12200_v57  ;;  %vm13570_vm10 = vmmov %vm13513_vm1  ;;  %4447 = vst.msk [vmem:[#allocation3 + $0xb8] sm:$0xff] %vm13513_vm1, %v13523_v43  ;;  %v12258_v23 = vld [vmem:[#allocation2 + $0xaf] sm:$0xff] }
 0x29b   : > { %9714 = vmatmul.mubr.msk.f32.gmra.mrb[46].mxu1 %vm13570_vm10, %v12202_v5  ;;  %vm13574_vm11 = vmmov %vm13513_vm1 }
 0x29c   : > { %9864 = vmatmul.mubr.msk.f32.gmra.mrb[78].mxu0 %vm13574_vm11, %v12204_v40  ;;  %vm13575_vm14 = vmmov %vm13513_vm1 }
 0x29d   : > { %4340 = vst.msk [vmem:[%s11852_s13 + $0xa0] sm:$0xff] %vm13575_vm14, %v4308_v31  ;;  %vm13576_vm12 = vmmov %vm13513_vm1  ;;  %9866 = vmatprep.mubr.msk.f32.mxu0 %vm13513_vm1, %v12236_v54  ;;  %v4242_v48 = vld [vmem:[#allocation3 + $0xc8] sm:$0xff] }
 0x29e   : > { %4380 = vst.msk [vmem:[#allocation2 + $0xc0] sm:$0xff] %vm13576_vm12, %v4308_v31  ;;  %vm13577_vm9 = vmmov %vm13513_vm1  ;;  %v4149_v31 = vld [vmem:[#allocation3 + $0xe0] sm:$0xff] }
 0x29f   : > { %4446 = vst.msk [vmem:[#allocation3 + $0xb0] sm:$0xff] %vm13577_vm9, %v13523_v43  ;;  %vm13578_vm10 = vmmov %vm13513_vm1  ;;  %vm12252_vm9 = vcmp.ne.s32.totalorder %v519_v52, 15  ;;  %v4181_v28 = vadd.f32 %v4149_v31, %v3974_v59  ;;  %v4241_v51 = vld [vmem:[#allocation3 + $0xc0] sm:$0xff]  ;;  %v4152_v31 = vld [vmem:[#allocation3 + $0xf8] sm:$0xff] }
 0x2a0   : > { %4212 = vst.msk [vmem:[#allocation3 + $0xd8] sm:$0xff] %vm13578_vm10, %v4180_v17  ;;  %vm13579_vm11 = vmmov %vm13513_vm1  ;;  %v13584_v17 = vmov 0  ;;  %v4280_v52 = vadd.f32 %v11829_v41, %v4241_v51  ;;  %v4281_v51 = vadd.f32 %v11829_v41, %v4242_v48 }
 0x2a1   : > { %4211 = vst.msk [vmem:[#allocation3 + $0xd0] sm:$0xff] %vm13579_vm11, %v4179_v37  ;;  %vm13580_vm15 = vmmov %vm13513_vm1  ;;  %v13585_v17 = vsel %vm12252_vm9, 4294967295, %v13584_v17  ;;  %v4310_v37 = vmax.f32 %v4278_v14, 0.0  ;;  %v9689_v14 = vpop.f32.mrb[62].mxu0 }
 0x2a2   : > { %9716 = vmatprep.mubr.msk.f32.mxu1 %vm13580_vm15, %v12222_v7  ;;  %vm13581_vm14 = vmmov %vm13513_vm1  ;;  %13586 = vst [vmem:[#allocation35_spill] sm:$0xff] %v13585_v17  ;;  %v4120_v59 = vsel %vm12252_vm9, %v9689_v14, 0.0  ;;  %v4313_v48 = vmax.f32 %v4281_v51, 0.0 }
 0x2a3   : > { %4341 = vst.msk [vmem:[%s11852_s13 + $0xa8] sm:$0xff] %vm13581_vm14, %v4309_v45  ;;  %vm13582_vm12 = vmmov %vm13513_vm1  ;;  %v4184_v6 = vadd.f32 %v4152_v31, %v4120_v59 }
 0x2a4   : > { %4381 = vst.msk [vmem:[#allocation2 + $0xc8] sm:$0xff] %vm13582_vm12, %v4309_v45  ;;  %vm13583_vm15 = vmmov %vm13513_vm1  ;;  %v4182_v45 = vadd.f32 %v4150_v61, %v4118_v55  ;;  %v12274_v55 = vld [vmem:[#allocation2 + $0xb7] sm:$0xff] }
 0x2a5   : > { %9717 = vmatmul.mubr.msk.f32.gmra.mrb[48].mxu1 %vm13583_vm15, %v12238_v2  ;;  %vm13587_vm10 = vmmov %vm13513_vm1  ;;  %4448 = vst.msk [vmem:[#allocation3 + $0xc0] sm:$0xff] %vm13513_vm1, %v13523_v43  ;;  %v12276_v61 = vld [vmem:[#allocation2 + $0xb8] sm:$0xff]  ;;  %v12304_v51 = vld [vmem:[#allocation2 + $0xc0] sm:$0xff] }
 0x2a6   : > { %9867 = vmatmul.mubr.msk.f32.gmra.mrb[80].mxu0 %vm13587_vm10, %v12240_v47  ;;  %vm13588_vm11 = vmmov %vm13513_vm1  ;;  %v12290_v14 = vld [vmem:[#allocation2 + $0xbf] sm:$0xff] }
 0x2a7   : > { %4342 = vst.msk [vmem:[%s11852_s13 + $0xb0] sm:$0xff] %vm13588_vm11, %v4310_v37  ;;  %vm13589_vm14 = vmmov %vm13513_vm1 }
 0x2a8   : > { %4382 = vst.msk [vmem:[#allocation2 + $0xd0] sm:$0xff] %vm13589_vm14, %v4310_v37  ;;  %vm13590_vm12 = vmmov %vm13513_vm1  ;;  %v3984_v37 = vpop.f32.mrb[63].mxu0  ;;  %v4243_v17 = vld [vmem:[#allocation3 + $0xd0] sm:$0xff] }
 0x2a9   : > { %4449 = vst.msk [vmem:[#allocation3 + $0xc8] sm:$0xff] %vm13590_vm12, %v13523_v43  ;;  %vm13591_vm15 = vmmov %vm13513_vm1 }
 0x2aa   : > { %4214 = vst.msk [vmem:[#allocation3 + $0xe8] sm:$0xff] %vm13591_vm15, %v4182_v45  ;;  %vm13592_vm10 = vmmov %vm13513_vm1  ;;  %v4151_v45 = vld [vmem:[#allocation3 + $0xf0] sm:$0xff] }
 0x2ab   : > { %4213 = vst.msk [vmem:[#allocation3 + $0xe0] sm:$0xff] %vm13592_vm10, %v4181_v28  ;;  %vm13593_vm13 = vmmov %vm13513_vm1  ;;  %v4312_v28 = vmax.f32 %v4280_v52, 0.0  ;;  %v4183_v56 = vadd.f32 %v4151_v45, %v3984_v37  ;;  %v4282_v52 = vadd.f32 %v11829_v41, %v4243_v17  ;;  %v12306_v59 = vld [vmem:[#allocation2 + $0xc7] sm:$0xff] }
 0x2ac   : > { %9719 = vmatprep.mubr.msk.f32.mxu1 %vm13593_vm13, %v12258_v23  ;;  %vm13594_vm11 = vmmov %vm13513_vm1  ;;  %v12308_v31 = vld [vmem:[#allocation2 + $0xc8] sm:$0xff] }
 0x2ad   : > { %4343 = vst.msk [vmem:[%s11852_s13 + $0xb8] sm:$0xff] %vm13594_vm11, %v4311_v38  ;;  %vm13595_vm14 = vmmov %vm13513_vm1 }
 0x2ae   : > { %4383 = vst.msk [vmem:[#allocation2 + $0xd8] sm:$0xff] %vm13595_vm14, %v4311_v38  ;;  %vm13596_vm12 = vmmov %vm13513_vm1  ;;  %v4244_v38 = vld [vmem:[#allocation3 + $0xd8] sm:$0xff] }
 0x2af   : > { %9869 = vmatprep.mubr.msk.f32.mxu0 %vm13596_vm12, %v12272_v20  ;;  %vm13597_vm13 = vmmov %vm13513_vm1  ;;  %v4283_v17 = vadd.f32 %v11829_v41, %v4244_v38  ;;  %v12332_v38 = vld [vmem:[#allocation2 + $0xd0] sm:$0xff] }
 0x2b0   : > { %9720 = vmatmul.mubr.msk.f32.gmra.mrb[50].mxu1 %vm13597_vm13, %v12274_v55  ;;  %9870 = vmatmul.mubr.msk.f32.gmra.mrb[82].mxu0 %vm13513_vm1, %v12276_v61  ;;  %vm13598_vm15 = vmmov %vm13513_vm1 }
 0x2b1   : > { %4344 = vst.msk [vmem:[%s11852_s13 + $0xc0] sm:$0xff] %vm13598_vm15, %v4312_v28  ;;  %vm13599_vm10 = vmmov %vm13513_vm1  ;;  %9722 = vmatprep.mubr.msk.f32.mxu1 %vm13513_vm1, %v12290_v14  ;;  %v4246_v37 = vld [vmem:[#allocation3 + $0xe8] sm:$0xff] }
 0x2b2   : > { %4384 = vst.msk [vmem:[#allocation2 + $0xe0] sm:$0xff] %vm13599_vm10, %v4312_v28  ;;  %vm13600_vm11 = vmmov %vm13513_vm1  ;;  %v4245_v45 = vld [vmem:[#allocation3 + $0xe0] sm:$0xff]  ;;  %v12320_v28 = vld [vmem:[#allocation2 + $0xcf] sm:$0xff] }
 0x2b3   : > { %4451 = vst.msk [vmem:[#allocation3 + $0xd8] sm:$0xff] %vm13600_vm11, %v13523_v43  ;;  %vm13601_vm14 = vmmov %vm13513_vm1 }
 0x2b4   : > { %4450 = vst.msk [vmem:[#allocation3 + $0xd0] sm:$0xff] %vm13601_vm14, %v13523_v43  ;;  %vm13602_vm12 = vmmov %vm13513_vm1 }
 0x2b5   : > { %4216 = vst.msk [vmem:[#allocation3 + $0xf8] sm:$0xff] %vm13602_vm12, %v4184_v6  ;;  %vm13603_vm13 = vmmov %vm13513_vm1  ;;  %v4315_v6 = vmax.f32 %v4283_v17, 0.0  ;;  %v12336_v17 = vld [vmem:[#allocation2 + $0xd8] sm:$0xff] }
 0x2b6   : > { %4215 = vst.msk [vmem:[#allocation3 + $0xf0] sm:$0xff] %vm13603_vm13, %v4183_v56  ;;  %vm13604_vm15 = vmmov %vm13513_vm1  ;;  %v4314_v56 = vmax.f32 %v4282_v52, 0.0  ;;  %v12334_v52 = vld [vmem:[#allocation2 + $0xd7] sm:$0xff] }
 0x2b7   : > { %4345 = vst.msk [vmem:[%s11852_s13 + $0xc8] sm:$0xff] %vm13604_vm15, %v4313_v48  ;;  %vm13605_vm10 = vmmov %vm13513_vm1 }
 0x2b8   : > { %4385 = vst.msk [vmem:[#allocation2 + $0xe8] sm:$0xff] %vm13605_vm10, %v4313_v48  ;;  %vm13606_vm11 = vmmov %vm13513_vm1  ;;  %v4284_v48 = vadd.f32 %v11829_v41, %v4245_v45 }
 0x2b9   : > { %9872 = vmatprep.mubr.msk.f32.mxu0 %vm13606_vm11, %v12304_v51  ;;  %vm13607_vm14 = vmmov %vm13513_vm1  ;;  %4386 = vst.msk [vmem:[#allocation2 + $0xf0] sm:$0xff] %vm13513_vm1, %v4314_v56  ;;  %v12348_v32 = vld [vmem:[#allocation2 + $0xdf] sm:$0xff] }
 0x2ba   : > { %9723 = vmatmul.mubr.msk.f32.gmra.mrb[52].mxu1 %vm13607_vm14, %v12306_v59  ;;  %vm13608_vm12 = vmmov %vm13513_vm1  ;;  %v4316_v45 = vmax.f32 %v4284_v48, 0.0 }
 0x2bb   : > { %9873 = vmatmul.mubr.msk.f32.gmra.mrb[84].mxu0 %vm13608_vm12, %v12308_v31  ;;  %vm13609_vm13 = vmmov %vm13513_vm1 }
 0x2bc   : > { %4346 = vst.msk [vmem:[%s11852_s13 + $0xd0] sm:$0xff] %vm13609_vm13, %v4314_v56  ;;  %vm13610_vm15 = vmmov %vm13513_vm1  ;;  %v4285_v56 = vadd.f32 %v11829_v41, %v4246_v37  ;;  %v4248_v13 = vld [vmem:[#allocation3 + $0xf8] sm:$0xff]  ;;  %v12360_v37 = vld [vmem:[#allocation2 + $0xe0] sm:$0xff] }
 0x2bd   : > { %4453 = vst.msk [vmem:[#allocation3 + $0xe8] sm:$0xff] %vm13610_vm15, %v13523_v43  ;;  %vm13611_vm10 = vmmov %vm13513_vm1  ;;  %v4247_v60 = vld [vmem:[#allocation3 + $0xf0] sm:$0xff] }
 0x2be   : > { %4452 = vst.msk [vmem:[#allocation3 + $0xe0] sm:$0xff] %vm13611_vm10, %v13523_v43  ;;  %vm13612_vm11 = vmmov %vm13513_vm1  ;;  %v4317_v29 = vmax.f32 %v4285_v56, 0.0 }
 0x2bf   : > { %9725 = vmatprep.mubr.msk.f32.mxu1 %vm13612_vm11, %v12320_v28  ;;  %vm13613_vm14 = vmmov %vm13513_vm1  ;;  %v12362_v48 = vld [vmem:[#allocation2 + $0xe7] sm:$0xff] }
 0x2c0   : > { %4347 = vst.msk [vmem:[%s11852_s13 + $0xd8] sm:$0xff] %vm13613_vm14, %v4315_v6  ;;  %vm13614_vm12 = vmmov %vm13513_vm1  ;;  %9726 = vmatmul.mubr.msk.f32.gmra.mrb[54].mxu1 %vm13513_vm1, %v12334_v52  ;;  %v12364_v56 = vld [vmem:[#allocation2 + $0xe8] sm:$0xff]  ;;  %v12378_v4 = vld [vmem:[#allocation2 + $0xf0] sm:$0xff] }
 0x2c1   : > { %4387 = vst.msk [vmem:[#allocation2 + $0xf8] sm:$0xff] %vm13614_vm12, %v4315_v6  ;;  %vm13615_vm13 = vmmov %vm13513_vm1  ;;  %v4286_v6 = vadd.f32 %v11829_v41, %v4247_v60  ;;  %v4287_v60 = vadd.f32 %v11829_v41, %v4248_v13  ;;  %v12376_v16 = vld [vmem:[#allocation2 + $0xef] sm:$0xff] }
 0x2c2   : > { %9875 = vmatprep.mubr.msk.f32.mxu0 %vm13615_vm13, %v12332_v38  ;;  %vm13616_vm15 = vmmov %vm13513_vm1  ;;  %4349 = vst.msk [vmem:[%s11852_s13 + $0xe8] sm:$0xff] %vm13513_vm1, %v4317_v29 }
 0x2c3   : > { %9876 = vmatmul.mubr.msk.f32.gmra.mrb[86].mxu0 %vm13616_vm15, %v12336_v17  ;;  %vm13617_vm10 = vmmov %vm13513_vm1 }
 0x2c4   : > { %4348 = vst.msk [vmem:[%s11852_s13 + $0xe0] sm:$0xff] %vm13617_vm10, %v4316_v45  ;;  %vm13618_vm11 = vmmov %vm13513_vm1 }
 0x2c5   : > { %4388 = vst.msk [vmem:[#allocation2 + $0x100] sm:$0xff] %vm13618_vm11, %v4316_v45  ;;  %vm13619_vm14 = vmmov %vm13513_vm1  ;;  %v4319_v45 = vmax.f32 %v4287_v60, 0.0 }
 0x2c6   : > { %4455 = vst.msk [vmem:[#allocation3 + $0xf8] sm:$0xff] %vm13619_vm14, %v13523_v43  ;;  %vm13620_vm12 = vmmov %vm13513_vm1 }
 0x2c7   : > { %4454 = vst.msk [vmem:[#allocation3 + $0xf0] sm:$0xff] %vm13620_vm12, %v13523_v43  ;;  %vm13621_vm13 = vmmov %vm13513_vm1  ;;  %v4318_v43 = vmax.f32 %v4286_v6, 0.0 }
 0x2c8   : > { %9728 = vmatprep.mubr.msk.f32.mxu1 %vm13621_vm13, %v12348_v32  ;;  %vm13622_vm15 = vmmov %vm13513_vm1  ;;  %v12380_v58 = vld [vmem:[#allocation2 + $0xf7] sm:$0xff] }
 0x2c9   : > { %4389 = vst.msk [vmem:[#allocation2 + $0x108] sm:$0xff] %vm13622_vm15, %v4317_v29  ;;  %vm13623_vm10 = vmmov %vm13513_vm1  ;;  %v12389_v13 = vld [vmem:[#allocation2 + $0xf8] sm:$0xff] }
 0x2ca   : > { %9878 = vmatprep.mubr.msk.f32.mxu0 %vm13623_vm10, %v12360_v37  ;;  %vm13624_vm11 = vmmov %vm13513_vm1  ;;  %13626 = vst [vmem:[#allocation36_spill] sm:$0xff] %v12380_v58 }
 0x2cb   : > { %9729 = vmatmul.mubr.msk.f32.gmra.mrb[56].mxu1 %vm13624_vm11, %v12362_v48  ;;  %vm13625_vm14 = vmmov %vm13513_vm1  ;;  %13630 = vst [vmem:[#allocation37_spill] sm:$0xff] %v12389_v13 }
 0x2cc   : > { %9879 = vmatmul.mubr.msk.f32.gmra.mrb[88].mxu0 %vm13625_vm14, %v12364_v56  ;;  %vm13627_vm12 = vmmov %vm13513_vm1  ;;  %9731 = vmatprep.mubr.msk.f32.mxu1 %vm13513_vm1, %v12376_v16  ;;  %v12398_v29 = vld [vmem:[#allocation2 + $0xff] sm:$0xff] }
 0x2cd   : > { %4350 = vst.msk [vmem:[%s11852_s13 + $0xf0] sm:$0xff] %vm13627_vm12, %v4318_v43  ;;  %vm13628_vm13 = vmmov %vm13513_vm1  ;;  %v12400_v41 = vld [vmem:[#allocation2 + $0x100] sm:$0xff] }
 0x2ce   : > { %4390 = vst.msk [vmem:[#allocation2 + $0x110] sm:$0xff] %vm13628_vm13, %v4318_v43  ;;  %vm13629_vm15 = vmmov %vm13513_vm1  ;;  %v4456_v43 = vld [vmem:[#allocation2 + $0xf] sm:$0xff] }
 0x2cf   : > { %9881 = vmatprep.mubr.msk.f32.mxu0 %vm13629_vm15, %v12378_v4  ;;  %vm13631_vm10 = vmmov %vm13513_vm1  ;;  %13635 = vst [vmem:[#allocation38_spill] sm:$0xff] %v12398_v29 }
 0x2d0   : > { %4351 = vst.msk [vmem:[%s11852_s13 + $0xf8] sm:$0xff] %vm13631_vm10, %v4319_v45  ;;  %vm13632_vm11 = vmmov %vm13513_vm1  ;;  %v12402_v6 = vld [vmem:[#allocation2 + $0x107] sm:$0xff] }
 0x2d1   : > { %4391 = vst.msk [vmem:[#allocation2 + $0x118] sm:$0xff] %vm13632_vm11, %v4319_v45  ;;  %vm13633_vm14 = vmmov %vm13513_vm1  ;;  %v12408_v60 = vld [vmem:[#allocation2 + $0x108] sm:$0xff] }
 0x2d2   : > { %9732 = vmatmul.mubr.msk.f32.gmra.mrb[58].mxu1 %vm13633_vm14, %v12380_v58  ;;  %vm13634_vm9 = vmmov %vm13513_vm1  ;;  %13636 = vst [vmem:[#allocation39_spill] sm:$0xff] %v12400_v41 }
 0x2d3   : > { %9882 = vmatmul.mubr.msk.f32.gmra.mrb[90].mxu0 %vm13634_vm9, %v12389_v13  ;;  %13637 = vst [vmem:[#allocation40_spill] sm:$0xff] %v12402_v6  ;;  %vm13638_vm12 = vmmov %vm13513_vm1 }
 0x2d4   : > { %9734 = vmatprep.mubr.msk.f32.mxu1 %vm13638_vm12, %v12398_v29  ;;  %vm13639_vm13 = vmmov %vm13513_vm1  ;;  %13640 = vst [vmem:[#allocation41_spill] sm:$0xff] %v12408_v60  ;;  %v5569_v29 = vld [vmem:[#allocation2 + $0x10] sm:$0xff] }
 0x2d5   : > { %9884 = vmatprep.mubr.msk.f32.mxu0 %vm13639_vm13, %v12400_v41  ;;  %vm13641_vm15 = vmmov %vm13513_vm1  ;;  %v12414_v45 = vld [vmem:[#allocation2 + $0x10f] sm:$0xff] }
 0x2d6   : > { %9735 = vmatmul.mubr.msk.f32.gmra.mrb[60].mxu1 %vm13513_vm1, %v12402_v6  ;;  %v12416_v13 = vld [vmem:[#allocation2 + $0x110] sm:$0xff]  ;;  %vm13643_vm9 = vmmov %vm13513_vm1  ;;  %v5570_v6 = vld [vmem:[#allocation2 + $0x18] sm:$0xff] }
 0x2d7   : > { %9885 = vmatmul.mubr.msk.f32.gmra.mrb[92].mxu0 %vm13641_vm15, %v12408_v60  ;;  %13642 = vst [vmem:[#allocation42_spill] sm:$0xff] %v12416_v13  ;;  %9737 = vmatprep.mubr.msk.f32.mxu1 %vm13643_vm9, %v12414_v45  ;;  %vm13644_vm10 = vmmov %vm13513_vm1  ;;  %v4457_v60 = vld [vmem:[#allocation2 + $0x17] sm:$0xff]  ;;  %vm13649_vm15 = vcmask 1043456  }
 0x2d8   : > { %v12418_v58 = vld [vmem:[#allocation2 + $0x117] sm:$0xff]  ;;  %9887 = vmatprep.mubr.msk.f32.mxu0 %vm13644_vm10, %v12416_v13  ;;  %vm13645_vm11 = vmmov %vm13513_vm1 }
 0x2d9   : > { %v12424_v41 = vld [vmem:[#allocation2 + $0x118] sm:$0xff]  ;;  %vm13646_vm14 = vmmov %vm13513_vm1  ;;  %v12436_v13 = vld [vmem:[%s13267_s3 + $0x14] sm:$0xf] }
 0x2da   : > { %9738 = vmatmul.mubr.msk.f32.gmra.mrb[62].mxu1 %vm13645_vm11, %v12418_v58  ;;  %vm13647_vm12 = vmmov %vm13513_vm1 }
 0x2db   : > { %9888 = vmatmul.mubr.msk.f32.gmra.mrb[94].mxu0 %vm13646_vm14, %v12424_v41  ;;  %9742 = vmatprep.mubr.msk.f32.mxu1 %vm13647_vm12, %v4456_v43  ;;  %vm13648_vm13 = vmmov %vm13513_vm1 }
 0x2dc   : > { %9892 = vmatprep.mubr.msk.f32.mxu0 %vm13648_vm13, %v5569_v29  ;;  %vm13650_vm9 = vmmov %vm13513_vm1  ;;  %v12574_v29 = vld [vmem:[%s13267_s3 + $0x8] sm:$0xf] }
 0x2dd   : > { %vm13651_vm10 = vmmov %vm13513_vm1 }
 0x2de   : > { %9743 = vmatmul.mubr.msk.f32.vlgmr.msra.gmra.mrb[32].mxu1 %vm13513_vm1, %v4457_v60  ;;  %vm13652_vm11 = vmmov %vm13513_vm1 }
 0x2df   : > { %9791 = vmatpush3.msk.msra.mxu1 %vm13649_vm15, %v11908_v1  ;;  %9893 = vmatmul.mubr.msk.f32.vlgmr.msra.gmra.mrb[64].mxu0 %vm13650_vm9, %v5570_v6  ;;  %vm13653_vm14 = vmmov %vm13649_vm15  ;;  %v13700_v1 = vld [vmem:[#allocation36_spill] sm:$0xff] }
 0x2e0   : > { %9745 = vmatprep.mubr.msk.f32.mxu1 %vm13651_vm10, %v11910_v8  ;;  %9895 = vmatprep.mubr.msk.f32.mxu0 %vm13652_vm11, %v11924_v11  ;;  %vm13654_vm12 = vmmov %vm13653_vm14  ;;  %v13702_v8 = vld [vmem:[#allocation37_spill] sm:$0xff]  ;;  %v13704_v11 = vld [vmem:[#allocation38_spill] sm:$0xff] }
 0x2e1   : > { %9941 = vmatpush3.msk.msra.mxu0 %vm13653_vm14, %v11951_v22  ;;  %9990 = vmatprep.subr.msk.mxu1 %vm13654_vm12, %v12436_v13  ;;  %vm13655_vm13 = vmmov %vm13513_vm1  ;;  %v13710_v22 = vld [vmem:[#allocation41_spill] sm:$0xff] }
 0x2e2   : > { %9746 = vmatmul.mubr.msk.f32.gmra.mrb[34].mxu1 %vm13655_vm13, %v11926_v12  ;;  %vm13656_vm15 = vmmov %vm13513_vm1  ;;  %v13706_v12 = vld [vmem:[#allocation39_spill] sm:$0xff] }
 0x2e3   : > { %9896 = vmatmul.mubr.msk.f32.gmra.mrb[66].mxu0 %vm13513_vm1, %v11928_v39  ;;  %9748 = vmatprep.mubr.msk.f32.mxu1 %vm13656_vm15, %v11957_v34  ;;  %vm13657_vm9 = vmmov %vm13513_vm1  ;;  %v13708_v39 = vld [vmem:[#allocation40_spill] sm:$0xff] }
 0x2e4   : > { %9898 = vmatprep.mubr.msk.f32.mxu0 %vm13657_vm9, %v11975_v62  ;;  %vm13658_vm10 = vmmov %vm13513_vm1 }
 0x2e5   : > { %vm13659_vm11 = vmmov %vm13513_vm1 }
 0x2e6   : > { %9749 = vmatmul.mubr.msk.f32.gmra.mrb[36].mxu1 %vm13658_vm10, %v11977_v42  ;;  %vm13660_vm14 = vmmov %vm13513_vm1 }
 0x2e7   : > { %9899 = vmatmul.mubr.msk.f32.gmra.mrb[68].mxu0 %vm13659_vm11, %v11979_v36  ;;  %9751 = vmatprep.mubr.msk.f32.mxu1 %vm13660_vm14, %v12001_v15  ;;  %vm13661_vm12 = vmmov %vm13513_vm1 }
 0x2e8   : > { %9901 = vmatprep.mubr.msk.f32.mxu0 %vm13661_vm12, %v12015_v21  ;;  %vm13662_vm13 = vmmov %vm13513_vm1 }
 0x2e9   : > { %vm13663_vm15 = vmmov %vm13513_vm1 }
 0x2ea   : > { %9752 = vmatmul.mubr.msk.f32.gmra.mrb[38].mxu1 %vm13662_vm13, %v12017_v24  ;;  %vm13664_vm9 = vmmov %vm13513_vm1 }
 0x2eb   : > { %9902 = vmatmul.mubr.msk.f32.gmra.mrb[70].mxu0 %vm13513_vm1, %v12019_v26  ;;  %9754 = vmatprep.mubr.msk.f32.mxu1 %vm13663_vm15, %v12038_v9  ;;  %vm13665_vm10 = vmmov %vm13513_vm1 }
 0x2ec   : > { %9904 = vmatprep.mubr.msk.f32.mxu0 %vm13664_vm9, %v12052_v30  ;;  %vm13666_vm11 = vmmov %vm13513_vm1 }
 0x2ed   : > { %vm13667_vm14 = vmmov %vm13513_vm1 }
 0x2ee   : > { %9755 = vmatmul.mubr.msk.f32.gmra.mrb[40].mxu1 %vm13665_vm10, %v12054_v10  ;;  %vm13668_vm12 = vmmov %vm13513_vm1 }
 0x2ef   : > { %9905 = vmatmul.mubr.msk.f32.gmra.mrb[72].mxu0 %vm13666_vm11, %v12056_v46  ;;  %9757 = vmatprep.mubr.msk.f32.mxu1 %vm13667_vm14, %v12075_v33  ;;  %vm13669_vm13 = vmmov %vm13513_vm1 }
 0x2f0   : > { %9907 = vmatprep.mubr.msk.f32.mxu0 %vm13668_vm12, %v12089_v63  ;;  %vm13670_vm15 = vmmov %vm13513_vm1 }
 0x2f1   : > { %vm13671_vm9 = vmmov %vm13513_vm1 }
 0x2f2   : > { %9758 = vmatmul.mubr.msk.f32.gmra.mrb[42].mxu1 %vm13669_vm13, %v12091_v18  ;;  %vm13672_vm10 = vmmov %vm13513_vm1 }
 0x2f3   : > { %9908 = vmatmul.mubr.msk.f32.gmra.mrb[74].mxu0 %vm13513_vm1, %v12093_v19  ;;  %9760 = vmatprep.mubr.msk.f32.mxu1 %vm13670_vm15, %v12112_v0  ;;  %vm13673_vm11 = vmmov %vm13513_vm1 }
 0x2f4   : > { %9910 = vmatprep.mubr.msk.f32.mxu0 %vm13671_vm9, %v12126_v53  ;;  %vm13674_vm14 = vmmov %vm13513_vm1 }
 0x2f5   : > { %vm13675_vm12 = vmmov %vm13513_vm1 }
 0x2f6   : > { %9761 = vmatmul.mubr.msk.f32.gmra.mrb[44].mxu1 %vm13672_vm10, %v12128_v50  ;;  %vm13676_vm13 = vmmov %vm13513_vm1 }
 0x2f7   : > { %9911 = vmatmul.mubr.msk.f32.gmra.mrb[76].mxu0 %vm13673_vm11, %v12130_v27  ;;  %9763 = vmatprep.mubr.msk.f32.mxu1 %vm13674_vm14, %v12149_v44  ;;  %vm13677_vm15 = vmmov %vm13513_vm1 }
 0x2f8   : > { %9913 = vmatprep.mubr.msk.f32.mxu0 %vm13675_vm12, %v12163_v3  ;;  %vm13678_vm9 = vmmov %vm13513_vm1 }
 0x2f9   : > { %vm13679_vm10 = vmmov %vm13513_vm1 }
 0x2fa   : > { %9764 = vmatmul.mubr.msk.f32.gmra.mrb[46].mxu1 %vm13676_vm13, %v12165_v25  ;;  %vm13680_vm11 = vmmov %vm13513_vm1 }
 0x2fb   : > { %9914 = vmatmul.mubr.msk.f32.gmra.mrb[78].mxu0 %vm13513_vm1, %v12167_v49  ;;  %9766 = vmatprep.mubr.msk.f32.mxu1 %vm13677_vm15, %v12186_v35  ;;  %vm13681_vm14 = vmmov %vm13513_vm1 }
 0x2fc   : > { %9916 = vmatprep.mubr.msk.f32.mxu0 %vm13678_vm9, %v12200_v57  ;;  %vm13682_vm12 = vmmov %vm13513_vm1 }
 0x2fd   : > { %vm13683_vm13 = vmmov %vm13513_vm1 }
 0x2fe   : > { %9767 = vmatmul.mubr.msk.f32.gmra.mrb[48].mxu1 %vm13679_vm10, %v12202_v5  ;;  %vm13684_vm15 = vmmov %vm13513_vm1 }
 0x2ff   : > { %9917 = vmatmul.mubr.msk.f32.gmra.mrb[80].mxu0 %vm13680_vm11, %v12204_v40  ;;  %9769 = vmatprep.mubr.msk.f32.mxu1 %vm13681_vm14, %v12222_v7  ;;  %vm13685_vm9 = vmmov %vm13513_vm1 }
 0x300   : > { %9919 = vmatprep.mubr.msk.f32.mxu0 %vm13682_vm12, %v12236_v54  ;;  %vm13686_vm10 = vmmov %vm13513_vm1 }
 0x301   : > { %vm13687_vm11 = vmmov %vm13513_vm1 }
 0x302   : > { %9770 = vmatmul.mubr.msk.f32.gmra.mrb[50].mxu1 %vm13683_vm13, %v12238_v2  ;;  %vm13688_vm14 = vmmov %vm13513_vm1 }
 0x303   : > { %9920 = vmatmul.mubr.msk.f32.gmra.mrb[82].mxu0 %vm13513_vm1, %v12240_v47  ;;  %9772 = vmatprep.mubr.msk.f32.mxu1 %vm13684_vm15, %v12258_v23  ;;  %vm13689_vm12 = vmmov %vm13513_vm1 }
 0x304   : > { %9922 = vmatprep.mubr.msk.f32.mxu0 %vm13685_vm9, %v12272_v20  ;;  %vm13690_vm13 = vmmov %vm13513_vm1 }
 0x305   : > { %vm13691_vm15 = vmmov %vm13513_vm1 }
 0x306   : > { %9773 = vmatmul.mubr.msk.f32.gmra.mrb[52].mxu1 %vm13686_vm10, %v12274_v55  ;;  %vm13692_vm9 = vmmov %vm13513_vm1 }
 0x307   : > { %9923 = vmatmul.mubr.msk.f32.gmra.mrb[84].mxu0 %vm13687_vm11, %v12276_v61  ;;  %9775 = vmatprep.mubr.msk.f32.mxu1 %vm13688_vm14, %v12290_v14  ;;  %vm13693_vm10 = vmmov %vm13513_vm1 }
 0x308   : > { %9925 = vmatprep.mubr.msk.f32.mxu0 %vm13689_vm12, %v12304_v51  ;;  %vm13694_vm11 = vmmov %vm13513_vm1 }
 0x309   : > { %vm13695_vm14 = vmmov %vm13513_vm1 }
 0x30a   : > { %9776 = vmatmul.mubr.msk.f32.gmra.mrb[54].mxu1 %vm13690_vm13, %v12306_v59  ;;  %vm13696_vm12 = vmmov %vm13513_vm1 }
 0x30b   : > { %9926 = vmatmul.mubr.msk.f32.gmra.mrb[86].mxu0 %vm13513_vm1, %v12308_v31  ;;  %9778 = vmatprep.mubr.msk.f32.mxu1 %vm13691_vm15, %v12320_v28  ;;  %vm13697_vm13 = vmmov %vm13513_vm1 }
 0x30c   : > { %9928 = vmatprep.mubr.msk.f32.mxu0 %vm13692_vm9, %v12332_v38  ;;  %vm13698_vm15 = vmmov %vm13513_vm1 }
 0x30d   : > { %vm13699_vm9 = vmmov %vm13513_vm1 }
 0x30e   : > { %9779 = vmatmul.mubr.msk.f32.gmra.mrb[56].mxu1 %vm13693_vm10, %v12334_v52  ;;  %vm13701_vm10 = vmmov %vm13513_vm1 }
 0x30f   : > { %9929 = vmatmul.mubr.msk.f32.gmra.mrb[88].mxu0 %vm13694_vm11, %v12336_v17  ;;  %9781 = vmatprep.mubr.msk.f32.mxu1 %vm13695_vm14, %v12348_v32  ;;  %vm13703_vm11 = vmmov %vm13513_vm1 }
 0x310   : > { %9931 = vmatprep.mubr.msk.f32.mxu0 %vm13696_vm12, %v12360_v37  ;;  %vm13705_vm14 = vmmov %vm13513_vm1 }
 0x311   : > { %vm13707_vm12 = vmmov %vm13513_vm1 }
 0x312   : > { %9782 = vmatmul.mubr.msk.f32.gmra.mrb[58].mxu1 %vm13697_vm13, %v12362_v48  ;;  %vm13709_vm13 = vmmov %vm13513_vm1 }
 0x313   : > { %9932 = vmatmul.mubr.msk.f32.gmra.mrb[90].mxu0 %vm13513_vm1, %v12364_v56  ;;  %9784 = vmatprep.mubr.msk.f32.mxu1 %vm13698_vm15, %v12376_v16  ;;  %vm13711_vm15 = vmmov %vm13513_vm1 }
 0x314   : > { %9934 = vmatprep.mubr.msk.f32.mxu0 %vm13699_vm9, %v12378_v4  ;;  %vm13712_vm9 = vmmov %vm13513_vm1 }
 0x316   : > { %9785 = vmatmul.mubr.msk.f32.gmra.mrb[60].mxu1 %vm13701_vm10, %v13700_v1  ;;  %vm13713_vm10 = vmmov %vm13513_vm1 }
 0x317   : > { %9935 = vmatmul.mubr.msk.f32.gmra.mrb[92].mxu0 %vm13703_vm11, %v13702_v8  ;;  %9787 = vmatprep.mubr.msk.f32.mxu1 %vm13705_vm14, %v13704_v11  ;;  %vm13714_vm11 = vmmov %vm13513_vm1  ;;  %vm13715_vm14 = vcmask 1043456  }
 0x318   : > { %9937 = vmatprep.mubr.msk.f32.mxu0 %vm13707_vm12, %v13706_v12  ;;  %vm13716_vm12 = vmmov %vm13513_vm1 }
 0x31a   : > { %9788 = vmatmul.mubr.msk.f32.gmra.mrb[62].mxu1 %vm13709_vm13, %v13708_v39  ;;  %vm13717_vm13 = vmmov %vm13513_vm1 }
 0x31b   : > { %9938 = vmatmul.mubr.msk.f32.gmra.mrb[94].mxu0 %vm13513_vm1, %v13710_v22  ;;  %9792 = vmatprep.mubr.msk.f32.mxu1 %vm13711_vm15, %v11957_v34  ;;  %vm13718_vm1 = vmmov %vm13715_vm14  ;;  %v12719_v34 = vld [vmem:[#allocation2 + $0x39] sm:$0xff] }
 0x31c   : > { %9942 = vmatprep.mubr.msk.f32.mxu0 %vm13712_vm9, %v11975_v62  ;;  %vm13719_vm15 = vmmov %vm13712_vm9  ;;  %v12723_v62 = vld [vmem:[#allocation2 + $0x41] sm:$0xff] }
 0x31e   : > { %9793 = vmatmul.mubr.msk.f32.vlgmr.msra.gmra.mrb[32].mxu1 %vm13713_vm10, %v11977_v42  ;;  %vm13720_vm10 = vmmov %vm13712_vm9  ;;  %v12727_v42 = vld [vmem:[#allocation2 + $0x49] sm:$0xff] }
 0x31f   : > { %9943 = vmatmul.mubr.msk.f32.vlgmr.msra.gmra.mrb[64].mxu0 %vm13714_vm11, %v11979_v36  ;;  %9991 = vmatpush3.msk.msra.mxu1 %vm13715_vm14, %v12436_v13  ;;  %vm13721_vm11 = vmmov %vm13712_vm9  ;;  %v12731_v36 = vld [vmem:[#allocation2 + $0x51] sm:$0xff] }
 0x320   : > { %9795 = vmatprep.mubr.msk.f32.mxu1 %vm13716_vm12, %v12001_v15  ;;  %9945 = vmatprep.mubr.msk.f32.mxu0 %vm13717_vm13, %v12015_v21  ;;  %vm13722_vm14 = vmmov %vm13712_vm9  ;;  %v12735_v15 = vld [vmem:[#allocation2 + $0x59] sm:$0xff]  ;;  %v12739_v21 = vld [vmem:[#allocation2 + $0x61] sm:$0xff] }
 0x321   : > { %10040 = vmatprep.subr.msk.mxu1 %vm13718_vm1, %v12574_v29  ;;  %vm13723_vm12 = vmmov %vm13712_vm9 }
 0x322   : > { %9796 = vmatmul.mubr.msk.f32.gmra.mrb[34].mxu1 %vm13719_vm15, %v12017_v24  ;;  %vm13724_vm13 = vmmov %vm13712_vm9  ;;  %v12743_v24 = vld [vmem:[#allocation2 + $0x69] sm:$0xff] }
 0x323   : > { %9946 = vmatmul.mubr.msk.f32.gmra.mrb[66].mxu0 %vm13712_vm9, %v12019_v26  ;;  %9798 = vmatprep.mubr.msk.f32.mxu1 %vm13720_vm10, %v12038_v9  ;;  %vm13725_vm1 = vmmov %vm13712_vm9  ;;  %v12747_v26 = vld [vmem:[#allocation2 + $0x71] sm:$0xff]  ;;  %v12755_v9 = vld [vmem:[#allocation2 + $0x81] sm:$0xff] }
 0x324   : > { %9948 = vmatprep.mubr.msk.f32.mxu0 %vm13721_vm11, %v12052_v30  ;;  %vm13726_vm15 = vmmov %vm13725_vm1  ;;  %v12759_v30 = vld [vmem:[#allocation2 + $0x89] sm:$0xff] }
 0x325   : > { %vm13727_vm9 = vmmov %vm13725_vm1 }
 0x326   : > { %9799 = vmatmul.mubr.msk.f32.gmra.mrb[36].mxu1 %vm13722_vm14, %v12054_v10  ;;  %vm13728_vm10 = vmmov %vm13725_vm1  ;;  %v12763_v10 = vld [vmem:[#allocation2 + $0x91] sm:$0xff] }
 0x327   : > { %9949 = vmatmul.mubr.msk.f32.gmra.mrb[68].mxu0 %vm13723_vm12, %v12056_v46  ;;  %9801 = vmatprep.mubr.msk.f32.mxu1 %vm13724_vm13, %v12075_v33  ;;  %vm13729_vm11 = vmmov %vm13725_vm1  ;;  %v12751_v33 = vld [vmem:[#allocation2 + $0x79] sm:$0xff] }
 0x328   : > { %9951 = vmatprep.mubr.msk.f32.mxu0 %vm13725_vm1, %v12089_v63  ;;  %vm13730_vm14 = vmmov %vm13725_vm1  ;;  %v12767_v46 = vld [vmem:[#allocation2 + $0x99] sm:$0xff]  ;;  %v12771_v63 = vld [vmem:[#allocation2 + $0xa1] sm:$0xff] }
 0x329   : > { %vm13731_vm12 = vmmov %vm13725_vm1 }
 0x32a   : > { %9802 = vmatmul.mubr.msk.f32.gmra.mrb[38].mxu1 %vm13726_vm15, %v12091_v18  ;;  %vm13732_vm13 = vmmov %vm13725_vm1  ;;  %v12775_v18 = vld [vmem:[#allocation2 + $0xa9] sm:$0xff] }
 0x32b   : > { %9952 = vmatmul.mubr.msk.f32.gmra.mrb[70].mxu0 %vm13727_vm9, %v12093_v19  ;;  %9804 = vmatprep.mubr.msk.f32.mxu1 %vm13728_vm10, %v12112_v0  ;;  %vm13733_vm15 = vmmov %vm13725_vm1  ;;  %v12711_v0 = vld [vmem:[#allocation2 + $0x31] sm:$0xff] }
 0x32c   : > { %9954 = vmatprep.mubr.msk.f32.mxu0 %vm13729_vm11, %v12126_v53  ;;  %vm13734_vm9 = vmmov %vm13725_vm1  ;;  %v12779_v19 = vld [vmem:[#allocation2 + $0xb1] sm:$0xff]  ;;  %v12783_v53 = vld [vmem:[#allocation2 + $0xb9] sm:$0xff] }
 0x32d   : > { %vm13735_vm10 = vmmov %vm13725_vm1 }
 0x32e   : > { %9805 = vmatmul.mubr.msk.f32.gmra.mrb[40].mxu1 %vm13730_vm14, %v12128_v50  ;;  %vm13736_vm11 = vmmov %vm13725_vm1  ;;  %v12787_v50 = vld [vmem:[#allocation2 + $0xc1] sm:$0xff] }
 0x32f   : > { %9955 = vmatmul.mubr.msk.f32.gmra.mrb[72].mxu0 %vm13731_vm12, %v12130_v27  ;;  %9807 = vmatprep.mubr.msk.f32.mxu1 %vm13732_vm13, %v12149_v44  ;;  %vm13737_vm14 = vmmov %vm13725_vm1  ;;  %v12707_v44 = vld [vmem:[%s13267_s3 + $0x20] sm:$0xf]  ;;  %v12791_v27 = vld [vmem:[#allocation2 + $0xc9] sm:$0xff] }
 0x330   : > { %9957 = vmatprep.mubr.msk.f32.mxu0 %vm13725_vm1, %v12163_v3  ;;  %vm13738_vm12 = vmmov %vm13725_vm1  ;;  %v12795_v3 = vld [vmem:[#allocation2 + $0xd1] sm:$0xff] }
 0x331   : > { %vm13739_vm13 = vmmov %vm13725_vm1 }
 0x332   : > { %9808 = vmatmul.mubr.msk.f32.gmra.mrb[42].mxu1 %vm13733_vm15, %v12165_v25  ;;  %vm13740_vm15 = vmmov %vm13725_vm1  ;;  %v12799_v25 = vld [vmem:[#allocation2 + $0xd9] sm:$0xff] }
 0x333   : > { %9958 = vmatmul.mubr.msk.f32.gmra.mrb[74].mxu0 %vm13734_vm9, %v12167_v49  ;;  %9810 = vmatprep.mubr.msk.f32.mxu1 %vm13735_vm10, %v12186_v35  ;;  %vm13741_vm9 = vmmov %vm13725_vm1  ;;  %v12697_v35 = vld [vmem:[#allocation2 + $0x21] sm:$0xff] }
 0x334   : > { %9960 = vmatprep.mubr.msk.f32.mxu0 %vm13736_vm11, %v12200_v57  ;;  %vm13742_vm10 = vmmov %vm13725_vm1  ;;  %v12803_v49 = vld [vmem:[#allocation2 + $0xe1] sm:$0xff]  ;;  %v12807_v57 = vld [vmem:[#allocation2 + $0xe9] sm:$0xff] }
 0x335   : > { %vm13743_vm11 = vmmov %vm13725_vm1 }
 0x336   : > { %9811 = vmatmul.mubr.msk.f32.gmra.mrb[44].mxu1 %vm13737_vm14, %v12202_v5  ;;  %vm13744_vm14 = vmmov %vm13725_vm1  ;;  %v12811_v5 = vld [vmem:[#allocation2 + $0xf1] sm:$0xff] }
 0x337   : > { %9961 = vmatmul.mubr.msk.f32.gmra.mrb[76].mxu0 %vm13738_vm12, %v12204_v40  ;;  %9813 = vmatprep.mubr.msk.f32.mxu1 %vm13739_vm13, %v12222_v7  ;;  %vm13745_vm12 = vmmov %vm13725_vm1  ;;  %v6196_v7 = vld [vmem:[#allocation2 + $0x128] sm:$0xff]  ;;  %v12815_v40 = vld [vmem:[#allocation2 + $0xf9] sm:$0xff] }
 0x338   : > { %9963 = vmatprep.mubr.msk.f32.mxu0 %vm13725_vm1, %v12236_v54  ;;  %vm13746_vm13 = vmmov %vm13725_vm1  ;;  %v12819_v54 = vld [vmem:[#allocation2 + $0x101] sm:$0xff] }
 0x33a   : > { %9814 = vmatmul.mubr.msk.f32.gmra.mrb[46].mxu1 %vm13740_vm15, %v12238_v2  ;;  %vm13747_vm15 = vmmov %vm13725_vm1  ;;  %v12823_v2 = vld [vmem:[#allocation2 + $0x109] sm:$0xff] }
 0x33b   : > { %9964 = vmatmul.mubr.msk.f32.gmra.mrb[78].mxu0 %vm13741_vm9, %v12240_v47  ;;  %9816 = vmatprep.mubr.msk.f32.mxu1 %vm13742_vm10, %v12258_v23  ;;  %vm13748_vm9 = vmmov %vm13725_vm1  ;;  %v5082_v23 = vld [vmem:[#allocation2 + $0x127] sm:$0xff]  ;;  %v12827_v47 = vld [vmem:[#allocation2 + $0x111] sm:$0xff] }
 0x33c   : > { %9966 = vmatprep.mubr.msk.f32.mxu0 %vm13743_vm11, %v12272_v20  ;;  %vm13749_vm10 = vmmov %vm13725_vm1  ;;  %v6651_v20 = vld [vmem:[#allocation2 + $0x11] sm:$0xff] }
 0x33d   : > { %vm13750_vm11 = vmmov %vm13725_vm1 }
 0x33e   : > { %9817 = vmatmul.mubr.msk.f32.gmra.mrb[48].mxu1 %vm13744_vm14, %v12274_v55  ;;  %vm13751_vm14 = vmmov %vm13725_vm1  ;;  %v12831_v55 = vld [vmem:[#allocation2 + $0x119] sm:$0xff] }
 0x33f   : > { %9967 = vmatmul.mubr.msk.f32.gmra.mrb[80].mxu0 %vm13745_vm12, %v12276_v61  ;;  %9819 = vmatprep.mubr.msk.f32.mxu1 %vm13746_vm13, %v12290_v14  ;;  %vm13752_vm12 = vmmov %vm13725_vm1  ;;  %v6652_v61 = vld [vmem:[#allocation2 + $0x19] sm:$0xff]  ;;  %v5474_v14 = vld [vmem:[#allocation3 + $0x8] sm:$0xff] }
 0x340   : > { %9969 = vmatprep.mubr.msk.f32.mxu0 %vm13725_vm1, %v12304_v51  ;;  %vm13753_vm13 = vmmov %vm13725_vm1 }
 0x342   : > { %9820 = vmatmul.mubr.msk.f32.gmra.mrb[50].mxu1 %vm13747_vm15, %v12306_v59  ;;  %vm13754_vm15 = vmmov %vm13725_vm1  ;;  %v5473_v59 = vld [vmem:[#allocation3] sm:$0xff] }
 0x343   : > { %9970 = vmatmul.mubr.msk.f32.gmra.mrb[82].mxu0 %vm13748_vm9, %v12308_v31  ;;  %9822 = vmatprep.mubr.msk.f32.mxu1 %vm13749_vm10, %v12320_v28  ;;  %vm13755_vm9 = vmmov %vm13725_vm1 }
 0x344   : > { %9972 = vmatprep.mubr.msk.f32.mxu0 %vm13750_vm11, %v12332_v38  ;;  %vm13756_vm10 = vmmov %vm13725_vm1 }
 0x345   : > { %vm13757_vm11 = vmmov %vm13725_vm1 }
 0x346   : > { %9823 = vmatmul.mubr.msk.f32.gmra.mrb[52].mxu1 %vm13751_vm14, %v12334_v52  ;;  %vm13758_vm14 = vmmov %vm13725_vm1 }
 0x347   : > { %9973 = vmatmul.mubr.msk.f32.gmra.mrb[84].mxu0 %vm13752_vm12, %v12336_v17  ;;  %9825 = vmatprep.mubr.msk.f32.mxu1 %vm13753_vm13, %v12348_v32  ;;  %vm13759_vm12 = vmmov %vm13725_vm1  ;;  %v5081_v32 = vld [vmem:[#allocation2 + $0x11f] sm:$0xff] }
 0x348   : > { %9975 = vmatprep.mubr.msk.f32.mxu0 %vm13725_vm1, %v12360_v37  ;;  %vm13760_vm13 = vmmov %vm13725_vm1 }
 0x34a   : > { %9826 = vmatmul.mubr.msk.f32.gmra.mrb[54].mxu1 %vm13754_vm15, %v12362_v48  ;;  %vm13761_vm15 = vmmov %vm13725_vm1  ;;  %v5476_v48 = vld [vmem:[#allocation3 + $0x18] sm:$0xff] }
 0x34b   : > { %9976 = vmatmul.mubr.msk.f32.gmra.mrb[86].mxu0 %vm13755_vm9, %v12364_v56  ;;  %9828 = vmatprep.mubr.msk.f32.mxu1 %vm13756_vm10, %v12376_v16  ;;  %vm13762_vm9 = vmmov %vm13725_vm1  ;;  %v6195_v16 = vld [vmem:[#allocation2 + $0x120] sm:$0xff] }
 0x34c   : > { %9978 = vmatprep.mubr.msk.f32.mxu0 %vm13757_vm11, %v12378_v4  ;;  %vm13763_vm10 = vmmov %vm13725_vm1  ;;  %v13764_v4 = vld [vmem:[#allocation42_spill] sm:$0xff] }
 0x34d   : > { %vm13765_vm11 = vmmov %vm13725_vm1 }
 0x34e   : > { %9829 = vmatmul.mubr.msk.f32.gmra.mrb[56].mxu1 %vm13758_vm14, %v13700_v1  ;;  %vm13766_vm14 = vmmov %vm13725_vm1 }
 0x34f   : > { %9979 = vmatmul.mubr.msk.f32.gmra.mrb[88].mxu0 %vm13759_vm12, %v13702_v8  ;;  %9831 = vmatprep.mubr.msk.f32.mxu1 %vm13760_vm13, %v13704_v11  ;;  %vm13767_vm12 = vmmov %vm13725_vm1  ;;  %v5478_v11 = vld [vmem:[#allocation3 + $0x28] sm:$0xff] }
 0x350   : > { %9981 = vmatprep.mubr.msk.f32.mxu0 %vm13725_vm1, %v13706_v12  ;;  %vm13768_vm13 = vmmov %vm13725_vm1 }
 0x352   : > { %9832 = vmatmul.mubr.msk.f32.gmra.mrb[58].mxu1 %vm13761_vm15, %v13708_v39  ;;  %vm13769_vm15 = vmmov %vm13725_vm1 }
 0x353   : > { %9982 = vmatmul.mubr.msk.f32.gmra.mrb[90].mxu0 %vm13762_vm9, %v13710_v22  ;;  %9834 = vmatprep.mubr.msk.f32.mxu1 %vm13763_vm10, %v12414_v45  ;;  %vm13770_vm9 = vmmov %vm13725_vm1  ;;  %v5477_v22 = vld [vmem:[#allocation3 + $0x20] sm:$0xff] }
 0x354   : > { %9984 = vmatprep.mubr.msk.f32.mxu0 %vm13765_vm11, %v13764_v4  ;;  %vm13771_vm10 = vmmov %vm13725_vm1 }
 0x355   : > { %vm13772_vm11 = vmmov %vm13725_vm1 }
 0x356   : > { %9835 = vmatmul.mubr.msk.f32.gmra.mrb[60].mxu1 %vm13766_vm14, %v12418_v58  ;;  %v12702_v58 = vld [vmem:[#allocation2 + $0x29] sm:$0xff]  ;;  %vm13773_vm14 = vcmask 1043456  }
 0x357   : > { %9985 = vmatmul.mubr.msk.f32.gmra.mrb[92].mxu0 %vm13767_vm12, %v12424_v41  ;;  %9837 = vmatprep.mubr.msk.f32.mxu1 %vm13768_vm13, %v5081_v32  ;;  %vm13774_vm12 = vmmov %vm13725_vm1  ;;  %v5475_v41 = vld [vmem:[#allocation3 + $0x10] sm:$0xff] }
 0x358   : > { %9987 = vmatprep.mubr.msk.f32.mxu0 %vm13725_vm1, %v6195_v16  ;;  %vm13775_vm13 = vmmov %vm13773_vm14 }
 0x35a   : > { %9838 = vmatmul.mubr.msk.f32.gmra.mrb[62].mxu1 %vm13769_vm15, %v5082_v23  ;;  %vm13776_vm15 = vmmov %vm13725_vm1 }
 0x35b   : > { %9988 = vmatmul.mubr.msk.f32.gmra.mrb[94].mxu0 %vm13770_vm9, %v6196_v7  ;;  %9992 = vmatprep.mubr.msk.f32.mxu1 %vm13771_vm10, %v12697_v35  ;;  %vm13777_vm9 = vmmov %vm13725_vm1 }
 0x35c   : > { %vm13778_vm10 = vmmov %vm13725_vm1 }
 0x35e   : > { %9993 = vmatmul.mubr.msk.f32.vlgmr.msra.gmra.mrb[64].mxu1 %vm13772_vm11, %v12702_v58  ;;  %vm13779_vm11 = vmmov %vm13725_vm1 }
 0x35f   : > { %10041 = vmatpush3.msk.msra.mxu1 %vm13773_vm14, %v12574_v29  ;;  %9995 = vmatprep.mubr.msk.f32.mxu1 %vm13774_vm12, %v12711_v0  ;;  %vm13780_vm14 = vmmov %vm13725_vm1 }
 0x360   : > { %10090 = vmatprep.subr.msk.mxu1 %vm13775_vm13, %v12707_v44  ;;  %vm13781_vm12 = vmmov %vm13725_vm1 }
 0x361   : > { %vm13782_vm13 = vmmov %vm13725_vm1 }
 0x362   : > { %9996 = vmatmul.mubr.msk.f32.gmra.mrb[66].mxu1 %vm13725_vm1, %v12719_v34 }
 0x363   : > { %9998 = vmatprep.mubr.msk.f32.mxu1 %vm13776_vm15, %v12723_v62  ;;  %vm13783_vm15 = vmmov %vm13725_vm1 }
 0x366   : > { %9999 = vmatmul.mubr.msk.f32.gmra.mrb[68].mxu1 %vm13777_vm9, %v12727_v42  ;;  %vm13784_vm9 = vmmov %vm13725_vm1 }
 0x367   : > { %10001 = vmatprep.mubr.msk.f32.mxu1 %vm13778_vm10, %v12731_v36  ;;  %vm13785_vm10 = vmmov %vm13725_vm1 }
 0x36a   : > { %10002 = vmatmul.mubr.msk.f32.gmra.mrb[70].mxu1 %vm13779_vm11, %v12735_v15  ;;  %vm13786_vm11 = vmmov %vm13725_vm1 }
 0x36b   : > { %10004 = vmatprep.mubr.msk.f32.mxu1 %vm13780_vm14, %v12739_v21  ;;  %vm13787_vm14 = vmmov %vm13725_vm1 }
 0x36e   : > { %10005 = vmatmul.mubr.msk.f32.gmra.mrb[72].mxu1 %vm13781_vm12, %v12743_v24  ;;  %vm13788_vm12 = vmmov %vm13725_vm1 }
 0x36f   : > { %10007 = vmatprep.mubr.msk.f32.mxu1 %vm13782_vm13, %v12747_v26  ;;  %vm13789_vm13 = vmmov %vm13725_vm1 }
 0x372   : > { %10008 = vmatmul.mubr.msk.f32.gmra.mrb[74].mxu1 %vm13725_vm1, %v12751_v33 }
 0x373   : > { %10010 = vmatprep.mubr.msk.f32.mxu1 %vm13783_vm15, %v12755_v9  ;;  %vm13790_vm15 = vmmov %vm13725_vm1 }
 0x376   : > { %10011 = vmatmul.mubr.msk.f32.gmra.mrb[76].mxu1 %vm13784_vm9, %v12759_v30  ;;  %vm13791_vm9 = vmmov %vm13725_vm1 }
 0x377   : > { %10013 = vmatprep.mubr.msk.f32.mxu1 %vm13785_vm10, %v12763_v10  ;;  %vm13792_vm10 = vmmov %vm13725_vm1 }
 0x37a   : > { %10014 = vmatmul.mubr.msk.f32.gmra.mrb[78].mxu1 %vm13786_vm11, %v12767_v46  ;;  %vm13793_vm11 = vmmov %vm13725_vm1 }
 0x37b   : > { %10016 = vmatprep.mubr.msk.f32.mxu1 %vm13787_vm14, %v12771_v63  ;;  %vm13794_vm14 = vmmov %vm13725_vm1 }
 0x37e   : > { %10017 = vmatmul.mubr.msk.f32.gmra.mrb[80].mxu1 %vm13788_vm12, %v12775_v18  ;;  %vm13795_vm12 = vmmov %vm13725_vm1 }
 0x37f   : > { %10019 = vmatprep.mubr.msk.f32.mxu1 %vm13789_vm13, %v12779_v19  ;;  %vm13796_vm13 = vmmov %vm13725_vm1 }
 0x382   : > { %10020 = vmatmul.mubr.msk.f32.gmra.mrb[82].mxu1 %vm13725_vm1, %v12783_v53 }
 0x383   : > { %10022 = vmatprep.mubr.msk.f32.mxu1 %vm13790_vm15, %v12787_v50  ;;  %vm13797_vm15 = vmmov %vm13725_vm1 }
 0x386   : > { %10023 = vmatmul.mubr.msk.f32.gmra.mrb[84].mxu1 %vm13791_vm9, %v12791_v27  ;;  %vm13798_vm9 = vmmov %vm13725_vm1 }
 0x387   : > { %10025 = vmatprep.mubr.msk.f32.mxu1 %vm13792_vm10, %v12795_v3  ;;  %vm13799_vm10 = vmmov %vm13725_vm1 }
 0x38a   : > { %10026 = vmatmul.mubr.msk.f32.gmra.mrb[86].mxu1 %vm13793_vm11, %v12799_v25  ;;  %vm13800_vm11 = vmmov %vm13725_vm1 }
 0x38b   : > { %10028 = vmatprep.mubr.msk.f32.mxu1 %vm13794_vm14, %v12803_v49  ;;  %vm13801_vm14 = vmmov %vm13725_vm1 }
 0x38e   : > { %10029 = vmatmul.mubr.msk.f32.gmra.mrb[88].mxu1 %vm13795_vm12, %v12807_v57  ;;  %vm13802_vm12 = vmmov %vm13725_vm1 }
 0x38f   : > { %10031 = vmatprep.mubr.msk.f32.mxu1 %vm13796_vm13, %v12811_v5  ;;  %vm13803_vm13 = vcmask 1043456  }
 0x392   : > { %10032 = vmatmul.mubr.msk.f32.gmra.mrb[90].mxu1 %vm13725_vm1, %v12815_v40 }
 0x393   : > { %10034 = vmatprep.mubr.msk.f32.mxu1 %vm13797_vm15, %v12819_v54  ;;  %vm13804_vm15 = vmmov %vm13725_vm1 }
 0x396   : > { %10035 = vmatmul.mubr.msk.f32.gmra.mrb[92].mxu1 %vm13798_vm9, %v12823_v2  ;;  %vm13805_vm9 = vmmov %vm13725_vm1 }
 0x397   : > { %10037 = vmatprep.mubr.msk.f32.mxu1 %vm13799_vm10, %v12827_v47  ;;  %vm13806_vm10 = vmmov %vm13725_vm1 }
 0x39a   : > { %10038 = vmatmul.mubr.msk.f32.gmra.mrb[94].mxu1 %vm13800_vm11, %v12831_v55  ;;  %vm13807_vm11 = vmmov %vm13725_vm1 }
 0x39b   : > { %10042 = vmatprep.mubr.msk.f32.mxu1 %vm13801_vm14, %v6651_v20  ;;  %vm13808_vm14 = vmmov %vm13725_vm1  ;;  %v5481_v20 = vld [vmem:[#allocation3 + $0x40] sm:$0xff] }
 0x39e   : > { %10043 = vmatmul.mubr.msk.f32.vlgmr.msra.gmra.mrb[64].mxu1 %vm13802_vm12, %v6652_v61  ;;  %vm13809_vm12 = vmmov %vm13725_vm1 }
 0x39f   : > { %10091 = vmatpush3.msk.msra.mxu1 %vm13803_vm13, %v12707_v44  ;;  %10045 = vmatprep.mubr.msk.f32.mxu1 %vm13725_vm1, %v12697_v35  ;;  %vm13810_vm13 = vmmov %vm13725_vm1 }
 0x3a2   : > { %10046 = vmatmul.mubr.msk.f32.gmra.mrb[66].mxu1 %vm13804_vm15, %v12702_v58  ;;  %vm13811_vm15 = vmmov %vm13725_vm1  ;;  %v5480_v58 = vld [vmem:[#allocation3 + $0x38] sm:$0xff] }
 0x3a3   : > { %10048 = vmatprep.mubr.msk.f32.mxu1 %vm13805_vm9, %v12711_v0  ;;  %vm13812_vm9 = vmmov %vm13725_vm1 }
 0x3a6   : > { %10049 = vmatmul.mubr.msk.f32.gmra.mrb[68].mxu1 %vm13806_vm10, %v12719_v34  ;;  %vm13813_vm10 = vmmov %vm13725_vm1 }
 0x3a7   : > { %10051 = vmatprep.mubr.msk.f32.mxu1 %vm13807_vm11, %v12723_v62  ;;  %vm13814_vm11 = vmmov %vm13725_vm1 }
 0x3aa   : > { %10052 = vmatmul.mubr.msk.f32.gmra.mrb[70].mxu1 %vm13808_vm14, %v12727_v42  ;;  %vm13815_vm14 = vmmov %vm13725_vm1 }
 0x3ab   : > { %10054 = vmatprep.mubr.msk.f32.mxu1 %vm13809_vm12, %v12731_v36  ;;  %vm13816_vm12 = vmmov %vm13725_vm1 }
 0x3ae   : > { %10055 = vmatmul.mubr.msk.f32.gmra.mrb[72].mxu1 %vm13810_vm13, %v12735_v15  ;;  %vm13817_vm13 = vmmov %vm13725_vm1 }
 0x3af   : > { %10057 = vmatprep.mubr.msk.f32.mxu1 %vm13725_vm1, %v12739_v21 }
 0x3b2   : > { %10058 = vmatmul.mubr.msk.f32.gmra.mrb[74].mxu1 %vm13811_vm15, %v12743_v24  ;;  %vm13818_vm15 = vmmov %vm13725_vm1 }
 0x3b3   : > { %10060 = vmatprep.mubr.msk.f32.mxu1 %vm13812_vm9, %v12747_v26  ;;  %vm13819_vm9 = vmmov %vm13725_vm1 }
 0x3b6   : > { %10061 = vmatmul.mubr.msk.f32.gmra.mrb[76].mxu1 %vm13813_vm10, %v12751_v33  ;;  %vm13820_vm10 = vmmov %vm13725_vm1 }
 0x3b7   : > { %10063 = vmatprep.mubr.msk.f32.mxu1 %vm13814_vm11, %v12755_v9  ;;  %vm13821_vm11 = vmmov %vm13725_vm1 }
 0x3ba   : > { %10064 = vmatmul.mubr.msk.f32.gmra.mrb[78].mxu1 %vm13815_vm14, %v12759_v30  ;;  %vm13822_vm14 = vmmov %vm13725_vm1 }
 0x3bb   : > { %10066 = vmatprep.mubr.msk.f32.mxu1 %vm13816_vm12, %v12763_v10  ;;  %vm13823_vm12 = vmmov %vm13725_vm1 }
 0x3be   : > { %10067 = vmatmul.mubr.msk.f32.gmra.mrb[80].mxu1 %vm13817_vm13, %v12767_v46  ;;  %vm13824_vm13 = vmmov %vm13725_vm1 }
 0x3bf   : > { %10069 = vmatprep.mubr.msk.f32.mxu1 %vm13725_vm1, %v12771_v63 }
 0x3c2   : > { %10070 = vmatmul.mubr.msk.f32.gmra.mrb[82].mxu1 %vm13818_vm15, %v12775_v18  ;;  %vm13825_vm15 = vmmov %vm13725_vm1 }
 0x3c3   : > { %10072 = vmatprep.mubr.msk.f32.mxu1 %vm13819_vm9, %v12779_v19  ;;  %vm13826_vm9 = vmmov %vm13725_vm1 }
 0x3c6   : > { %10073 = vmatmul.mubr.msk.f32.gmra.mrb[84].mxu1 %vm13820_vm10, %v12783_v53  ;;  %vm13827_vm10 = vmmov %vm13725_vm1 }
 0x3c7   : > { %10075 = vmatprep.mubr.msk.f32.mxu1 %vm13821_vm11, %v12787_v50  ;;  %vm13828_vm11 = vmmov %vm13725_vm1 }
 0x3ca   : > { %10076 = vmatmul.mubr.msk.f32.gmra.mrb[86].mxu1 %vm13822_vm14, %v12791_v27  ;;  %vm13829_vm14 = vmmov %vm13725_vm1 }
 0x3cb   : > { %10078 = vmatprep.mubr.msk.f32.mxu1 %vm13823_vm12, %v12795_v3  ;;  %vm13830_vm12 = vmmov %vm13725_vm1 }
 0x3ce   : > { %10079 = vmatmul.mubr.msk.f32.gmra.mrb[88].mxu1 %vm13824_vm13, %v12799_v25  ;;  %vm13831_vm13 = vmmov %vm13725_vm1 }
 0x3cf   : > { %10081 = vmatprep.mubr.msk.f32.mxu1 %vm13725_vm1, %v12803_v49 }
 0x3d2   : > { %10082 = vmatmul.mubr.msk.f32.gmra.mrb[90].mxu1 %vm13825_vm15, %v12807_v57  ;;  %vm13832_vm15 = vmmov %vm13725_vm1 }
 0x3d3   : > { %10084 = vmatprep.mubr.msk.f32.mxu1 %vm13826_vm9, %v12811_v5  ;;  %vm13833_vm9 = vmmov %vm13725_vm1 }
 0x3d6   : > { %10085 = vmatmul.mubr.msk.f32.gmra.mrb[92].mxu1 %vm13827_vm10, %v12815_v40  ;;  %vm13834_vm10 = vmmov %vm13725_vm1 }
 0x3d7   : > { %10087 = vmatprep.mubr.msk.f32.mxu1 %vm13828_vm11, %v12819_v54  ;;  %vm13835_vm11 = vmmov %vm13725_vm1 }
 0x3da   : > { %10088 = vmatmul.mubr.msk.f32.gmra.mrb[94].mxu1 %vm13829_vm14, %v12823_v2  ;;  %vm13836_vm14 = vmmov %vm13725_vm1 }
 0x3db   : > { %10092 = vmatprep.mubr.msk.f32.mxu1 %vm13830_vm12, %v12711_v0  ;;  %vm13837_vm12 = vmmov %vm13725_vm1 }
 0x3de   : > { %10093 = vmatmul.mubr.msk.f32.vlgmr.msra.gmra.mrb[64].mxu1 %vm13831_vm13, %v12719_v34  ;;  %vm13838_vm13 = vmmov %vm13725_vm1 }
 0x3df   : > { %10095 = vmatprep.mubr.msk.f32.mxu1 %vm13725_vm1, %v12723_v62 }
 0x3e2   : > { %10096 = vmatmul.mubr.msk.f32.gmra.mrb[66].mxu1 %vm13832_vm15, %v12727_v42  ;;  %vm13839_vm15 = vmmov %vm13725_vm1  ;;  %v5479_v42 = vld [vmem:[#allocation3 + $0x30] sm:$0xff] }
 0x3e3   : > { %10098 = vmatprep.mubr.msk.f32.mxu1 %vm13833_vm9, %v12731_v36  ;;  %vm13841_vm9 = vmmov %vm13725_vm1 }
 0x3e6   : > { %10099 = vmatmul.mubr.msk.f32.gmra.mrb[68].mxu1 %vm13834_vm10, %v12735_v15  ;;  %vm13842_vm10 = vmmov %vm13725_vm1 }
 0x3e7   : > { %10101 = vmatprep.mubr.msk.f32.mxu1 %vm13835_vm11, %v12739_v21  ;;  %vm13843_vm11 = vmmov %vm13725_vm1 }
 0x3ea   : > { %10102 = vmatmul.mubr.msk.f32.gmra.mrb[70].mxu1 %vm13836_vm14, %v12743_v24  ;;  %vm13844_vm14 = vmmov %vm13725_vm1 }
 0x3eb   : > { %10104 = vmatprep.mubr.msk.f32.mxu1 %vm13837_vm12, %v12747_v26  ;;  %vm13847_vm12 = vmmov %vm13725_vm1 }
 0x3ee   : > { %10105 = vmatmul.mubr.msk.f32.gmra.mrb[72].mxu1 %vm13838_vm13, %v12751_v33  ;;  %vm13848_vm13 = vmmov %vm13725_vm1  ;;  %v5490_v33 = vld [vmem:[#allocation3 + $0x88] sm:$0xff] }
 0x3ef   : > { %10107 = vmatprep.mubr.msk.f32.mxu1 %vm13725_vm1, %v12755_v9 }
 0x3f1   : > { %v9794_v51 = vpop.f32.mrb[32].mxu1 }
 0x3f2   : > { %v5506_v31 = vadd.f32 %v9794_v51, %v5474_v14  ;;  %v9944_v28 = vpop.f32.mrb[64].mxu0  ;;  %v5250_v38 = vpop.f32.mrb[33].mxu1  ;;  %10108 = vmatmul.mubr.msk.f32.gmra.mrb[74].mxu1 %vm13839_vm15, %v12759_v30  ;;  %vm13851_vm15 = vmmov %vm13725_vm1 }
 0x3f3   : > { %v5441_v17 = vsel %vm11566_vm2, %v5250_v38, 0.0  ;;  %v6364_v37 = vpop.f32.mrb[65].mxu0  ;;  %10110 = vmatprep.mubr.msk.f32.mxu1 %vm13841_vm9, %v12763_v10  ;;  %vm13846_vm2 = vmmov %vm13725_vm1  ;;  %v5482_v10 = vld [vmem:[#allocation3 + $0x48] sm:$0xff]  ;;  %v5484_v38 = vld [vmem:[#allocation3 + $0x58] sm:$0xff] }
 0x3f4   : > { %5538 = vst.msk [vmem:[#allocation3 + $0x8] sm:$0xff] %vm13842_vm10, %v5506_v31  ;;  %v5505_v56 = vadd.f32 %v5473_v59, %v5441_v17  ;;  %vm13852_vm9 = vmmov %vm13725_vm1 }
 0x3f5   : > { %v9797_v13 = vpop.f32.mrb[34].mxu1  ;;  %vm13853_vm10 = vmmov %vm13725_vm1 }
 0x3f6   : > { %5537 = vst.msk [vmem:[#allocation3] sm:$0xff] %vm13843_vm11, %v5505_v56  ;;  %v5508_v6 = vadd.f32 %v9797_v13, %v5476_v48  ;;  %v9947_v60 = vpop.f32.mrb[66].mxu0  ;;  %v5260_v43 = vpop.f32.mrb[35].mxu1  ;;  %10111 = vmatmul.mubr.msk.f32.gmra.mrb[76].mxu1 %vm13844_vm14, %v12767_v46  ;;  %vm13856_vm11 = vmmov %vm13725_vm1  ;;  %v5483_v56 = vld [vmem:[#allocation3 + $0x50] sm:$0xff] }
 0x3f7   : > { %v5443_v1 = vsel %vm11578_vm3, %v5260_v43, 0.0  ;;  %v6374_v8 = vpop.f32.mrb[67].mxu0  ;;  %10113 = vmatprep.mubr.msk.f32.mxu1 %vm13846_vm2, %v12771_v63  ;;  %vm13850_vm3 = vmmov %vm13725_vm1 }
 0x3f8   : > { %5540 = vst.msk [vmem:[#allocation3 + $0x18] sm:$0xff] %vm13847_vm12, %v5508_v6  ;;  %v5507_v12 = vadd.f32 %v5475_v41, %v5443_v1  ;;  %vm13857_vm14 = vmmov %vm13725_vm1  ;;  %v5486_v1 = vld [vmem:[#allocation3 + $0x68] sm:$0xff] }
 0x3f9   : > { %v9800_v39 = vpop.f32.mrb[36].mxu1  ;;  %vm13858_vm2 = vmmov %vm13725_vm1 }
 0x3fa   : > { %5539 = vst.msk [vmem:[#allocation3 + $0x10] sm:$0xff] %vm13848_vm13, %v5507_v12  ;;  %v5510_v29 = vadd.f32 %v9800_v39, %v5478_v11  ;;  %v9950_v4 = vpop.f32.mrb[68].mxu0  ;;  %v5270_v16 = vpop.f32.mrb[37].mxu1  ;;  %10114 = vmatmul.mubr.msk.f32.gmra.mrb[78].mxu1 %vm13725_vm1, %v12775_v18  ;;  %vm13859_vm12 = vmmov %vm13725_vm1 }
 0x3fb   : > { %v6556_v32 = vld [vmem:[#allocation3 + $0x8] sm:$0xff]  ;;  %v5445_v7 = vsel %vm11592_vm4, %v5270_v16, 0.0  ;;  %v6384_v35 = vpop.f32.mrb[69].mxu0  ;;  %10116 = vmatprep.mubr.msk.f32.mxu1 %vm13850_vm3, %v12779_v19  ;;  %vm13854_vm4 = vmmov %vm13725_vm1 }
 0x3fc   : > { %v6588_v44 = vadd.f32 %v9944_v28, %v6556_v32  ;;  %5542 = vst.msk [vmem:[#allocation3 + $0x28] sm:$0xff] %vm13851_vm15, %v5510_v29  ;;  %v5509_v0 = vadd.f32 %v5477_v22, %v5445_v7  ;;  %vm13860_vm13 = vmmov %vm13725_vm1  ;;  %v5485_v22 = vld [vmem:[#allocation3 + $0x60] sm:$0xff] }
 0x3fd   : > { %v6555_v34 = vld [vmem:[#allocation3] sm:$0xff]  ;;  %v9803_v62 = vpop.f32.mrb[38].mxu1  ;;  %vm13863_vm3 = vmmov %vm13725_vm1 }
 0x3fe   : > { %6620 = vst.msk [vmem:[#allocation3 + $0x8] sm:$0xff] %vm13852_vm9, %v6588_v44  ;;  %v6587_v36 = vadd.f32 %v6555_v34, %v6364_v37  ;;  %v5512_v15 = vadd.f32 %v9803_v62, %v5480_v58  ;;  %v9953_v21 = vpop.f32.mrb[70].mxu0  ;;  %v5280_v24 = vpop.f32.mrb[39].mxu1  ;;  %10117 = vmatmul.mubr.msk.f32.gmra.mrb[80].mxu1 %vm13854_vm4, %v12783_v53  ;;  %vm13864_vm15 = vmmov %vm13725_vm1  ;;  %v5487_v62 = vld [vmem:[#allocation3 + $0x70] sm:$0xff] }
 0x3ff   : > { %5541 = vst.msk [vmem:[#allocation3 + $0x20] sm:$0xff] %vm13853_vm10, %v5509_v0  ;;  %v6558_v26 = vld [vmem:[#allocation3 + $0x18] sm:$0xff]  ;;  %v5447_v9 = vsel %vm11604_vm5, %v5280_v24, 0.0  ;;  %v6394_v30 = vpop.f32.mrb[71].mxu0  ;;  %10119 = vmatprep.mubr.msk.f32.mxu1 %vm13856_vm11, %v12787_v50  ;;  %vm13861_vm5 = vmmov %vm13725_vm1 }
 0x400   : > { %6619 = vst.msk [vmem:[#allocation3] sm:$0xff] %vm13857_vm14, %v6587_v36  ;;  %v6590_v46 = vadd.f32 %v9947_v60, %v6558_v26  ;;  %v5511_v63 = vadd.f32 %v5479_v42, %v5447_v9  ;;  %vm13865_vm9 = vmmov %vm13725_vm1 }
 0x401   : > { %5544 = vst.msk [vmem:[#allocation3 + $0x38] sm:$0xff] %vm13858_vm2, %v5512_v15  ;;  %v6557_v18 = vld [vmem:[#allocation3 + $0x10] sm:$0xff]  ;;  %v9806_v19 = vpop.f32.mrb[40].mxu1  ;;  %vm13866_vm10 = vmmov %vm13725_vm1 }
 0x402   : > { %6622 = vst.msk [vmem:[#allocation3 + $0x18] sm:$0xff] %vm13859_vm12, %v6590_v46  ;;  %v6589_v53 = vadd.f32 %v6557_v18, %v6374_v8  ;;  %v5514_v61 = vadd.f32 %v9806_v19, %v5482_v10  ;;  %v9956_v14 = vpop.f32.mrb[72].mxu0  ;;  %v5290_v51 = vpop.f32.mrb[41].mxu1  ;;  %10120 = vmatmul.mubr.msk.f32.gmra.mrb[82].mxu1 %vm13861_vm5, %v12791_v27  ;;  %vm13869_vm4 = vmmov %vm13725_vm1 }
 0x403   : > { %5543 = vst.msk [vmem:[#allocation3 + $0x30] sm:$0xff] %vm13860_vm13, %v5511_v63  ;;  %v6560_v50 = vld [vmem:[#allocation3 + $0x28] sm:$0xff]  ;;  %v5449_v31 = vsel %vm11617_vm6, %v5290_v51, 0.0  ;;  %v6404_v28 = vpop.f32.mrb[73].mxu0  ;;  %10122 = vmatprep.mubr.msk.f32.mxu1 %vm13725_vm1, %v12795_v3  ;;  %vm13867_vm6 = vmmov %vm13725_vm1  ;;  %v5489_v63 = vld [vmem:[#allocation3 + $0x80] sm:$0xff] }
 0x404   : > { %6621 = vst.msk [vmem:[#allocation3 + $0x10] sm:$0xff] %vm13863_vm3, %v6589_v53  ;;  %v6592_v52 = vadd.f32 %v9950_v4, %v6560_v50  ;;  %v5513_v17 = vadd.f32 %v5481_v20, %v5449_v31  ;;  %vm13870_vm11 = vmmov %vm13725_vm1  ;;  %v13889_v53 = vld [vmem:[#allocation12_spill] sm:$0xff]  ;;  %v5492_v51 = vld [vmem:[#allocation3 + $0x98] sm:$0xff] }
 0x405   : > { %5546 = vst.msk [vmem:[#allocation3 + $0x48] sm:$0xff] %vm13864_vm15, %v5514_v61  ;;  %v9809_v48 = vpop.f32.mrb[42].mxu1  ;;  %vm13871_vm14 = vmmov %vm13725_vm1  ;;  %v7277_v31 = vld [vmem:[#allocation2 + $0x121] sm:$0xff] }
 0x406   : > { %v6559_v37 = vld [vmem:[#allocation3 + $0x20] sm:$0xff]  ;;  %6624 = vst.msk [vmem:[#allocation3 + $0x28] sm:$0xff] %vm13865_vm9, %v6592_v52  ;;  %v5516_v13 = vadd.f32 %v9809_v48, %v5484_v38  ;;  %v9959_v41 = vpop.f32.mrb[74].mxu0  ;;  %v5300_v6 = vpop.f32.mrb[43].mxu1  ;;  %10123 = vmatmul.mubr.msk.f32.gmra.mrb[84].mxu1 %vm13867_vm6, %v12799_v25  ;;  %vm13872_vm2 = vmmov %vm13725_vm1  ;;  %v5491_v52 = vld [vmem:[#allocation3 + $0x90] sm:$0xff] }
 0x407   : > { %v6591_v27 = vadd.f32 %v6559_v37, %v6384_v35  ;;  %5545 = vst.msk [vmem:[#allocation3 + $0x40] sm:$0xff] %vm13866_vm10, %v5513_v17  ;;  %v5451_v43 = vsel %vm11635_vm7, %v5300_v6, 0.0  ;;  %v6414_v45 = vpop.f32.mrb[75].mxu0  ;;  %10125 = vmatprep.mubr.msk.f32.mxu1 %vm13869_vm4, %v12803_v49  ;;  %vm13873_vm12 = vmmov %vm13725_vm1  ;;  %v5488_v35 = vld [vmem:[#allocation3 + $0x78] sm:$0xff]  ;;  %v7278_v6 = vld [vmem:[#allocation2 + $0x129] sm:$0xff] }
 0x408   : > { %v6562_v3 = vld [vmem:[#allocation3 + $0x38] sm:$0xff]  ;;  %5548 = vst.msk [vmem:[#allocation3 + $0x58] sm:$0xff] %vm13871_vm14, %v5516_v13  ;;  %v5515_v11 = vadd.f32 %v5483_v56, %v5451_v43  ;;  %vm13874_vm7 = vmmov %vm13725_vm1  ;;  %v13896_v56 = vld [vmem:[#allocation13_spill] sm:$0xff] }
 0x409   : > { %6623 = vst.msk [vmem:[#allocation3 + $0x20] sm:$0xff] %vm13870_vm11, %v6591_v27  ;;  %v6594_v8 = vadd.f32 %v9953_v21, %v6562_v3  ;;  %v9812_v39 = vpop.f32.mrb[44].mxu1  ;;  %vm13876_vm13 = vmmov %vm13725_vm1  ;;  %v13881_v21 = vld [vmem:[#allocation11_spill] sm:$0xff] }
 0x40a   : > { %v6561_v12 = vld [vmem:[#allocation3 + $0x30] sm:$0xff]  ;;  %5547 = vst.msk [vmem:[#allocation3 + $0x50] sm:$0xff] %vm13873_vm12, %v5515_v11  ;;  %v5518_v29 = vadd.f32 %v9812_v39, %v5486_v1  ;;  %v9962_v4 = vpop.f32.mrb[76].mxu0  ;;  %v5310_v16 = vpop.f32.mrb[45].mxu1  ;;  %10126 = vmatmul.mubr.msk.f32.gmra.mrb[86].mxu1 %vm13874_vm7, %v12807_v57  ;;  %vm13877_vm5 = vmmov %vm13725_vm1  ;;  %vm13882_vm9 = vnez %v13881_v21  ;;  %vm13890_vm12 = vnez %v13889_v53  ;;  %v5493_v1 = vld [vmem:[#allocation3 + $0xa0] sm:$0xff] }
 0x40b   : > { %6626 = vst.msk [vmem:[#allocation3 + $0x38] sm:$0xff] %vm13872_vm2, %v6594_v8  ;;  %v6593_v25 = vadd.f32 %v6561_v12, %v6394_v30  ;;  %v5453_v23 = vsel %vm11649_vm8, %v5310_v16, 0.0  ;;  %v6424_v7 = vpop.f32.mrb[77].mxu0  ;;  %10128 = vmatprep.mubr.msk.f32.mxu1 %vm13876_vm13, %v12811_v5  ;;  %vm13878_vm3 = vmmov %vm13725_vm1 }
 0x40c   : > { %v6564_v49 = vld [vmem:[#allocation3 + $0x48] sm:$0xff]  ;;  %5550 = vst.msk [vmem:[#allocation3 + $0x68] sm:$0xff] %vm13725_vm1, %v5518_v29  ;;  %v5517_v44 = vadd.f32 %v5485_v22, %v5453_v23  ;;  %vm13879_vm15 = vmmov %vm13725_vm1  ;;  %v13904_v22 = vld [vmem:[#allocation14_spill] sm:$0xff] }
 0x40d   : > { %6625 = vst.msk [vmem:[#allocation3 + $0x30] sm:$0xff] %vm13877_vm5, %v6593_v25  ;;  %v6596_v58 = vadd.f32 %v9956_v14, %v6564_v49  ;;  %v9815_v34 = vpop.f32.mrb[46].mxu1  ;;  %vm13880_vm8 = vmmov %vm13725_vm1 }
 0x40e   : > { %v6563_v0 = vld [vmem:[#allocation3 + $0x40] sm:$0xff]  ;;  %5549 = vst.msk [vmem:[#allocation3 + $0x60] sm:$0xff] %vm13879_vm15, %v5517_v44  ;;  %v5520_v42 = vadd.f32 %v9815_v34, %v5488_v35  ;;  %v9965_v36 = vpop.f32.mrb[78].mxu0  ;;  %v5320_v15 = vpop.f32.mrb[47].mxu1  ;;  %10129 = vmatmul.mubr.msk.f32.gmra.mrb[88].mxu1 %vm13880_vm8, %v12815_v40  ;;  %vm13883_vm10 = vmmov %vm13725_vm1  ;;  %vm13897_vm8 = vnez %v13896_v56 }
 0x40f   : > { %6628 = vst.msk [vmem:[#allocation3 + $0x48] sm:$0xff] %vm13878_vm3, %v6596_v58  ;;  %v6595_v57 = vadd.f32 %v6563_v0, %v6404_v28  ;;  %v6566_v5 = vld [vmem:[#allocation3 + $0x58] sm:$0xff]  ;;  %v5455_v24 = vsel %vm13882_vm9, %v5320_v15, 0.0  ;;  %v6434_v26 = vpop.f32.mrb[79].mxu0  ;;  %10131 = vmatprep.mubr.msk.f32.mxu1 %vm13883_vm10, %v12819_v54  ;;  %vm13884_vm6 = vmmov %vm13725_vm1 }
 0x410   : > { %v6598_v9 = vadd.f32 %v9959_v41, %v6566_v5  ;;  %vm13885_vm4 = vmmov %vm13725_vm1  ;;  %v5519_v30 = vadd.f32 %v5487_v62, %v5455_v24  ;;  %v5494_v41 = vld [vmem:[#allocation3 + $0xa8] sm:$0xff]  ;;  %v13910_v62 = vld [vmem:[#allocation15_spill] sm:$0xff] }
 0x411   : > { %6627 = vst.msk [vmem:[#allocation3 + $0x40] sm:$0xff] %vm13884_vm6, %v6595_v57  ;;  %v6565_v10 = vld [vmem:[#allocation3 + $0x50] sm:$0xff]  ;;  %v9818_v46 = vpop.f32.mrb[48].mxu1  ;;  %vm13886_vm11 = vmmov %vm13725_vm1 }
 0x412   : > { %5552 = vst.msk [vmem:[#allocation3 + $0x78] sm:$0xff] %vm13885_vm4, %v5520_v42  ;;  %v6597_v40 = vadd.f32 %v6565_v10, %v6414_v45  ;;  %vm13887_vm14 = vmmov %vm13725_vm1  ;;  %v5522_v18 = vadd.f32 %v9818_v46, %v5490_v33  ;;  %v9968_v19 = vpop.f32.mrb[80].mxu0  ;;  %v5330_v20 = vpop.f32.mrb[49].mxu1 }
 0x413   : > { %6630 = vst.msk [vmem:[#allocation3 + $0x58] sm:$0xff] %vm13886_vm11, %v6598_v9  ;;  %vm13888_vm2 = vmmov %vm13725_vm1  ;;  %v6568_v54 = vld [vmem:[#allocation3 + $0x68] sm:$0xff]  ;;  %v5457_v61 = vsel %vm13890_vm12, %v5330_v20, 0.0  ;;  %v6444_v14 = vpop.f32.mrb[81].mxu0 }
 0x414   : > { %5551 = vst.msk [vmem:[#allocation3 + $0x70] sm:$0xff] %vm13887_vm14, %v5519_v30  ;;  %10132 = vmatmul.mubr.msk.f32.gmra.mrb[90].mxu1 %vm13888_vm2, %v12823_v2  ;;  %vm13891_vm7 = vmmov %vm13725_vm1  ;;  %v6600_v50 = vadd.f32 %v9962_v4, %v6568_v54  ;;  %v5521_v59 = vadd.f32 %v5489_v63, %v5457_v61  ;;  %vm13905_vm2 = vnez %v13904_v22  ;;  %v5496_v4 = vld [vmem:[#allocation3 + $0xb8] sm:$0xff]  ;;  %v13915_v63 = vld [vmem:[#allocation16_spill] sm:$0xff] }
 0x415   : > { %10134 = vmatprep.mubr.msk.f32.mxu1 %vm13891_vm7, %v12827_v47  ;;  %vm13892_vm13 = vmmov %vm13725_vm1  ;;  %v6567_v28 = vld [vmem:[#allocation3 + $0x60] sm:$0xff]  ;;  %v9821_v38 = vpop.f32.mrb[50].mxu1  ;;  %v5503_v22 = vld [vmem:[#allocation3 + $0xf0] sm:$0xff] }
 0x416   : > { %6629 = vst.msk [vmem:[#allocation3 + $0x50] sm:$0xff] %vm13892_vm13, %v6597_v40  ;;  %vm13893_vm5 = vmmov %vm13725_vm1  ;;  %v6599_v2 = vadd.f32 %v6567_v28, %v6424_v7  ;;  %v5524_v17 = vadd.f32 %v9821_v38, %v5492_v51  ;;  %v9971_v37 = vpop.f32.mrb[82].mxu0  ;;  %v5340_v48 = vpop.f32.mrb[51].mxu1  ;;  %v5495_v7 = vld [vmem:[#allocation3 + $0xb0] sm:$0xff]  ;;  %v13921_v38 = vld [vmem:[#allocation17_spill] sm:$0xff] }
 0x417   : > { %5554 = vst.msk [vmem:[#allocation3 + $0x88] sm:$0xff] %vm13893_vm5, %v5522_v18  ;;  %vm13894_vm3 = vmmov %vm13725_vm1  ;;  %v5459_v27 = vsel %vm13897_vm8, %v5340_v48, 0.0  ;;  %v6454_v13 = vpop.f32.mrb[83].mxu0 }
 0x418   : > { %6632 = vst.msk [vmem:[#allocation3 + $0x68] sm:$0xff] %vm13725_vm1, %v6600_v50  ;;  %vm13895_vm15 = vmmov %vm13725_vm1  ;;  %v5523_v60 = vadd.f32 %v5491_v52, %v5459_v27  ;;  %v5501_v27 = vld [vmem:[#allocation3 + $0xe0] sm:$0xff] }
 0x419   : > { %5553 = vst.msk [vmem:[#allocation3 + $0x80] sm:$0xff] %vm13894_vm3, %v5521_v59  ;;  %10135 = vmatmul.mubr.msk.f32.gmra.mrb[92].mxu1 %vm13895_vm15, %v12831_v55  ;;  %v6570_v47 = vld [vmem:[#allocation3 + $0x78] sm:$0xff]  ;;  %vm13898_vm9 = vmmov %vm13725_vm1  ;;  %v9824_v45 = vpop.f32.mrb[52].mxu1 }
 0x41a   : > { %10137 = vmatprep.mubr.msk.f32.mxu1 %vm13898_vm9, %v7277_v31  ;;  %vm13899_vm10 = vmmov %vm13725_vm1  ;;  %v6602_v3 = vadd.f32 %v9965_v36, %v6570_v47  ;;  %v5526_v8 = vadd.f32 %v9824_v45, %v5494_v41  ;;  %v9974_v11 = vpop.f32.mrb[84].mxu0  ;;  %v5350_v12 = vpop.f32.mrb[53].mxu1  ;;  %v5498_v36 = vld [vmem:[#allocation3 + $0xc8] sm:$0xff] }
 0x41b   : > { %6631 = vst.msk [vmem:[#allocation3 + $0x60] sm:$0xff] %vm13899_vm10, %v6599_v2  ;;  %vm13900_vm6 = vmmov %vm13725_vm1  ;;  %v6569_v43 = vld [vmem:[#allocation3 + $0x70] sm:$0xff]  ;;  %v5461_v25 = vsel %vm13905_vm2, %v5350_v12, 0.0  ;;  %v6464_v29 = vpop.f32.mrb[85].mxu0  ;;  %vm13916_vm10 = vnez %v13915_v63  ;;  %vm13922_vm2 = vnez %v13921_v38 }
 0x41c   : > { %5556 = vst.msk [vmem:[#allocation3 + $0x98] sm:$0xff] %vm13900_vm6, %v5524_v17  ;;  %vm13901_vm4 = vmmov %vm13725_vm1  ;;  %v6601_v55 = vadd.f32 %v6569_v43, %v6434_v26  ;;  %v5525_v49 = vadd.f32 %v5493_v1, %v5461_v25  ;;  %v5497_v26 = vld [vmem:[#allocation3 + $0xc0] sm:$0xff]  ;;  %v5502_v17 = vld [vmem:[#allocation3 + $0xe8] sm:$0xff] }
 0x41d   : > { %6634 = vst.msk [vmem:[#allocation3 + $0x78] sm:$0xff] %vm13901_vm4, %v6602_v3  ;;  %vm13902_vm11 = vmmov %vm13725_vm1  ;;  %v9827_v23 = vpop.f32.mrb[54].mxu1  ;;  %v13927_v43 = vld [vmem:[#allocation18_spill] sm:$0xff] }
 0x41e   : > { %5555 = vst.msk [vmem:[#allocation3 + $0x90] sm:$0xff] %vm13902_vm11, %v5523_v60  ;;  %vm13903_vm14 = vmmov %vm13725_vm1  ;;  %v6572_v39 = vld [vmem:[#allocation3 + $0x88] sm:$0xff]  ;;  %v5528_v58 = vadd.f32 %v9827_v23, %v5496_v4  ;;  %v9977_v44 = vpop.f32.mrb[86].mxu0  ;;  %v5360_v0 = vpop.f32.mrb[55].mxu1 }
 0x41f   : > { %10138 = vmatmul.mubr.msk.f32.gmra.mrb[94].mxu1 %vm13903_vm14, %v7278_v6  ;;  %vm13906_vm12 = vmmov %vm13725_vm1  ;;  %v6604_v16 = vadd.f32 %v9968_v19, %v6572_v39  ;;  %v6474_v42 = vpop.f32.mrb[87].mxu0  ;;  %v5500_v19 = vld [vmem:[#allocation3 + $0xd8] sm:$0xff] }
 0x420   : > { %6633 = vst.msk [vmem:[#allocation3 + $0x70] sm:$0xff] %vm13906_vm12, %v6601_v55  ;;  %vm13907_vm7 = vmmov %vm13725_vm1  ;;  %v6571_v32 = vld [vmem:[#allocation3 + $0x80] sm:$0xff]  ;;  %v5504_v55 = vld [vmem:[#allocation3 + $0xf8] sm:$0xff] }
 0x421   : > { %5558 = vst.msk [vmem:[#allocation3 + $0xa8] sm:$0xff] %vm13907_vm7, %v5526_v8  ;;  %vm13908_vm13 = vmmov %vm13725_vm1  ;;  %v6603_v35 = vadd.f32 %v6571_v32, %v6444_v14  ;;  %v9830_v24 = vpop.f32.mrb[56].mxu1  ;;  %v5499_v14 = vld [vmem:[#allocation3 + $0xd0] sm:$0xff]  ;;  %v13932_v32 = vld [vmem:[#allocation19_spill] sm:$0xff] }
 0x422   : > { %6636 = vst.msk [vmem:[#allocation3 + $0x88] sm:$0xff] %vm13908_vm13, %v6604_v16  ;;  %vm13909_vm5 = vmmov %vm13725_vm1  ;;  %vm13911_vm1 = vnez %v13910_v62  ;;  %v5530_v9 = vadd.f32 %v9830_v24, %v5498_v36  ;;  %v9980_v30 = vpop.f32.mrb[88].mxu0  ;;  %v5370_v10 = vpop.f32.mrb[57].mxu1 }
 0x423   : > { %5557 = vst.msk [vmem:[#allocation3 + $0xa0] sm:$0xff] %vm13909_vm5, %v5525_v49  ;;  %v6574_v34 = vld [vmem:[#allocation3 + $0x98] sm:$0xff]  ;;  %v5463_v57 = vsel %vm13911_vm1, %v5360_v0, 0.0  ;;  %vm13912_vm15 = vmmov %vm13894_vm3  ;;  %v5465_v40 = vsel %vm13916_vm10, %v5370_v10, 0.0  ;;  %v6484_v18 = vpop.f32.mrb[89].mxu0  ;;  %vm13928_vm1 = vnez %v13927_v43  ;;  %vm13933_vm10 = vnez %v13932_v32  ;;  %v7669_v10 = vld [vmem:[#allocation3] sm:$0xff] }
 0x424   : > { %6635 = vst.msk [vmem:[#allocation3 + $0x80] sm:$0xff] %vm13894_vm3, %v6603_v35  ;;  %v6606_v15 = vadd.f32 %v9971_v37, %v6574_v34  ;;  %v5527_v5 = vadd.f32 %v5495_v7, %v5463_v57  ;;  %vm13913_vm8 = vmmov %vm13894_vm3  ;;  %v5529_v54 = vadd.f32 %v5497_v26, %v5465_v40  ;;  %v13943_v26 = vld [vmem:[#allocation20_spill] sm:$0xff] }
 0x425   : > { %5560 = vst.msk [vmem:[#allocation3 + $0xb8] sm:$0xff] %vm13912_vm15, %v5528_v58  ;;  %v6573_v21 = vld [vmem:[#allocation3 + $0x90] sm:$0xff]  ;;  %vm13914_vm9 = vmmov %vm13894_vm3  ;;  %v9833_v61 = vpop.f32.mrb[58].mxu1 }
 0x426   : > { %6638 = vst.msk [vmem:[#allocation3 + $0x98] sm:$0xff] %vm13913_vm8, %v6606_v15  ;;  %v6605_v33 = vadd.f32 %v6573_v21, %v6454_v13  ;;  %vm13917_vm6 = vmmov %vm13894_vm3  ;;  %v5532_v50 = vadd.f32 %v9833_v61, %v5500_v19  ;;  %v9983_v59 = vpop.f32.mrb[90].mxu0  ;;  %v5380_v31 = vpop.f32.mrb[59].mxu1 }
 0x427   : > { %5559 = vst.msk [vmem:[#allocation3 + $0xb0] sm:$0xff] %vm13914_vm9, %v5527_v5  ;;  %vm13918_vm4 = vmmov %vm13894_vm3  ;;  %v5467_v52 = vsel %vm13922_vm2, %v5380_v31, 0.0  ;;  %v6494_v2 = vpop.f32.mrb[91].mxu0 }
 0x428   : > { %v6576_v46 = vld [vmem:[#allocation3 + $0xa8] sm:$0xff]  ;;  %6637 = vst.msk [vmem:[#allocation3 + $0x90] sm:$0xff] %vm13917_vm6, %v6605_v33  ;;  %vm13919_vm11 = vmmov %vm13894_vm3  ;;  %v5531_v48 = vadd.f32 %v5499_v14, %v5467_v52  ;;  %v7673_v52 = vld [vmem:[#allocation3 + $0x20] sm:$0xff] }
 0x429   : > { %v6608_v20 = vadd.f32 %v9974_v11, %v6576_v46  ;;  %5562 = vst.msk [vmem:[#allocation3 + $0xc8] sm:$0xff] %vm13918_vm4, %v5530_v9  ;;  %vm13920_vm14 = vmmov %vm13894_vm3  ;;  %v9836_v56 = vpop.f32.mrb[60].mxu1  ;;  %v7670_v9 = vld [vmem:[#allocation3 + $0x8] sm:$0xff] }
 0x42a   : > { %v6575_v53 = vld [vmem:[#allocation3 + $0xa0] sm:$0xff]  ;;  %5561 = vst.msk [vmem:[#allocation3 + $0xc0] sm:$0xff] %vm13920_vm14, %v5529_v54  ;;  %vm13923_vm12 = vmmov %vm13894_vm3  ;;  %v5534_v41 = vadd.f32 %v9836_v56, %v5502_v17  ;;  %v9986_v6 = vpop.f32.mrb[92].mxu0  ;;  %v5390_v3 = vpop.f32.mrb[61].mxu1 }
 0x42b   : > { %6640 = vst.msk [vmem:[#allocation3 + $0xa8] sm:$0xff] %vm13919_vm11, %v6608_v20  ;;  %v6607_v51 = vadd.f32 %v6575_v53, %v6464_v29  ;;  %vm13924_vm7 = vmmov %vm13894_vm3  ;;  %v5469_v45 = vsel %vm13928_vm1, %v5390_v3, 0.0  ;;  %v6504_v1 = vpop.f32.mrb[93].mxu0  ;;  %vm13944_vm1 = vnez %v13943_v26  ;;  %v7672_v20 = vld [vmem:[#allocation3 + $0x18] sm:$0xff]  ;;  %v7671_v53 = vld [vmem:[#allocation3 + $0x10] sm:$0xff] }
 0x42c   : > { %v6578_v28 = vld [vmem:[#allocation3 + $0xb8] sm:$0xff]  ;;  %5564 = vst.msk [vmem:[#allocation3 + $0xd8] sm:$0xff] %vm13924_vm7, %v5532_v50  ;;  %vm13925_vm13 = vmmov %vm13894_vm3  ;;  %v5533_v11 = vadd.f32 %v5501_v27, %v5469_v45  ;;  %v13068_v50 = vld [vmem:[%s13268_s4] ss:$0 sm:$0xff] }
 0x42d   : > { %6639 = vst.msk [vmem:[#allocation3 + $0xa0] sm:$0xff] %vm13923_vm12, %v6607_v51  ;;  %v6610_v37 = vadd.f32 %v9977_v44, %v6578_v28  ;;  %vm13926_vm5 = vmmov %vm13894_vm3  ;;  %v9839_v39 = vpop.f32.mrb[62].mxu1  ;;  %v7674_v28 = vld [vmem:[#allocation3 + $0x28] sm:$0xff]  ;;  %v7675_v45 = vld [vmem:[#allocation3 + $0x30] sm:$0xff] }
 0x42e   : > { %v6577_v47 = vld [vmem:[#allocation3 + $0xb0] sm:$0xff]  ;;  %5563 = vst.msk [vmem:[#allocation3 + $0xd0] sm:$0xff] %vm13926_vm5, %v5531_v48  ;;  %vm13929_vm15 = vmmov %vm13894_vm3  ;;  %v5536_v29 = vadd.f32 %v9839_v39, %v5504_v55  ;;  %v9989_v4 = vpop.f32.mrb[94].mxu0  ;;  %v5400_v16 = vpop.f32.mrb[63].mxu1 }
 0x42f   : > { %6642 = vst.msk [vmem:[#allocation3 + $0xb8] sm:$0xff] %vm13925_vm13, %v6610_v37  ;;  %v6609_v13 = vadd.f32 %v6577_v47, %v6474_v42  ;;  %vm13930_vm8 = vmmov %vm13894_vm3  ;;  %v5471_v23 = vsel %vm13933_vm10, %v5400_v16, 0.0  ;;  %v6514_v7 = vpop.f32.mrb[95].mxu0  ;;  %v4392_v47 = vld [vmem:[%s10610_s10 + $0x20] sm:$0xff] }
 0x430   : > { %v6580_v60 = vld [vmem:[#allocation3 + $0xc8] sm:$0xff]  ;;  %5566 = vst.msk [vmem:[#allocation3 + $0xe8] sm:$0xff] %vm13929_vm15, %v5534_v41  ;;  %vm13931_vm9 = vmmov %vm13894_vm3  ;;  %v5535_v58 = vadd.f32 %v5503_v22, %v5471_v23  ;;  %v4394_v22 = vld [vmem:[%s10610_s10 + $0x30] sm:$0xff] }
 0x431   : > { %6641 = vst.msk [vmem:[#allocation3 + $0xb0] sm:$0xff] %vm13894_vm3, %v6609_v13  ;;  %v6612_v8 = vadd.f32 %v9980_v30, %v6580_v60  ;;  %v6579_v12 = vld [vmem:[#allocation3 + $0xc0] sm:$0xff]  ;;  %vm13934_vm6 = vmmov %vm13894_vm3  ;;  %v7676_v60 = vld [vmem:[#allocation3 + $0x38] sm:$0xff] }
 0x432   : > { %v6611_v25 = vadd.f32 %v6579_v12, %v6484_v18  ;;  %5565 = vst.msk [vmem:[#allocation3 + $0xe0] sm:$0xff] %vm13931_vm9, %v5533_v11  ;;  %vm13935_vm4 = vmmov %vm13894_vm3  ;;  %v13947_v18 = vld [vmem:[#allocation21_spill] sm:$0xff]  ;;  %v13958_v23 = vld [vmem:[#allocation24_spill] sm:$0xff] }
 0x433   : > { %6644 = vst.msk [vmem:[#allocation3 + $0xc8] sm:$0xff] %vm13930_vm8, %v6612_v8  ;;  %v6582_v49 = vld [vmem:[#allocation3 + $0xd8] sm:$0xff]  ;;  %vm13936_vm11 = vmmov %vm13894_vm3  ;;  %vm13948_vm8 = vnez %v13947_v18 }
 0x434   : > { %6643 = vst.msk [vmem:[#allocation3 + $0xc0] sm:$0xff] %vm13934_vm6, %v6611_v25  ;;  %v6614_v35 = vadd.f32 %v9983_v59, %v6582_v49  ;;  %vm13937_vm14 = vmmov %vm13894_vm3  ;;  %v13951_v59 = vld [vmem:[#allocation22_spill] sm:$0xff]  ;;  %v4395_v8 = vld [vmem:[%s10610_s10 + $0x38] sm:$0xff] }
 0x435   : > { %5568 = vst.msk [vmem:[#allocation3 + $0xf8] sm:$0xff] %vm13935_vm4, %v5536_v29  ;;  %v6581_v44 = vld [vmem:[#allocation3 + $0xd0] sm:$0xff]  ;;  %vm13938_vm2 = vmmov %vm13894_vm3  ;;  %vm13952_vm6 = vnez %v13951_v59 }
 0x436   : > { %6646 = vst.msk [vmem:[#allocation3 + $0xd8] sm:$0xff] %vm13936_vm11, %v6614_v35  ;;  %v6613_v0 = vadd.f32 %v6581_v44, %v6494_v2  ;;  %vm13939_vm12 = vmmov %vm13938_vm2  ;;  %v4393_v2 = vld [vmem:[%s10610_s10 + $0x28] sm:$0xff]  ;;  %v7677_v44 = vld [vmem:[#allocation3 + $0x40] sm:$0xff] }
 0x437   : > { %5567 = vst.msk [vmem:[#allocation3 + $0xf0] sm:$0xff] %vm13937_vm14, %v5535_v58  ;;  %v6584_v34 = vld [vmem:[#allocation3 + $0xe8] sm:$0xff]  ;;  %vm13940_vm7 = vmmov %vm13938_vm2 }
 0x438   : > { %6645 = vst.msk [vmem:[#allocation3 + $0xd0] sm:$0xff] %vm13938_vm2, %v6613_v0  ;;  %v6616_v62 = vadd.f32 %v9986_v6, %v6584_v34  ;;  %vm13941_vm13 = vmmov %vm13938_vm2  ;;  %v13955_v6 = vld [vmem:[#allocation23_spill] sm:$0xff]  ;;  %v7678_v35 = vld [vmem:[#allocation3 + $0x48] sm:$0xff] }
 0x439   : > { %v6583_v57 = vld [vmem:[#allocation3 + $0xe0] sm:$0xff]  ;;  %vm13942_vm5 = vmmov %vm13938_vm2  ;;  %vm13956_vm14 = vnez %v13955_v6 }
 0x43a   : > { %6648 = vst.msk [vmem:[#allocation3 + $0xe8] sm:$0xff] %vm13939_vm12, %v6616_v62  ;;  %v6615_v42 = vadd.f32 %v6583_v57, %v6504_v1  ;;  %vm13945_vm3 = vmmov %vm13938_vm2  ;;  %v4397_v62 = vld [vmem:[%s10610_s10 + $0x48] sm:$0xff] }
 0x43b   : > { %vm13946_vm15 = vmmov %vm13938_vm2 }
 0x43c   : > { %v6586_v36 = vld [vmem:[#allocation3 + $0xf8] sm:$0xff]  ;;  %6647 = vst.msk [vmem:[#allocation3 + $0xe0] sm:$0xff] %vm13940_vm7, %v6615_v42  ;;  %vm13949_vm9 = vmmov %vm13938_vm2  ;;  %vm13959_vm7 = vnez %v13958_v23 }
 0x43d   : > { %v6618_v15 = vadd.f32 %v9989_v4, %v6586_v36  ;;  %vm13950_vm10 = vmmov %vm13938_vm2 }
 0x43e   : > { %v6585_v5 = vld [vmem:[#allocation3 + $0xf0] sm:$0xff]  ;;  %vm13953_vm4 = vmmov %vm13938_vm2 }
 0x43f   : > { %6650 = vst.msk [vmem:[#allocation3 + $0xf8] sm:$0xff] %vm13941_vm13, %v6618_v15  ;;  %v6617_v21 = vadd.f32 %v6585_v5, %v6514_v7  ;;  %vm13954_vm11 = vmmov %vm13938_vm2  ;;  %v4396_v15 = vld [vmem:[%s10610_s10 + $0x40] sm:$0xff] }
 0x440   : > { %vm13957_vm12 = vmmov %vm13938_vm2 }
 0x441   : > { %6649 = vst.msk [vmem:[#allocation3 + $0xf0] sm:$0xff] %vm13942_vm5, %v6617_v21  ;;  %vm13960_vm13 = vmmov %vm13938_vm2 }
 0x442   : > { %vm13961_vm5 = vmmov %vm13938_vm2 }
 0x4b1   : > { %v10094_v24 = vpop.f32.mrb[64].mxu1 }
 0x4b2   : > { %v7638_v33 = vsel %vm13944_vm1, %v10094_v24, 0.0  ;;  %v7446_v30 = vpop.f32.mrb[65].mxu1  ;;  %vm13962_vm1 = vmmov %vm13938_vm2 }
 0x4b3   : > { %v7702_v46 = vadd.f32 %v7670_v9, %v7638_v33  ;;  %v7701_v63 = vadd.f32 %v7669_v10, %v7446_v30  ;;  %v13964_v30 = vld [vmem:[#allocation25_spill] sm:$0xff] }
 0x4b5   : > { %7734 = vst.msk [vmem:[#allocation3 + $0x8] sm:$0xff] %vm13945_vm3, %v7702_v46  ;;  %v10097_v40 = vpop.f32.mrb[66].mxu1  ;;  %vm13963_vm3 = vmmov %vm13962_vm1  ;;  %v7680_v46 = vld [vmem:[#allocation3 + $0x58] sm:$0xff] }
 0x4b6   : > { %7733 = vst.msk [vmem:[#allocation3] sm:$0xff] %vm13946_vm15, %v7701_v63  ;;  %v7640_v19 = vsel %vm13948_vm8, %v10097_v40, 0.0  ;;  %v7456_v54 = vpop.f32.mrb[67].mxu1  ;;  %vm13965_vm15 = vnez %v13964_v30  ;;  %v7679_v40 = vld [vmem:[#allocation3 + $0x50] sm:$0xff]  ;;  %vm13966_vm8 = vmmov %vm13962_vm1 }
 0x4b7   : > { %v7704_v61 = vadd.f32 %v7672_v20, %v7640_v19  ;;  %v7703_v14 = vadd.f32 %v7671_v53, %v7456_v54  ;;  %v4399_v20 = vld [vmem:[%s10610_s10 + $0x58] sm:$0xff] }
 0x4b9   : > { %7736 = vst.msk [vmem:[#allocation3 + $0x18] sm:$0xff] %vm13949_vm9, %v7704_v61  ;;  %v10100_v51 = vpop.f32.mrb[68].mxu1  ;;  %vm13967_vm9 = vmmov %vm13962_vm1 }
 0x4ba   : > { %7735 = vst.msk [vmem:[#allocation3 + $0x10] sm:$0xff] %vm13950_vm10, %v7703_v14  ;;  %v7642_v31 = vsel %vm13952_vm6, %v10100_v51, 0.0  ;;  %v7466_v38 = vpop.f32.mrb[69].mxu1  ;;  %v4398_v14 = vld [vmem:[%s10610_s10 + $0x50] sm:$0xff]  ;;  %vm13968_vm10 = vmmov %vm13962_vm1 }
 0x4bb   : > { %v7706_v17 = vadd.f32 %v7674_v28, %v7642_v31  ;;  %v7705_v37 = vadd.f32 %v7673_v52, %v7466_v38  ;;  %vm13969_vm6 = vmmov %vm13962_vm1 }
 0x4bc   : > { %v7766_v48 = vld [vmem:[#allocation3 + $0x8] sm:$0xff] }
 0x4bd   : > { %v7765_v56 = vld [vmem:[#allocation3] sm:$0xff]  ;;  %v7805_v27 = vadd.f32 %v13068_v50, %v7766_v48  ;;  %7738 = vst.msk [vmem:[#allocation3 + $0x28] sm:$0xff] %vm13953_vm4, %v7706_v17  ;;  %v10103_v41 = vpop.f32.mrb[70].mxu1 }
 0x4be   : > { %v7804_v13 = vadd.f32 %v13068_v50, %v7765_v56  ;;  %7737 = vst.msk [vmem:[#allocation3 + $0x20] sm:$0xff] %vm13954_vm11, %v7705_v37  ;;  %v7644_v3 = vsel %vm13956_vm14, %v10103_v41, 0.0  ;;  %v7476_v43 = vpop.f32.mrb[71].mxu1  ;;  %v7682_v37 = vld [vmem:[#allocation3 + $0x68] sm:$0xff]  ;;  %vm13972_vm11 = vmmov %vm13962_vm1 }
 0x4bf   : > { %v7837_v1 = vadd.f32 %v7805_v27, %v4393_v2  ;;  %v7708_v11 = vadd.f32 %v7676_v60, %v7644_v3  ;;  %v7707_v12 = vadd.f32 %v7675_v45, %v7476_v43  ;;  %v13970_v2 = vld [vmem:[#allocation26_spill] sm:$0xff]  ;;  %vm13973_vm14 = vmmov %vm13962_vm1  ;;  %v4400_v60 = vld [vmem:[%s10610_s10 + $0x60] sm:$0xff] }
 0x4c0   : > { %v7836_v55 = vadd.f32 %v7804_v13, %v4392_v47  ;;  %v7768_v39 = vld [vmem:[#allocation3 + $0x18] sm:$0xff]  ;;  %vm13971_vm4 = vnez %v13970_v2  ;;  %v7681_v47 = vld [vmem:[#allocation3 + $0x60] sm:$0xff]  ;;  %v4401_v13 = vld [vmem:[%s10610_s10 + $0x68] sm:$0xff] }
 0x4c1   : > { %v7767_v25 = vld [vmem:[#allocation3 + $0x10] sm:$0xff]  ;;  %v7869_v29 = vmax.f32 %v7837_v1, 0.0  ;;  %v7807_v16 = vadd.f32 %v13068_v50, %v7768_v39  ;;  %7740 = vst.msk [vmem:[#allocation3 + $0x38] sm:$0xff] %vm13938_vm2, %v7708_v11  ;;  %v10106_v32 = vpop.f32.mrb[72].mxu1  ;;  %vm13974_vm2 = vmmov %vm13962_vm1 }
 0x4c2   : > { %v7868_v4 = vmax.f32 %v7836_v55, 0.0  ;;  %v7806_v49 = vadd.f32 %v13068_v50, %v7767_v25  ;;  %7739 = vst.msk [vmem:[#allocation3 + $0x30] sm:$0xff] %vm13957_vm12, %v7707_v12  ;;  %v7646_v7 = vsel %vm13959_vm7, %v10106_v32, 0.0  ;;  %v7486_v58 = vpop.f32.mrb[73].mxu1  ;;  %vm13975_vm12 = vmmov %vm13962_vm1 }
 0x4c3   : > { %7901 = vst.msk [vmem:[%s13086_s30 + $0x8] sm:$0xff] %vm13960_vm13, %v7869_v29  ;;  %v7839_v0 = vadd.f32 %v7807_v16, %v4395_v8  ;;  %v7710_v57 = vadd.f32 %v7678_v35, %v7646_v7  ;;  %v7709_v42 = vadd.f32 %v7677_v44, %v7486_v58  ;;  %v7683_v29 = vld [vmem:[#allocation3 + $0x70] sm:$0xff]  ;;  %vm13977_vm7 = vmmov %vm13962_vm1 }
 0x4c4   : > { %7900 = vst.msk [vmem:[%s13086_s30] sm:$0xff] %vm13961_vm5, %v7868_v4  ;;  %v7838_v34 = vadd.f32 %v7806_v49, %v4394_v22  ;;  %v7770_v36 = vld [vmem:[#allocation3 + $0x28] sm:$0xff]  ;;  %v7684_v22 = vld [vmem:[#allocation3 + $0x78] sm:$0xff]  ;;  %vm13978_vm13 = vmmov %vm13962_vm1 }
 0x4c5   : > { %v7769_v5 = vld [vmem:[#allocation3 + $0x20] sm:$0xff]  ;;  %v7871_v21 = vmax.f32 %v7839_v0, 0.0  ;;  %v7809_v26 = vadd.f32 %v13068_v50, %v7770_v36  ;;  %7742 = vst.msk [vmem:[#allocation3 + $0x48] sm:$0xff] %vm13962_vm1, %v7710_v57  ;;  %v10109_v9 = vpop.f32.mrb[74].mxu1  ;;  %v4403_v49 = vld [vmem:[%s10610_s10 + $0x78] sm:$0xff]  ;;  %v4402_v35 = vld [vmem:[%s10610_s10 + $0x70] sm:$0xff] }
 0x4c6   : > { %v7870_v24 = vmax.f32 %v7838_v34, 0.0  ;;  %v7808_v33 = vadd.f32 %v13068_v50, %v7769_v5  ;;  %7741 = vst.msk [vmem:[#allocation3 + $0x40] sm:$0xff] %vm13963_vm3, %v7709_v42  ;;  %v7648_v10 = vsel %vm13965_vm15, %v10109_v9, 0.0  ;;  %v7496_v63 = vpop.f32.mrb[75].mxu1  ;;  %v13981_v42 = vld [vmem:[#allocation28_spill] sm:$0xff] }
 0x4c7   : > { %7903 = vst.msk [vmem:[%s13086_s30 + $0x18] sm:$0xff] %vm13966_vm8, %v7871_v21  ;;  %v7841_v18 = vadd.f32 %v7809_v26, %v4397_v62  ;;  %v7712_v54 = vadd.f32 %v7680_v46, %v7648_v10  ;;  %v7711_v53 = vadd.f32 %v7679_v40, %v7496_v63  ;;  %v7685_v21 = vld [vmem:[#allocation3 + $0x80] sm:$0xff] }
 0x4c8   : > { %7902 = vst.msk [vmem:[%s13086_s30 + $0x10] sm:$0xff] %vm13967_vm9, %v7870_v24  ;;  %v7840_v19 = vadd.f32 %v7808_v33, %v4396_v15  ;;  %v7772_v61 = vld [vmem:[#allocation3 + $0x38] sm:$0xff]  ;;  %v7686_v15 = vld [vmem:[#allocation3 + $0x88] sm:$0xff]  ;;  %v4404_v46 = vld [vmem:[%s10610_s10 + $0x80] sm:$0xff] }
 0x4c9   : > { %v7771_v51 = vld [vmem:[#allocation3 + $0x30] sm:$0xff]  ;;  %v7873_v59 = vmax.f32 %v7841_v18, 0.0  ;;  %v7811_v28 = vadd.f32 %v13068_v50, %v7772_v61  ;;  %7744 = vst.msk [vmem:[#allocation3 + $0x58] sm:$0xff] %vm13968_vm10, %v7712_v54  ;;  %v10112_v52 = vpop.f32.mrb[76].mxu1  ;;  %v4405_v33 = vld [vmem:[%s10610_s10 + $0x88] sm:$0xff] }
 0x4ca   : > { %v7872_v31 = vmax.f32 %v7840_v19, 0.0  ;;  %v7810_v38 = vadd.f32 %v13068_v50, %v7771_v51  ;;  %7743 = vst.msk [vmem:[#allocation3 + $0x50] sm:$0xff] %vm13969_vm6, %v7711_v53  ;;  %v7650_v17 = vsel %vm13971_vm4, %v10112_v52, 0.0  ;;  %v7506_v48 = vpop.f32.mrb[77].mxu1  ;;  %v13987_v53 = vld [vmem:[#allocation29_spill] sm:$0xff] }
 0x4cb   : > { %7905 = vst.msk [vmem:[%s13086_s30 + $0x28] sm:$0xff] %vm13972_vm11, %v7873_v59  ;;  %v7843_v56 = vadd.f32 %v7811_v28, %v4399_v20  ;;  %v7714_v41 = vadd.f32 %v7682_v37, %v7650_v17  ;;  %v7713_v6 = vadd.f32 %v7681_v47, %v7506_v48  ;;  %vm13988_vm10 = vnez %v13987_v53  ;;  %v7687_v59 = vld [vmem:[#allocation3 + $0x90] sm:$0xff] }
 0x4cc   : > { %7904 = vst.msk [vmem:[%s13086_s30 + $0x20] sm:$0xff] %vm13973_vm14, %v7872_v31  ;;  %v7842_v27 = vadd.f32 %v7810_v38, %v4398_v14  ;;  %v7774_v3 = vld [vmem:[#allocation3 + $0x48] sm:$0xff]  ;;  %v7688_v14 = vld [vmem:[#allocation3 + $0x98] sm:$0xff]  ;;  %v4406_v37 = vld [vmem:[%s10610_s10 + $0x90] sm:$0xff] }
 0x4cd   : > { %v7773_v43 = vld [vmem:[#allocation3 + $0x40] sm:$0xff]  ;;  %v7875_v45 = vmax.f32 %v7843_v56, 0.0  ;;  %v7813_v55 = vadd.f32 %v13068_v50, %v7774_v3  ;;  %7746 = vst.msk [vmem:[#allocation3 + $0x68] sm:$0xff] %vm13974_vm2, %v7714_v41  ;;  %v10115_v11 = vpop.f32.mrb[78].mxu1  ;;  %v4407_v38 = vld [vmem:[%s10610_s10 + $0x98] sm:$0xff] }
 0x4ce   : > { %v7874_v1 = vmax.f32 %v7842_v27, 0.0  ;;  %v7812_v8 = vadd.f32 %v13068_v50, %v7773_v43  ;;  %7745 = vst.msk [vmem:[#allocation3 + $0x60] sm:$0xff] %vm13975_vm12, %v7713_v6  ;;  %v7652_v39 = vsel %vm11930_vm0, %v10115_v11, 0.0  ;;  %v7516_v25 = vpop.f32.mrb[79].mxu1  ;;  %vm13979_vm0 = vmmov %vm13962_vm1  ;;  %vm13982_vm1 = vnez %v13981_v42  ;;  %v13993_v6 = vld [vmem:[#allocation30_spill] sm:$0xff] }
 0x4cf   : > { %7907 = vst.msk [vmem:[%s13086_s30 + $0x38] sm:$0xff] %vm13977_vm7, %v7875_v45  ;;  %v7845_v4 = vadd.f32 %v7813_v55, %v4401_v13  ;;  %v7716_v32 = vadd.f32 %v7684_v22, %v7652_v39  ;;  %v7715_v23 = vadd.f32 %v7683_v29, %v7516_v25  ;;  %vm13980_vm5 = vmmov %vm13979_vm0  ;;  %vm13994_vm2 = vnez %v13993_v6  ;;  %v7689_v45 = vld [vmem:[#allocation3 + $0xa0] sm:$0xff] }
 0x4d0   : > { %7906 = vst.msk [vmem:[%s13086_s30 + $0x30] sm:$0xff] %vm13978_vm13, %v7874_v1  ;;  %v7844_v16 = vadd.f32 %v7812_v8, %v4400_v60  ;;  %v7776_v7 = vld [vmem:[#allocation3 + $0x58] sm:$0xff]  ;;  %vm13983_vm3 = vmmov %vm13979_vm0  ;;  %v7690_v60 = vld [vmem:[#allocation3 + $0xa8] sm:$0xff] }
 0x4d1   : > { %v7775_v58 = vld [vmem:[#allocation3 + $0x50] sm:$0xff]  ;;  %v7877_v44 = vmax.f32 %v7845_v4, 0.0  ;;  %v7815_v34 = vadd.f32 %v13068_v50, %v7776_v7  ;;  %7748 = vst.msk [vmem:[#allocation3 + $0x78] sm:$0xff] %vm13979_vm0, %v7716_v32  ;;  %v10118_v57 = vpop.f32.mrb[80].mxu1  ;;  %vm13984_vm15 = vmmov %vm13979_vm0  ;;  %v4409_v8 = vld [vmem:[%s10610_s10 + $0xa8] sm:$0xff] }
 0x4d2   : > { %v7876_v0 = vmax.f32 %v7844_v16, 0.0  ;;  %v7814_v62 = vadd.f32 %v13068_v50, %v7775_v58  ;;  %7747 = vst.msk [vmem:[#allocation3 + $0x70] sm:$0xff] %vm13980_vm5, %v7715_v23  ;;  %v7654_v36 = vsel %vm13982_vm1, %v10118_v57, 0.0  ;;  %v7526_v5 = vpop.f32.mrb[81].mxu1  ;;  %vm13985_vm8 = vmmov %vm13979_vm0  ;;  %v4408_v22 = vld [vmem:[%s10610_s10 + $0xa0] sm:$0xff]  ;;  %v13998_v23 = vld [vmem:[#allocation31_spill] sm:$0xff] }
 0x4d3   : > { %7909 = vst.msk [vmem:[%s13086_s30 + $0x48] sm:$0xff] %vm13983_vm3, %v7877_v44  ;;  %v7847_v24 = vadd.f32 %v7815_v34, %v4403_v49  ;;  %v7718_v9 = vadd.f32 %v7686_v15, %v7654_v36  ;;  %v7717_v30 = vadd.f32 %v7685_v21, %v7526_v5  ;;  %vm13986_vm9 = vmmov %vm13979_vm0  ;;  %vm13999_vm5 = vnez %v13998_v23  ;;  %v7691_v44 = vld [vmem:[#allocation3 + $0xb0] sm:$0xff] }
 0x4d4   : > { %7908 = vst.msk [vmem:[%s13086_s30 + $0x40] sm:$0xff] %vm13984_vm15, %v7876_v0  ;;  %v7846_v26 = vadd.f32 %v7814_v62, %v4402_v35  ;;  %v7778_v10 = vld [vmem:[#allocation3 + $0x68] sm:$0xff]  ;;  %vm13989_vm6 = vmmov %vm13979_vm0  ;;  %v7692_v35 = vld [vmem:[#allocation3 + $0xb8] sm:$0xff] }
 0x4d5   : > { %v7777_v63 = vld [vmem:[#allocation3 + $0x60] sm:$0xff]  ;;  %v7879_v40 = vmax.f32 %v7847_v24, 0.0  ;;  %v7817_v19 = vadd.f32 %v13068_v50, %v7778_v10  ;;  %7750 = vst.msk [vmem:[#allocation3 + $0x88] sm:$0xff] %vm13985_vm8, %v7718_v9  ;;  %v10121_v54 = vpop.f32.mrb[82].mxu1  ;;  %vm13990_vm4 = vmmov %vm13979_vm0  ;;  %v4411_v62 = vld [vmem:[%s10610_s10 + $0xb8] sm:$0xff] }
 0x4d6   : > { %v7878_v18 = vmax.f32 %v7846_v26, 0.0  ;;  %v7816_v20 = vadd.f32 %v13068_v50, %v7777_v63  ;;  %7749 = vst.msk [vmem:[#allocation3 + $0x80] sm:$0xff] %vm13986_vm9, %v7717_v30  ;;  %v7656_v61 = vsel %vm13988_vm10, %v10121_v54, 0.0  ;;  %v7536_v51 = vpop.f32.mrb[83].mxu1  ;;  %vm13991_vm11 = vmmov %vm13979_vm0  ;;  %v4410_v15 = vld [vmem:[%s10610_s10 + $0xb0] sm:$0xff]  ;;  %v14004_v30 = vld [vmem:[#allocation32_spill] sm:$0xff] }
 0x4d7   : > { %7911 = vst.msk [vmem:[%s13086_s30 + $0x58] sm:$0xff] %vm13989_vm6, %v7879_v40  ;;  %v7849_v31 = vadd.f32 %v7817_v19, %v4405_v33  ;;  %v7720_v52 = vadd.f32 %v7688_v14, %v7656_v61  ;;  %v7719_v2 = vadd.f32 %v7687_v59, %v7536_v51  ;;  %vm13992_vm14 = vmmov %vm13979_vm0  ;;  %vm14005_vm9 = vnez %v14004_v30  ;;  %v7693_v40 = vld [vmem:[#allocation3 + $0xc0] sm:$0xff] }
 0x4d8   : > { %7910 = vst.msk [vmem:[%s13086_s30 + $0x50] sm:$0xff] %vm13990_vm4, %v7878_v18  ;;  %v7848_v28 = vadd.f32 %v7816_v20, %v4404_v46  ;;  %v7780_v17 = vld [vmem:[#allocation3 + $0x78] sm:$0xff]  ;;  %vm13995_vm12 = vmmov %vm13979_vm0  ;;  %v7694_v46 = vld [vmem:[#allocation3 + $0xc8] sm:$0xff] }
 0x4d9   : > { %v7779_v48 = vld [vmem:[#allocation3 + $0x70] sm:$0xff]  ;;  %v7881_v47 = vmax.f32 %v7849_v31, 0.0  ;;  %v7819_v27 = vadd.f32 %v13068_v50, %v7780_v17  ;;  %7752 = vst.msk [vmem:[#allocation3 + $0x98] sm:$0xff] %vm13991_vm11, %v7720_v52  ;;  %v10124_v41 = vpop.f32.mrb[84].mxu1  ;;  %vm13996_vm7 = vmmov %vm13979_vm0  ;;  %v4413_v20 = vld [vmem:[%s10610_s10 + $0xc8] sm:$0xff] }
 0x4da   : > { %v7880_v56 = vmax.f32 %v7848_v28, 0.0  ;;  %v7818_v13 = vadd.f32 %v13068_v50, %v7779_v48  ;;  %7751 = vst.msk [vmem:[#allocation3 + $0x90] sm:$0xff] %vm13992_vm14, %v7719_v2  ;;  %v7658_v3 = vsel %vm13994_vm2, %v10124_v41, 0.0  ;;  %v7546_v43 = vpop.f32.mrb[85].mxu1  ;;  %vm13997_vm13 = vmmov %vm13979_vm0  ;;  %v4412_v14 = vld [vmem:[%s10610_s10 + $0xc0] sm:$0xff]  ;;  %v14010_v2 = vld [vmem:[#allocation33_spill] sm:$0xff] }
 0x4db   : > { %7913 = vst.msk [vmem:[%s13086_s30 + $0x68] sm:$0xff] %vm13995_vm12, %v7881_v47  ;;  %v7851_v1 = vadd.f32 %v7819_v27, %v4407_v38  ;;  %v7722_v11 = vadd.f32 %v7690_v60, %v7658_v3  ;;  %v7721_v12 = vadd.f32 %v7689_v45, %v7546_v43  ;;  %vm14000_vm1 = vmmov %vm13979_vm0  ;;  %vm14011_vm14 = vnez %v14010_v2  ;;  %v7695_v47 = vld [vmem:[#allocation3 + $0xd0] sm:$0xff] }
 0x4dc   : > { %7912 = vst.msk [vmem:[%s13086_s30 + $0x60] sm:$0xff] %vm13996_vm7, %v7880_v56  ;;  %v7850_v55 = vadd.f32 %v7818_v13, %v4406_v37  ;;  %v7782_v39 = vld [vmem:[#allocation3 + $0x88] sm:$0xff]  ;;  %vm14001_vm3 = vmmov %vm13979_vm0  ;;  %v7696_v37 = vld [vmem:[#allocation3 + $0xd8] sm:$0xff] }
 0x4dd   : > { %v7781_v25 = vld [vmem:[#allocation3 + $0x80] sm:$0xff]  ;;  %v7883_v29 = vmax.f32 %v7851_v1, 0.0  ;;  %v7821_v16 = vadd.f32 %v13068_v50, %v7782_v39  ;;  %7754 = vst.msk [vmem:[#allocation3 + $0xa8] sm:$0xff] %vm13997_vm13, %v7722_v11  ;;  %v10127_v32 = vpop.f32.mrb[86].mxu1  ;;  %vm14002_vm15 = vmmov %vm13979_vm0  ;;  %v4415_v13 = vld [vmem:[%s10610_s10 + $0xd8] sm:$0xff] }
 0x4de   : > { %v7882_v4 = vmax.f32 %v7850_v55, 0.0  ;;  %v7820_v49 = vadd.f32 %v13068_v50, %v7781_v25  ;;  %7753 = vst.msk [vmem:[#allocation3 + $0xa0] sm:$0xff] %vm13979_vm0, %v7721_v12  ;;  %v7660_v7 = vsel %vm13999_vm5, %v10127_v32, 0.0  ;;  %v7556_v58 = vpop.f32.mrb[87].mxu1  ;;  %vm14003_vm8 = vmmov %vm13979_vm0  ;;  %v4414_v60 = vld [vmem:[%s10610_s10 + $0xd0] sm:$0xff] }
 0x4df   : > { %7915 = vst.msk [vmem:[%s13086_s30 + $0x78] sm:$0xff] %vm14000_vm1, %v7883_v29  ;;  %v7853_v0 = vadd.f32 %v7821_v16, %v4409_v8  ;;  %v7724_v57 = vadd.f32 %v7692_v35, %v7660_v7  ;;  %v7723_v42 = vadd.f32 %v7691_v44, %v7556_v58  ;;  %vm14006_vm10 = vmmov %vm13979_vm0  ;;  %v14016_v12 = vld [vmem:[#allocation34_spill] sm:$0xff]  ;;  %v7697_v29 = vld [vmem:[#allocation3 + $0xe0] sm:$0xff] }
 0x4e0   : > { %7914 = vst.msk [vmem:[%s13086_s30 + $0x70] sm:$0xff] %vm14001_vm3, %v7882_v4  ;;  %v7852_v34 = vadd.f32 %v7820_v49, %v4408_v22  ;;  %v7784_v36 = vld [vmem:[#allocation3 + $0x98] sm:$0xff]  ;;  %vm14007_vm6 = vmmov %vm13979_vm0  ;;  %v7698_v22 = vld [vmem:[#allocation3 + $0xe8] sm:$0xff] }
 0x4e1   : > { %v7783_v5 = vld [vmem:[#allocation3 + $0x90] sm:$0xff]  ;;  %v7885_v21 = vmax.f32 %v7853_v0, 0.0  ;;  %v7823_v26 = vadd.f32 %v13068_v50, %v7784_v36  ;;  %7756 = vst.msk [vmem:[#allocation3 + $0xb8] sm:$0xff] %vm14002_vm15, %v7724_v57  ;;  %v10130_v9 = vpop.f32.mrb[88].mxu1  ;;  %vm14008_vm4 = vmmov %vm13979_vm0  ;;  %v4417_v49 = vld [vmem:[%s10610_s10 + $0xe8] sm:$0xff] }
 0x4e2   : > { %v7884_v24 = vmax.f32 %v7852_v34, 0.0  ;;  %v7822_v33 = vadd.f32 %v13068_v50, %v7783_v5  ;;  %7755 = vst.msk [vmem:[#allocation3 + $0xb0] sm:$0xff] %vm14003_vm8, %v7723_v42  ;;  %v7662_v10 = vsel %vm14005_vm9, %v10130_v9, 0.0  ;;  %v7566_v63 = vpop.f32.mrb[89].mxu1  ;;  %vm14009_vm11 = vmmov %vm13979_vm0  ;;  %v4416_v35 = vld [vmem:[%s10610_s10 + $0xe0] sm:$0xff]  ;;  %v14021_v42 = vld [vmem:[#allocation35_spill] sm:$0xff] }
 0x4e3   : > { %7917 = vst.msk [vmem:[%s13086_s30 + $0x88] sm:$0xff] %vm14006_vm10, %v7885_v21  ;;  %v7855_v18 = vadd.f32 %v7823_v26, %v4411_v62  ;;  %v7726_v54 = vadd.f32 %v7694_v46, %v7662_v10  ;;  %v7725_v53 = vadd.f32 %v7693_v40, %v7566_v63  ;;  %vm14012_vm2 = vmmov %vm13979_vm0  ;;  %vm14022_vm8 = vnez %v14021_v42  ;;  %v7699_v21 = vld [vmem:[#allocation3 + $0xf0] sm:$0xff] }
 0x4e4   : > { %7916 = vst.msk [vmem:[%s13086_s30 + $0x80] sm:$0xff] %vm14007_vm6, %v7884_v24  ;;  %v7854_v19 = vadd.f32 %v7822_v33, %v4410_v15  ;;  %v7786_v61 = vld [vmem:[#allocation3 + $0xa8] sm:$0xff]  ;;  %vm14013_vm12 = vmmov %vm13979_vm0  ;;  %v7700_v15 = vld [vmem:[#allocation3 + $0xf8] sm:$0xff] }
 0x4e5   : > { %v7785_v51 = vld [vmem:[#allocation3 + $0xa0] sm:$0xff]  ;;  %v7887_v59 = vmax.f32 %v7855_v18, 0.0  ;;  %v7825_v28 = vadd.f32 %v13068_v50, %v7786_v61  ;;  %7758 = vst.msk [vmem:[#allocation3 + $0xc8] sm:$0xff] %vm14008_vm4, %v7726_v54  ;;  %vm14014_vm7 = vmmov %vm13979_vm0  ;;  %v4419_v33 = vld [vmem:[%s10610_s10 + $0xf8] sm:$0xff] }
 0x4e6   : > { %v7886_v31 = vmax.f32 %v7854_v19, 0.0  ;;  %v7824_v38 = vadd.f32 %v13068_v50, %v7785_v51  ;;  %7757 = vst.msk [vmem:[#allocation3 + $0xc0] sm:$0xff] %vm14009_vm11, %v7725_v53  ;;  %vm14015_vm13 = vmmov %vm13979_vm0  ;;  %vm14017_vm0 = vnez %v14016_v12  ;;  %v4418_v46 = vld [vmem:[%s10610_s10 + $0xf0] sm:$0xff]  ;;  %v4421_v61 = vld [vmem:[%s10610_s10 + $0x108] sm:$0xff] }
 0x4e7   : > { %v10133_v52 = vpop.f32.mrb[90].mxu1  ;;  %7919 = vst.msk [vmem:[%s13086_s30 + $0x98] sm:$0xff] %vm14012_vm2, %v7887_v59  ;;  %v7857_v56 = vadd.f32 %v7825_v28, %v4413_v20  ;;  %vm14018_vm5 = vmmov %vm14000_vm1  ;;  %v4420_v51 = vld [vmem:[%s10610_s10 + $0x100] sm:$0xff] }
 0x4e8   : > { %v7664_v17 = vsel %vm14011_vm14, %v10133_v52, 0.0  ;;  %v7576_v48 = vpop.f32.mrb[91].mxu1  ;;  %7918 = vst.msk [vmem:[%s13086_s30 + $0x90] sm:$0xff] %vm14013_vm12, %v7886_v31  ;;  %v7856_v27 = vadd.f32 %v7824_v38, %v4412_v14  ;;  %v7788_v3 = vld [vmem:[#allocation3 + $0xb8] sm:$0xff]  ;;  %vm14019_vm3 = vmmov %vm14000_vm1 }
 0x4e9   : > { %v7728_v41 = vadd.f32 %v7696_v37, %v7664_v17  ;;  %v7727_v6 = vadd.f32 %v7695_v47, %v7576_v48  ;;  %v7787_v43 = vld [vmem:[#allocation3 + $0xb0] sm:$0xff]  ;;  %v7889_v45 = vmax.f32 %v7857_v56, 0.0  ;;  %v7827_v55 = vadd.f32 %v13068_v50, %v7788_v3  ;;  %vm14020_vm15 = vmmov %vm14000_vm1  ;;  %v4423_v37 = vld [vmem:[%s10610_s10 + $0x118] sm:$0xff] }
 0x4ea   : > { %v7888_v1 = vmax.f32 %v7856_v27, 0.0  ;;  %v7826_v8 = vadd.f32 %v13068_v50, %v7787_v43  ;;  %vm14023_vm9 = vmmov %vm14000_vm1  ;;  %v4422_v47 = vld [vmem:[%s10610_s10 + $0x110] sm:$0xff] }
 0x4eb   : > { %7760 = vst.msk [vmem:[#allocation3 + $0xd8] sm:$0xff] %vm14014_vm7, %v7728_v41  ;;  %v7859_v4 = vadd.f32 %v7827_v55, %v4415_v13  ;;  %vm14024_vm10 = vmmov %vm14000_vm1 }
 0x4ec   : > { %7759 = vst.msk [vmem:[#allocation3 + $0xd0] sm:$0xff] %vm14015_vm13, %v7727_v6  ;;  %v10136_v11 = vpop.f32.mrb[92].mxu1  ;;  %v7858_v16 = vadd.f32 %v7826_v8, %v4414_v60  ;;  %v7790_v7 = vld [vmem:[#allocation3 + $0xc8] sm:$0xff]  ;;  %vm14025_vm6 = vmmov %vm14000_vm1 }
 0x4ed   : > { %v7666_v39 = vsel %vm14017_vm0, %v10136_v11, 0.0  ;;  %v7586_v25 = vpop.f32.mrb[93].mxu1  ;;  %7921 = vst.msk [vmem:[%s13086_s30 + $0xa8] sm:$0xff] %vm14018_vm5, %v7889_v45  ;;  %v7789_v58 = vld [vmem:[#allocation3 + $0xc0] sm:$0xff]  ;;  %v7891_v44 = vmax.f32 %v7859_v4, 0.0  ;;  %v7829_v34 = vadd.f32 %v13068_v50, %v7790_v7  ;;  %vm14026_vm4 = vmmov %vm14000_vm1 }
 0x4ee   : > { %7920 = vst.msk [vmem:[%s13086_s30 + $0xa0] sm:$0xff] %vm14000_vm1, %v7888_v1  ;;  %v7730_v32 = vadd.f32 %v7698_v22, %v7666_v39  ;;  %v7729_v23 = vadd.f32 %v7697_v29, %v7586_v25  ;;  %v7890_v0 = vmax.f32 %v7858_v16, 0.0  ;;  %v7828_v62 = vadd.f32 %v13068_v50, %v7789_v58  ;;  %vm14027_vm11 = vmmov %vm14000_vm1 }
 0x4ef   : > { %7923 = vst.msk [vmem:[%s13086_s30 + $0xb8] sm:$0xff] %vm14023_vm9, %v7891_v44  ;;  %v7861_v24 = vadd.f32 %v7829_v34, %v4417_v49  ;;  %vm14028_vm14 = vmmov %vm14000_vm1 }
 0x4f0   : > { %7762 = vst.msk [vmem:[#allocation3 + $0xe8] sm:$0xff] %vm14019_vm3, %v7730_v32  ;;  %v7860_v26 = vadd.f32 %v7828_v62, %v4416_v35  ;;  %vm14029_vm2 = vmmov %vm14000_vm1 }
 0x4f1   : > { %7761 = vst.msk [vmem:[#allocation3 + $0xe0] sm:$0xff] %vm14020_vm15, %v7729_v23  ;;  %v7893_v40 = vmax.f32 %v7861_v24, 0.0  ;;  %vm14030_vm12 = vmmov %vm14000_vm1 }
 0x4f2   : > { %v10139_v57 = vpop.f32.mrb[94].mxu1  ;;  %7922 = vst.msk [vmem:[%s13086_s30 + $0xb0] sm:$0xff] %vm14024_vm10, %v7890_v0  ;;  %v7792_v10 = vld [vmem:[#allocation3 + $0xd8] sm:$0xff]  ;;  %v7892_v18 = vmax.f32 %v7860_v26, 0.0  ;;  %vm14031_vm7 = vmmov %vm14000_vm1 }
 0x4f3   : > { %v7668_v36 = vsel %vm14022_vm8, %v10139_v57, 0.0  ;;  %v7596_v5 = vpop.f32.mrb[95].mxu1  ;;  %v7791_v63 = vld [vmem:[#allocation3 + $0xd0] sm:$0xff]  ;;  %v7831_v19 = vadd.f32 %v13068_v50, %v7792_v10  ;;  %7925 = vst.msk [vmem:[%s13086_s30 + $0xc8] sm:$0xff] %vm14027_vm11, %v7893_v40  ;;  %vm14032_vm13 = vmmov %vm14000_vm1 }
 0x4f4   : > { %v7732_v9 = vadd.f32 %v7700_v15, %v7668_v36  ;;  %v7731_v30 = vadd.f32 %v7699_v21, %v7596_v5  ;;  %v7830_v20 = vadd.f32 %v13068_v50, %v7791_v63  ;;  %7924 = vst.msk [vmem:[%s13086_s30 + $0xc0] sm:$0xff] %vm14028_vm14, %v7892_v18  ;;  %vm14033_vm0 = vmmov %vm14000_vm1 }
 0x4f5   : > { %v7863_v54 = vadd.f32 %v7831_v19, %v4419_v33  ;;  %vm14034_vm5 = vmmov %vm14033_vm0 }
 0x4f6   : > { %7764 = vst.msk [vmem:[#allocation3 + $0xf8] sm:$0xff] %vm14025_vm6, %v7732_v9  ;;  %v7862_v53 = vadd.f32 %v7830_v20, %v4418_v46 }
 0x4f7   : > { %7763 = vst.msk [vmem:[#allocation3 + $0xf0] sm:$0xff] %vm14026_vm4, %v7731_v30  ;;  %v7794_v14 = vld [vmem:[#allocation3 + $0xe8] sm:$0xff]  ;;  %v7895_v31 = vmax.f32 %v7863_v54, 0.0 }
 0x4f8   : > { %v7793_v59 = vld [vmem:[#allocation3 + $0xe0] sm:$0xff]  ;;  %v7894_v28 = vmax.f32 %v7862_v53, 0.0  ;;  %v7833_v38 = vadd.f32 %v13068_v50, %v7794_v14 }
 0x4f9   : > { %v7832_v52 = vadd.f32 %v13068_v50, %v7793_v59  ;;  %7927 = vst.msk [vmem:[%s13086_s30 + $0xd8] sm:$0xff] %vm14029_vm2, %v7895_v31 }
 0x4fa   : > { %7926 = vst.msk [vmem:[%s13086_s30 + $0xd0] sm:$0xff] %vm14030_vm12, %v7894_v28  ;;  %v7865_v2 = vadd.f32 %v7833_v38, %v4421_v61 }
 0x4fb   : > { %v7864_v17 = vadd.f32 %v7832_v52, %v4420_v51 }
 0x4fc   : > { %v7897_v27 = vmax.f32 %v7865_v2, 0.0 }
 0x4fd   : > { %v7796_v48 = vld [vmem:[#allocation3 + $0xf8] sm:$0xff]  ;;  %v7896_v13 = vmax.f32 %v7864_v17, 0.0 }
 0x4fe   : > { %v7795_v56 = vld [vmem:[#allocation3 + $0xf0] sm:$0xff]  ;;  %v7835_v41 = vadd.f32 %v13068_v50, %v7796_v48  ;;  %7929 = vst.msk [vmem:[%s13086_s30 + $0xe8] sm:$0xff] %vm14031_vm7, %v7897_v27 }
 0x4ff   : > { %v7834_v6 = vadd.f32 %v13068_v50, %v7795_v56  ;;  %7928 = vst.msk [vmem:[%s13086_s30 + $0xe0] sm:$0xff] %vm14032_vm13, %v7896_v13 }
 0x500   : > { %v7867_v3 = vadd.f32 %v7835_v41, %v4423_v37 }
 0x501   : > { %v7866_v60 = vadd.f32 %v7834_v6, %v4422_v47 }
 0x502   : > { %v7899_v43 = vmax.f32 %v7867_v3, 0.0 }
 0x503   : > { %v7898_v45 = vmax.f32 %v7866_v60, 0.0 }
 0x504   : > { %7931 = vst.msk [vmem:[%s13086_s30 + $0xf8] sm:$0xff] %vm14033_vm0, %v7899_v43 }
 0x505   : > { %7930 = vst.msk [vmem:[%s13086_s30 + $0xf0] sm:$0xff] %vm14034_vm5, %v7898_v45 }
 0x506 PF: > { %s17_s21 = sadd.s32 1, %s10540_s21  }
 0x507   : > { %p14_p4 = scmp.ge.s32.totalorder %s17_s21, 4  }
 0x509   :  { %16 = sbr.rel (!%p14_p4) target bundleno = 1 (0x1), region = 98 }

</bundles_post_ra>
